<compile_context>
chip_gen: v7x
topology: tpu7x:2x2x1
jax: 0.10.0
libtpu: 0.0.40
codegen_flags: <defaults>
</compile_context>

<pallas_src>
import jax
import jax.numpy as jnp
from jax.experimental import pallas as pl
from jax.experimental.pallas import tpu as pltpu

EMBED = 64
HEADS = 4
MLP_HIDDEN = 128
BN_EPS = 1e-5
LN_EPS = 1e-5


# ---------------------------------------------------------------------------
# The single fused kernel (one grid step == one batch element).
#
#   x{i}_ref : (1, T_i, S_i*C)   view of the raw input, S_i = 2^(i+1), T_i = L // S_i
#   w1c{i}   : (4*S_i*C, 64)     combined (dwconv-chain + chpool conv1 + BN) weight
#   b1c      : (5, 64)           combined conv1 biases (BN folded)
#   w2c      : (5, 256, 64)      im2col chpool conv2 weights (BN folded)
#   b2c      : (5, 64)
#   tok_ref  : (6, 64)           row0 = cls_token + pos_embed[0], rows1..5 = pos_embed[1:]
#   ln_ref   : (4, 64)           [ln1_gamma, ln1_beta, ln2_gamma, ln2_beta]
#   wqkv/bqkv, wo/bo, wm1/bm1, wm2/bm2, clsw/clsb : transformer + classifier weights
#   o_ref    : (1, 1, n_classes) softmax class probabilities
# ---------------------------------------------------------------------------
def _fused_kernel(x1_ref, x2_ref, x3_ref, x4_ref, x5_ref,
                  w1c1_ref, w1c2_ref, w1c3_ref, w1c4_ref, w1c5_ref,
                  b1c_ref, w2c_ref, b2c_ref,
                  tok_ref, ln_ref, wqkv_ref, bqkv_ref, wo_ref, bo_ref,
                  wm1_ref, bm1_ref, wm2_ref, bm2_ref, clsw_ref, clsb_ref,
                  o_ref):
    x_refs = (x1_ref, x2_ref, x3_ref, x4_ref, x5_ref)
    w1_refs = (w1c1_ref, w1c2_ref, w1c3_ref, w1c4_ref, w1c5_ref)
    b1c = b1c_ref[...]                      # (5, 64)
    b2c = b2c_ref[...]                      # (5, 64)

    def leaky(z):
        return jnp.where(z >= 0, z, 0.01 * z)

    # ---- 5 chpool branches (dwconv chain folded into conv1's weight) ----
    means = []
    for i in range(5):
        xk = x_refs[i][0]                   # (T, S*C)
        T = xk.shape[0]
        T1, T2 = T - 3, T - 6
        # im2col over the 4 time-shifted windows of the (already window-grouped) input.
        xcat = jnp.concatenate([xk[m:m + T1, :] for m in range(4)], axis=1)  # (T1, 4*S*C)
        h1 = jnp.dot(xcat, w1_refs[i][...], preferred_element_type=jnp.float32)
        h1 = leaky(h1 + b1c[i:i + 1, :])                                     # (T1, 64)
        # chpool conv2: im2col -> single K=256 contraction.
        hcat = jnp.concatenate([h1[r:r + T2, :] for r in range(4)], axis=1)  # (T2, 256)
        h2 = jnp.dot(hcat, w2c_ref[i], preferred_element_type=jnp.float32)
        h2 = leaky(h2 + b2c[i:i + 1, :])                                     # (T2, 64)
        means.append(jnp.mean(h2, axis=0, keepdims=True))                    # (1, 64)

    # ---- token assembly: [cls_token + pos0 ; w_i + pos_i] ----
    tok_add = tok_ref[...]                                                   # (6, 64)
    tokens = jnp.concatenate(
        [tok_add[0:1, :], jnp.concatenate(means, axis=0) + tok_add[1:6, :]], axis=0)

    # ---- transformer block (pre-norm, 4 heads, mlp_ratio=2, eval mode) ----
    ln_p = ln_ref[...]                                                       # (4, 64)

    def layer_norm(z, g, b):
        mu = jnp.mean(z, axis=-1, keepdims=True)
        var = jnp.mean((z - mu) ** 2, axis=-1, keepdims=True)
        return (z - mu) * jax.lax.rsqrt(var + LN_EPS) * g + b

    xn = layer_norm(tokens, ln_p[0:1, :], ln_p[1:2, :])
    qkv = jnp.dot(xn, wqkv_ref[...], preferred_element_type=jnp.float32) + bqkv_ref[...]
    q = qkv[:, 0:EMBED]
    k = qkv[:, EMBED:2 * EMBED]
    v = qkv[:, 2 * EMBED:3 * EMBED]

    Dh = EMBED // HEADS
    scale = 1.0 / (Dh ** 0.5)
    heads = []
    for h in range(HEADS):                  # N=6, tiny per-head work; loop kept for robustness
        sl = slice(h * Dh, (h + 1) * Dh)
        qh, kh, vh = q[:, sl], k[:, sl], v[:, sl]
        s = jnp.dot(qh, kh.T, preferred_element_type=jnp.float32) * scale
        s = s - jnp.max(s, axis=-1, keepdims=True)
        p = jnp.exp(s)
        p = p / jnp.sum(p, axis=-1, keepdims=True)
        heads.append(jnp.dot(p, vh, preferred_element_type=jnp.float32))
    attn = jnp.concatenate(heads, axis=1)                                    # (6, 64)
    attn_out = jnp.dot(attn, wo_ref[...], preferred_element_type=jnp.float32) + bo_ref[...]
    xa = tokens + attn_out

    xn2 = layer_norm(xa, ln_p[2:3, :], ln_p[3:4, :])
    hdn = jnp.dot(xn2, wm1_ref[...], preferred_element_type=jnp.float32) + bm1_ref[...]
    c = jnp.float32(0.7978845608028654)     # sqrt(2/pi), tanh-GELU
    hdn = 0.5 * hdn * (1.0 + jnp.tanh(c * (hdn + 0.044715 * hdn * hdn * hdn)))
    y = jnp.dot(hdn, wm2_ref[...], preferred_element_type=jnp.float32) + bm2_ref[...]
    xf = xa + y

    # ---- classifier on the cls token + softmax ----
    cls = xf[0:1, :]
    logits = jnp.dot(cls, clsw_ref[...], preferred_element_type=jnp.float32) + clsb_ref[...]
    m = jnp.max(logits, axis=-1, keepdims=True)
    e = jnp.exp(logits - m)
    o_ref[0] = e / jnp.sum(e, axis=-1, keepdims=True)


# ---------------------------------------------------------------------------
# Forward wrapper: fold weights, build input views, launch the fused kernel.
# ---------------------------------------------------------------------------
def mscnn_tran_forward(x_bcl, params):
    """x_bcl: (B, n_chans, L) float32, mirroring PyTorch NCW input."""
    B, C, L = x_bcl.shape
    n_classes = params['cls_w'].shape[1]
    x = jnp.transpose(x_bcl, (0, 2, 1)).astype(jnp.float32)          # (B, L, C)

    s_bn = 1.0 / jnp.sqrt(1.0 + jnp.float32(BN_EPS))                 # eval-mode BN scale

    # Effective weights of the composed depthwise chain: temp_w_k[t, c] is an affine
    # function of x[t*2^(k+1) : (t+1)*2^(k+1), c].
    Wk = params['dw_w'][0]                                           # (C, 2)
    Bk = params['dw_b'][0]                                           # (C,)
    eff = []
    for stage in range(1, 6):
        wst = params['dw_w'][stage]
        bst = params['dw_b'][stage]
        Wk = jnp.concatenate([wst[:, :1] * Wk, wst[:, 1:] * Wk], axis=1)   # (C, 2^(stage+1))
        Bk = (wst[:, 0] + wst[:, 1]) * Bk + bst
        eff.append((Wk, Bk))                                         # eff[i] -> temp_w_{i+1}

    x_views, w1c_list, b1c_list, w2c_list, b2c_list = [], [], [], [], []
    for i in range(5):
        W_eff, B_eff = eff[i]                                        # (C, S), (C,)
        S = W_eff.shape[1]                                           # 4, 8, 16, 32, 64
        T = L // S                                                   # length of temp_w_{i+1}
        br = params['chpool'][i]
        W1, b1, W2, b2 = br['W1'], br['b1'], br['W2'], br['b2']
        # Combined (dwconv chain + chpool conv1 + BN) matmul weight/bias.
        w1c = jnp.einsum('cj,dcm->mjcd', W_eff, W1).reshape(4 * S * C, EMBED) * s_bn
        b1c = (b1 + jnp.einsum('c,dcm->d', B_eff, W1)) * s_bn
        # chpool conv2 im2col weight (k*64 + e, d) = W2[d, e, k], BN folded.
        w2c = jnp.transpose(W2, (2, 1, 0)).reshape(4 * EMBED, EMBED) * s_bn
        b2c = b2 * s_bn
        x_views.append(x[:, :T * S, :].reshape(B, T, S * C))
        w1c_list.append(w1c)
        b1c_list.append(b1c)
        w2c_list.append(w2c)
        b2c_list.append(b2c)

    b1c = jnp.stack(b1c_list, axis=0)                                # (5, 64)
    w2c = jnp.stack(w2c_list, axis=0)                                # (5, 256, 64)
    b2c = jnp.stack(b2c_list, axis=0)                                # (5, 64)

    tb = params['tblock']
    wqkv = jnp.concatenate([tb['wq'], tb['wk'], tb['wv']], axis=1)   # (64, 192)
    bqkv = jnp.concatenate([tb['bq'], tb['bk'], tb['bv']], axis=1)   # (1, 192)
    lnp = jnp.concatenate([tb['ln1g'], tb['ln1b'], tb['ln2g'], tb['ln2b']], axis=0)  # (4, 64)
    tok_add = jnp.concatenate(
        [params['cls_token'][0] + params['pos_embed'][0, :1, :],
         params['pos_embed'][0, 1:, :]], axis=0)                     # (6, 64)

    args = (x_views + w1c_list +
            [b1c, w2c, b2c, tok_add, lnp, wqkv, bqkv,
             tb['wo'], tb['bo'], tb['wm1'], tb['bm1'], tb['wm2'], tb['bm2'],
             params['cls_w'], params['cls_b']])

    in_specs = []
    for xv in x_views:
        in_specs.append(pl.BlockSpec((1,) + xv.shape[1:], lambda b: (b, 0, 0)))
    for a in args[5:]:
        in_specs.append(pl.BlockSpec(a.shape, lambda b, _n=a.ndim: (0,) * _n))

    out = pl.pallas_call(
        _fused_kernel,
        out_shape=jax.ShapeDtypeStruct((B, 1, n_classes), jnp.float32),
        grid=(B,),
        in_specs=in_specs,
        out_specs=pl.BlockSpec((1, 1, n_classes), lambda b: (b, 0, 0)),
        compiler_params=pltpu.CompilerParams(
            dimension_semantics=("parallel",)),
    )(*args)
    return out[:, 0, :]                                              # (B, n_classes)


# ---------------------------------------------------------------------------
# Parameter init (deterministic, synthetic).
# ---------------------------------------------------------------------------
def init_params(key, n_chans, n_classes):
    C = n_chans
    keys = iter(jax.random.split(key, 48))

    def rnd(shape, scale):
        return (scale * jax.random.normal(next(keys), shape)).astype(jnp.float32)

    p = {}
    p['dw_w'] = rnd((6, C, 2), 0.3)          # depthwise Conv1d weights (per stage: (C, 2))
    p['dw_b'] = rnd((6, C), 0.1)

    p['chpool'] = [
        {'W1': rnd((EMBED, C, 4), 0.2),      # PyTorch Conv1d weight layout (out, in, k)
         'b1': rnd((EMBED,), 0.1),
         'W2': rnd((EMBED, EMBED, 4), 0.08),
         'b2': rnd((EMBED,), 0.1)}
        for _ in range(5)]

    D, Hd = EMBED, MLP_HIDDEN
    p['tblock'] = {                          # only the LAST block is applied (forward quirk)
        'ln1g': jnp.ones((1, D), jnp.float32), 'ln1b': jnp.zeros((1, D), jnp.float32),
        'wq': rnd((D, D), 0.1), 'bq': rnd((1, D), 0.05),
        'wk': rnd((D, D), 0.1), 'bk': rnd((1, D), 0.05),
        'wv': rnd((D, D), 0.1), 'bv': rnd((1, D), 0.05),
        'wo': rnd((D, D), 0.1), 'bo': rnd((1, D), 0.05),
        'ln2g': jnp.ones((1, D), jnp.float32), 'ln2b': jnp.zeros((1, D), jnp.float32),
        'wm1': rnd((D, Hd), 0.1), 'bm1': rnd((1, Hd), 0.05),
        'wm2': rnd((Hd, D), 0.1), 'bm2': rnd((1, D), 0.05),
    }

    # torch initializes these to zeros; small random values here to exercise the path.
    p['pos_embed'] = rnd((1, 6, EMBED), 0.05)
    p['cls_token'] = rnd((1, 1, EMBED), 0.05)
    p['cls_w'] = rnd((EMBED, n_classes), 0.1)
    p['cls_b'] = rnd((1, n_classes), 0.05)
    return p


# ---------------------------------------------------------------------------
# Pure-JAX reference (stage-by-stage, no weight folding) for runtime verification.
# ---------------------------------------------------------------------------
def reference_forward(x_bcl, params):
    hp = jax.lax.Precision.HIGHEST
    x = jnp.transpose(x_bcl, (0, 2, 1)).astype(jnp.float32)          # (B, L, C)

    # depthwise Conv1d(k=2, s=2, groups=C) chain
    t = x
    temps = []
    for i in range(6):
        w, b = params['dw_w'][i], params['dw_b'][i]
        To = (t.shape[1] - 2) // 2 + 1
        t = t[:, 0:2 * To:2, :] * w[:, 0] + t[:, 1:2 * To:2, :] * w[:, 1] + b
        temps.append(t)

    s_bn = 1.0 / jnp.sqrt(1.0 + jnp.float32(BN_EPS))

    def leaky(z):
        return jnp.where(z >= 0, z, 0.01 * z)

    ws = []
    for i in range(5):
        br = params['chpool'][i]
        W1, b1, W2, b2 = br['W1'], br['b1'], br['W2'], br['b2']
        xin = temps[i + 1]
        T = xin.shape[1]
        T1, T2 = T - 3, T - 6
        acc1 = sum(jnp.einsum('btc,dc->btd', xin[:, k:k + T1, :], W1[:, :, k],
                              precision=hp) for k in range(4)) + b1
        h1 = leaky(acc1 * s_bn)
        acc2 = sum(jnp.einsum('bte,de->btd', h1[:, k:k + T2, :], W2[:, :, k],
                              precision=hp) for k in range(4)) + b2
        h2 = leaky(acc2 * s_bn)
        ws.append(jnp.mean(h2, axis=1))                              # (B, 64)
    w = jnp.stack(ws, axis=1)                                        # (B, 5, 64)

    w = w + params['pos_embed'][:, 1:, :]
    cls_tok = params['cls_token'] + params['pos_embed'][:, :1, :]
    w = jnp.concatenate([jnp.broadcast_to(cls_tok, (w.shape[0], 1, EMBED)), w], axis=1)

    tb = params['tblock']
    B, N, D = w.shape
    Dh = D // HEADS

    def ln(z, g, b):
        mu = jnp.mean(z, axis=-1, keepdims=True)
        var = jnp.mean((z - mu) ** 2, axis=-1, keepdims=True)
        return (z - mu) * jax.lax.rsqrt(var + LN_EPS) * g + b

    xn = ln(w, tb['ln1g'], tb['ln1b'])
    q = (jnp.einsum('bnd,de->bne', xn, tb['wq'], precision=hp) + tb['bq']).reshape(B, N, HEADS, Dh)
    k = (jnp.einsum('bnd,de->bne', xn, tb['wk'], precision=hp) + tb['bk']).reshape(B, N, HEADS, Dh)
    v = (jnp.einsum('bnd,de->bne', xn, tb['wv'], precision=hp) + tb['bv']).reshape(B, N, HEADS, Dh)
    s_att = jnp.einsum('bnhd,bmhd->bhnm', q, k, precision=hp) / jnp.sqrt(jnp.float32(Dh))
    p_attn = jax.nn.softmax(s_att, axis=-1)
    o = jnp.einsum('bhnm,bmhd->bnhd', p_attn, v, precision=hp).reshape(B, N, D)
    attn_out = jnp.einsum('bnd,de->bne', o, tb['wo'], precision=hp) + tb['bo']
    xr = w + attn_out
    xn2 = ln(xr, tb['ln2g'], tb['ln2b'])
    h = jnp.einsum('bnd,dh->bnh', xn2, tb['wm1'], precision=hp) + tb['bm1']
    c = 0.7978845608028654
    h = 0.5 * h * (1.0 + jnp.tanh(c * (h + 0.044715 * h ** 3)))
    y = jnp.einsum('bnh,hd->bnd', h, tb['wm2'], precision=hp) + tb['bm2']
    xr = xr + y

    cls = xr[:, 0, :]
    logits = jnp.einsum('bd,dk->bk', cls, params['cls_w'], precision=hp) + params['cls_b']
    return jax.nn.softmax(logits, axis=-1)


if __name__ == "__main__":
    B, C, L, n_classes = 2, 4, 512, 3   # L >= 448 required for the smallest chpool branch
    key = jax.random.PRNGKey(0)
    pkey, xkey = jax.random.split(key)
    params = init_params(pkey, C, n_classes)
    x = jax.random.normal(xkey, (B, C, L), dtype=jnp.float32)

    out = jax.jit(mscnn_tran_forward)(x, params)
    out = jax.block_until_ready(out)

    ref = reference_forward(x, params)
    assert out.shape == (B, n_classes), out.shape
    assert bool(jnp.all(jnp.isfinite(out)))
    assert bool(jnp.allclose(jnp.sum(out, axis=-1), 1.0, atol=1e-4))
    assert bool(jnp.allclose(out, ref, atol=2e-3, rtol=2e-3)), (out, ref)
    print("KERNEL_OK")
</pallas_src>

<mosaic_0001>
module attributes {stable_mosaic.version = 11 : i64} {
  func.func @_fused_kernel(%arg0: i32, %arg1: memref<1x128x16xf32, #tpu.memory_space<vmem>>, %arg2: memref<1x64x32xf32, #tpu.memory_space<vmem>>, %arg3: memref<1x32x64xf32, #tpu.memory_space<vmem>>, %arg4: memref<1x16x128xf32, #tpu.memory_space<vmem>>, %arg5: memref<1x8x256xf32, #tpu.memory_space<vmem>>, %arg6: memref<64x64xf32, #tpu.memory_space<vmem>>, %arg7: memref<128x64xf32, #tpu.memory_space<vmem>>, %arg8: memref<256x64xf32, #tpu.memory_space<vmem>>, %arg9: memref<512x64xf32, #tpu.memory_space<vmem>>, %arg10: memref<1024x64xf32, #tpu.memory_space<vmem>>, %arg11: memref<5x64xf32, #tpu.memory_space<vmem>>, %arg12: memref<5x256x64xf32, #tpu.memory_space<vmem>>, %arg13: memref<5x64xf32, #tpu.memory_space<vmem>>, %arg14: memref<6x64xf32, #tpu.memory_space<vmem>>, %arg15: memref<4x64xf32, #tpu.memory_space<vmem>>, %arg16: memref<64x192xf32, #tpu.memory_space<vmem>>, %arg17: memref<1x192xf32, #tpu.memory_space<vmem>>, %arg18: memref<64x64xf32, #tpu.memory_space<vmem>>, %arg19: memref<1x64xf32, #tpu.memory_space<vmem>>, %arg20: memref<64x128xf32, #tpu.memory_space<vmem>>, %arg21: memref<1x128xf32, #tpu.memory_space<vmem>>, %arg22: memref<128x64xf32, #tpu.memory_space<vmem>>, %arg23: memref<1x64xf32, #tpu.memory_space<vmem>>, %arg24: memref<64x3xf32, #tpu.memory_space<vmem>>, %arg25: memref<1x3xf32, #tpu.memory_space<vmem>>, %arg26: memref<1x1x3xf32, #tpu.memory_space<vmem>>) attributes {dimension_semantics = [#tpu.dimension_semantics<parallel>], iteration_bounds = array<i64: 2>, scalar_prefetch = 0 : i64, scratch_operands = 0 : i64, tpu.core_type = #tpu.core_type<tc>, window_params = [{transform_indices = @transform_0, window_bounds = array<i64: 1, 128, 16>}, {transform_indices = @transform_1, window_bounds = array<i64: 1, 64, 32>}, {transform_indices = @transform_2, window_bounds = array<i64: 1, 32, 64>}, {transform_indices = @transform_3, window_bounds = array<i64: 1, 16, 128>}, {transform_indices = @transform_4, window_bounds = array<i64: 1, 8, 256>}, {pipeline_mode = #tpu.pipeline_mode<synchronous>, transform_indices = @transform_5, window_bounds = array<i64: 64, 64>}, {pipeline_mode = #tpu.pipeline_mode<synchronous>, transform_indices = @transform_6, window_bounds = array<i64: 128, 64>}, {pipeline_mode = #tpu.pipeline_mode<synchronous>, transform_indices = @transform_7, window_bounds = array<i64: 256, 64>}, {pipeline_mode = #tpu.pipeline_mode<synchronous>, transform_indices = @transform_8, window_bounds = array<i64: 512, 64>}, {pipeline_mode = #tpu.pipeline_mode<synchronous>, transform_indices = @transform_9, window_bounds = array<i64: 1024, 64>}, {pipeline_mode = #tpu.pipeline_mode<synchronous>, transform_indices = @transform_10, window_bounds = array<i64: 5, 64>}, {pipeline_mode = #tpu.pipeline_mode<synchronous>, transform_indices = @transform_11, window_bounds = array<i64: 5, 256, 64>}, {pipeline_mode = #tpu.pipeline_mode<synchronous>, transform_indices = @transform_12, window_bounds = array<i64: 5, 64>}, {pipeline_mode = #tpu.pipeline_mode<synchronous>, transform_indices = @transform_13, window_bounds = array<i64: 6, 64>}, {pipeline_mode = #tpu.pipeline_mode<synchronous>, transform_indices = @transform_14, window_bounds = array<i64: 4, 64>}, {pipeline_mode = #tpu.pipeline_mode<synchronous>, transform_indices = @transform_15, window_bounds = array<i64: 64, 192>}, {pipeline_mode = #tpu.pipeline_mode<synchronous>, transform_indices = @transform_16, window_bounds = array<i64: 1, 192>}, {pipeline_mode = #tpu.pipeline_mode<synchronous>, transform_indices = @transform_17, window_bounds = array<i64: 64, 64>}, {pipeline_mode = #tpu.pipeline_mode<synchronous>, transform_indices = @transform_18, window_bounds = array<i64: 1, 64>}, {pipeline_mode = #tpu.pipeline_mode<synchronous>, transform_indices = @transform_19, window_bounds = array<i64: 64, 128>}, {pipeline_mode = #tpu.pipeline_mode<synchronous>, transform_indices = @transform_20, window_bounds = array<i64: 1, 128>}, {pipeline_mode = #tpu.pipeline_mode<synchronous>, transform_indices = @transform_21, window_bounds = array<i64: 128, 64>}, {pipeline_mode = #tpu.pipeline_mode<synchronous>, transform_indices = @transform_22, window_bounds = array<i64: 1, 64>}, {pipeline_mode = #tpu.pipeline_mode<synchronous>, transform_indices = @transform_23, window_bounds = array<i64: 64, 3>}, {pipeline_mode = #tpu.pipeline_mode<synchronous>, transform_indices = @transform_24, window_bounds = array<i64: 1, 3>}, {transform_indices = @transform_25, window_bounds = array<i64: 1, 1, 3>}]} {
    %c0 = arith.constant 0 : index
    %c0_0 = arith.constant 0 : index
    %0 = vector.load %arg11[%c0, %c0_0] : memref<5x64xf32, #tpu.memory_space<vmem>>, vector<5x64xf32>
    %c0_1 = arith.constant 0 : index
    %c0_2 = arith.constant 0 : index
    %1 = vector.load %arg13[%c0_1, %c0_2] : memref<5x64xf32, #tpu.memory_space<vmem>>, vector<5x64xf32>
    %c0_3 = arith.constant 0 : index
    %c0_4 = arith.constant 0 : index
    %c0_5 = arith.constant 0 : index
    %2 = vector.load %arg1[%c0_3, %c0_4, %c0_5] : memref<1x128x16xf32, #tpu.memory_space<vmem>>, vector<1x128x16xf32>
    %3 = vector.shape_cast %2 : vector<1x128x16xf32> to vector<128x16xf32>
    %4 = vector.extract_strided_slice %3 {offsets = [0, 0], sizes = [125, 16], strides = [1, 1]} : vector<128x16xf32> to vector<125x16xf32>
    %5 = vector.extract_strided_slice %3 {offsets = [1, 0], sizes = [125, 16], strides = [1, 1]} : vector<128x16xf32> to vector<125x16xf32>
    %6 = vector.extract_strided_slice %3 {offsets = [2, 0], sizes = [125, 16], strides = [1, 1]} : vector<128x16xf32> to vector<125x16xf32>
    %7 = vector.extract_strided_slice %3 {offsets = [3, 0], sizes = [125, 16], strides = [1, 1]} : vector<128x16xf32> to vector<125x16xf32>
    %8 = tpu.concatenate %4, %5, %6, %7 in 1 : vector<125x16xf32>, vector<125x16xf32>, vector<125x16xf32>, vector<125x16xf32> -> vector<125x64xf32>
    %c0_6 = arith.constant 0 : index
    %c0_7 = arith.constant 0 : index
    %9 = vector.load %arg6[%c0_6, %c0_7] : memref<64x64xf32, #tpu.memory_space<vmem>>, vector<64x64xf32>
    %cst = arith.constant dense<0.000000e+00> : vector<125x64xf32>
    %10 = tpu.matmul %8, %9, %cst {dimension_numbers = #tpu.dot_dimension_numbers<[1], [0], [0], [1], [0, 0, 1, 1], [], []>} : vector<125x64xf32>, vector<64x64xf32>, vector<125x64xf32> -> vector<125x64xf32>
    %11 = vector.extract_strided_slice %0 {offsets = [0, 0], sizes = [1, 64], strides = [1, 1]} : vector<5x64xf32> to vector<1x64xf32>
    %12 = vector.broadcast %11 : vector<1x64xf32> to vector<125x64xf32>
    %13 = arith.addf %10, %12 : vector<125x64xf32>
    %cst_8 = arith.constant 0.000000e+00 : f32
    %14 = vector.broadcast %cst_8 : f32 to vector<125x64xf32>
    %15 = arith.cmpf oge, %13, %14 : vector<125x64xf32>
    %cst_9 = arith.constant 0.00999999977 : f32
    %16 = vector.broadcast %cst_9 : f32 to vector<125x64xf32>
    %17 = arith.mulf %16, %13 : vector<125x64xf32>
    %18 = arith.select %15, %13, %17 : vector<125x64xi1>, vector<125x64xf32>
    %19 = vector.extract_strided_slice %18 {offsets = [0, 0], sizes = [122, 64], strides = [1, 1]} : vector<125x64xf32> to vector<122x64xf32>
    %20 = vector.extract_strided_slice %18 {offsets = [1, 0], sizes = [122, 64], strides = [1, 1]} : vector<125x64xf32> to vector<122x64xf32>
    %21 = vector.extract_strided_slice %18 {offsets = [2, 0], sizes = [122, 64], strides = [1, 1]} : vector<125x64xf32> to vector<122x64xf32>
    %22 = vector.extract_strided_slice %18 {offsets = [3, 0], sizes = [122, 64], strides = [1, 1]} : vector<125x64xf32> to vector<122x64xf32>
    %23 = tpu.concatenate %19, %20, %21, %22 in 1 : vector<122x64xf32>, vector<122x64xf32>, vector<122x64xf32>, vector<122x64xf32> -> vector<122x256xf32>
    %c0_10 = arith.constant 0 : index
    %c0_11 = arith.constant 0 : index
    %c0_12 = arith.constant 0 : index
    %24 = vector.load %arg12[%c0_10, %c0_11, %c0_12] : memref<5x256x64xf32, #tpu.memory_space<vmem>>, vector<1x256x64xf32>
    %25 = vector.shape_cast %24 : vector<1x256x64xf32> to vector<256x64xf32>
    %cst_13 = arith.constant dense<0.000000e+00> : vector<122x64xf32>
    %26 = tpu.matmul %23, %25, %cst_13 {dimension_numbers = #tpu.dot_dimension_numbers<[1], [0], [0], [1], [0, 0, 1, 1], [], []>} : vector<122x256xf32>, vector<256x64xf32>, vector<122x64xf32> -> vector<122x64xf32>
    %27 = vector.extract_strided_slice %1 {offsets = [0, 0], sizes = [1, 64], strides = [1, 1]} : vector<5x64xf32> to vector<1x64xf32>
    %28 = vector.broadcast %27 : vector<1x64xf32> to vector<122x64xf32>
    %29 = arith.addf %26, %28 : vector<122x64xf32>
    %cst_14 = arith.constant 0.000000e+00 : f32
    %30 = vector.broadcast %cst_14 : f32 to vector<122x64xf32>
    %31 = arith.cmpf oge, %29, %30 : vector<122x64xf32>
    %cst_15 = arith.constant 0.00999999977 : f32
    %32 = vector.broadcast %cst_15 : f32 to vector<122x64xf32>
    %33 = arith.mulf %32, %29 : vector<122x64xf32>
    %34 = arith.select %31, %29, %33 : vector<122x64xi1>, vector<122x64xf32>
    %cst_16 = arith.constant dense<0.000000e+00> : vector<64xf32>
    %35 = vector.multi_reduction <add>, %34, %cst_16 [0] : vector<122x64xf32> to vector<64xf32>
    %36 = vector.shape_cast %35 : vector<64xf32> to vector<1x64xf32>
    %cst_17 = arith.constant 1.220000e+02 : f32
    %37 = vector.broadcast %cst_17 : f32 to vector<1x64xf32>
    %38 = arith.divf %36, %37 : vector<1x64xf32>
    %c0_18 = arith.constant 0 : index
    %c0_19 = arith.constant 0 : index
    %c0_20 = arith.constant 0 : index
    %39 = vector.load %arg2[%c0_18, %c0_19, %c0_20] : memref<1x64x32xf32, #tpu.memory_space<vmem>>, vector<1x64x32xf32>
    %40 = vector.shape_cast %39 : vector<1x64x32xf32> to vector<64x32xf32>
    %41 = vector.extract_strided_slice %40 {offsets = [0, 0], sizes = [61, 32], strides = [1, 1]} : vector<64x32xf32> to vector<61x32xf32>
    %42 = vector.extract_strided_slice %40 {offsets = [1, 0], sizes = [61, 32], strides = [1, 1]} : vector<64x32xf32> to vector<61x32xf32>
    %43 = vector.extract_strided_slice %40 {offsets = [2, 0], sizes = [61, 32], strides = [1, 1]} : vector<64x32xf32> to vector<61x32xf32>
    %44 = vector.extract_strided_slice %40 {offsets = [3, 0], sizes = [61, 32], strides = [1, 1]} : vector<64x32xf32> to vector<61x32xf32>
    %45 = tpu.concatenate %41, %42, %43, %44 in 1 : vector<61x32xf32>, vector<61x32xf32>, vector<61x32xf32>, vector<61x32xf32> -> vector<61x128xf32>
    %c0_21 = arith.constant 0 : index
    %c0_22 = arith.constant 0 : index
    %46 = vector.load %arg7[%c0_21, %c0_22] : memref<128x64xf32, #tpu.memory_space<vmem>>, vector<128x64xf32>
    %cst_23 = arith.constant dense<0.000000e+00> : vector<61x64xf32>
    %47 = tpu.matmul %45, %46, %cst_23 {dimension_numbers = #tpu.dot_dimension_numbers<[1], [0], [0], [1], [0, 0, 1, 1], [], []>} : vector<61x128xf32>, vector<128x64xf32>, vector<61x64xf32> -> vector<61x64xf32>
    %48 = vector.extract_strided_slice %0 {offsets = [1, 0], sizes = [1, 64], strides = [1, 1]} : vector<5x64xf32> to vector<1x64xf32>
    %49 = vector.broadcast %48 : vector<1x64xf32> to vector<61x64xf32>
    %50 = arith.addf %47, %49 : vector<61x64xf32>
    %cst_24 = arith.constant 0.000000e+00 : f32
    %51 = vector.broadcast %cst_24 : f32 to vector<61x64xf32>
    %52 = arith.cmpf oge, %50, %51 : vector<61x64xf32>
    %cst_25 = arith.constant 0.00999999977 : f32
    %53 = vector.broadcast %cst_25 : f32 to vector<61x64xf32>
    %54 = arith.mulf %53, %50 : vector<61x64xf32>
    %55 = arith.select %52, %50, %54 : vector<61x64xi1>, vector<61x64xf32>
    %56 = vector.extract_strided_slice %55 {offsets = [0, 0], sizes = [58, 64], strides = [1, 1]} : vector<61x64xf32> to vector<58x64xf32>
    %57 = vector.extract_strided_slice %55 {offsets = [1, 0], sizes = [58, 64], strides = [1, 1]} : vector<61x64xf32> to vector<58x64xf32>
    %58 = vector.extract_strided_slice %55 {offsets = [2, 0], sizes = [58, 64], strides = [1, 1]} : vector<61x64xf32> to vector<58x64xf32>
    %59 = vector.extract_strided_slice %55 {offsets = [3, 0], sizes = [58, 64], strides = [1, 1]} : vector<61x64xf32> to vector<58x64xf32>
    %60 = tpu.concatenate %56, %57, %58, %59 in 1 : vector<58x64xf32>, vector<58x64xf32>, vector<58x64xf32>, vector<58x64xf32> -> vector<58x256xf32>
    %c1 = arith.constant 1 : index
    %c0_26 = arith.constant 0 : index
    %c0_27 = arith.constant 0 : index
    %61 = vector.load %arg12[%c1, %c0_26, %c0_27] : memref<5x256x64xf32, #tpu.memory_space<vmem>>, vector<1x256x64xf32>
    %62 = vector.shape_cast %61 : vector<1x256x64xf32> to vector<256x64xf32>
    %cst_28 = arith.constant dense<0.000000e+00> : vector<58x64xf32>
    %63 = tpu.matmul %60, %62, %cst_28 {dimension_numbers = #tpu.dot_dimension_numbers<[1], [0], [0], [1], [0, 0, 1, 1], [], []>} : vector<58x256xf32>, vector<256x64xf32>, vector<58x64xf32> -> vector<58x64xf32>
    %64 = vector.extract_strided_slice %1 {offsets = [1, 0], sizes = [1, 64], strides = [1, 1]} : vector<5x64xf32> to vector<1x64xf32>
    %65 = vector.broadcast %64 : vector<1x64xf32> to vector<58x64xf32>
    %66 = arith.addf %63, %65 : vector<58x64xf32>
    %cst_29 = arith.constant 0.000000e+00 : f32
    %67 = vector.broadcast %cst_29 : f32 to vector<58x64xf32>
    %68 = arith.cmpf oge, %66, %67 : vector<58x64xf32>
    %cst_30 = arith.constant 0.00999999977 : f32
    %69 = vector.broadcast %cst_30 : f32 to vector<58x64xf32>
    %70 = arith.mulf %69, %66 : vector<58x64xf32>
    %71 = arith.select %68, %66, %70 : vector<58x64xi1>, vector<58x64xf32>
    %cst_31 = arith.constant dense<0.000000e+00> : vector<64xf32>
    %72 = vector.multi_reduction <add>, %71, %cst_31 [0] : vector<58x64xf32> to vector<64xf32>
    %73 = vector.shape_cast %72 : vector<64xf32> to vector<1x64xf32>
    %cst_32 = arith.constant 5.800000e+01 : f32
    %74 = vector.broadcast %cst_32 : f32 to vector<1x64xf32>
    %75 = arith.divf %73, %74 : vector<1x64xf32>
    %c0_33 = arith.constant 0 : index
    %c0_34 = arith.constant 0 : index
    %c0_35 = arith.constant 0 : index
    %76 = vector.load %arg3[%c0_33, %c0_34, %c0_35] : memref<1x32x64xf32, #tpu.memory_space<vmem>>, vector<1x32x64xf32>
    %77 = vector.shape_cast %76 : vector<1x32x64xf32> to vector<32x64xf32>
    %78 = vector.extract_strided_slice %77 {offsets = [0, 0], sizes = [29, 64], strides = [1, 1]} : vector<32x64xf32> to vector<29x64xf32>
    %79 = vector.extract_strided_slice %77 {offsets = [1, 0], sizes = [29, 64], strides = [1, 1]} : vector<32x64xf32> to vector<29x64xf32>
    %80 = vector.extract_strided_slice %77 {offsets = [2, 0], sizes = [29, 64], strides = [1, 1]} : vector<32x64xf32> to vector<29x64xf32>
    %81 = vector.extract_strided_slice %77 {offsets = [3, 0], sizes = [29, 64], strides = [1, 1]} : vector<32x64xf32> to vector<29x64xf32>
    %82 = tpu.concatenate %78, %79, %80, %81 in 1 : vector<29x64xf32>, vector<29x64xf32>, vector<29x64xf32>, vector<29x64xf32> -> vector<29x256xf32>
    %c0_36 = arith.constant 0 : index
    %c0_37 = arith.constant 0 : index
    %83 = vector.load %arg8[%c0_36, %c0_37] : memref<256x64xf32, #tpu.memory_space<vmem>>, vector<256x64xf32>
    %cst_38 = arith.constant dense<0.000000e+00> : vector<29x64xf32>
    %84 = tpu.matmul %82, %83, %cst_38 {dimension_numbers = #tpu.dot_dimension_numbers<[1], [0], [0], [1], [0, 0, 1, 1], [], []>} : vector<29x256xf32>, vector<256x64xf32>, vector<29x64xf32> -> vector<29x64xf32>
    %85 = vector.extract_strided_slice %0 {offsets = [2, 0], sizes = [1, 64], strides = [1, 1]} : vector<5x64xf32> to vector<1x64xf32>
    %86 = vector.broadcast %85 : vector<1x64xf32> to vector<29x64xf32>
    %87 = arith.addf %84, %86 : vector<29x64xf32>
    %cst_39 = arith.constant 0.000000e+00 : f32
    %88 = vector.broadcast %cst_39 : f32 to vector<29x64xf32>
    %89 = arith.cmpf oge, %87, %88 : vector<29x64xf32>
    %cst_40 = arith.constant 0.00999999977 : f32
    %90 = vector.broadcast %cst_40 : f32 to vector<29x64xf32>
    %91 = arith.mulf %90, %87 : vector<29x64xf32>
    %92 = arith.select %89, %87, %91 : vector<29x64xi1>, vector<29x64xf32>
    %93 = vector.extract_strided_slice %92 {offsets = [0, 0], sizes = [26, 64], strides = [1, 1]} : vector<29x64xf32> to vector<26x64xf32>
    %94 = vector.extract_strided_slice %92 {offsets = [1, 0], sizes = [26, 64], strides = [1, 1]} : vector<29x64xf32> to vector<26x64xf32>
    %95 = vector.extract_strided_slice %92 {offsets = [2, 0], sizes = [26, 64], strides = [1, 1]} : vector<29x64xf32> to vector<26x64xf32>
    %96 = vector.extract_strided_slice %92 {offsets = [3, 0], sizes = [26, 64], strides = [1, 1]} : vector<29x64xf32> to vector<26x64xf32>
    %97 = tpu.concatenate %93, %94, %95, %96 in 1 : vector<26x64xf32>, vector<26x64xf32>, vector<26x64xf32>, vector<26x64xf32> -> vector<26x256xf32>
    %c2 = arith.constant 2 : index
    %c0_41 = arith.constant 0 : index
    %c0_42 = arith.constant 0 : index
    %98 = vector.load %arg12[%c2, %c0_41, %c0_42] : memref<5x256x64xf32, #tpu.memory_space<vmem>>, vector<1x256x64xf32>
    %99 = vector.shape_cast %98 : vector<1x256x64xf32> to vector<256x64xf32>
    %cst_43 = arith.constant dense<0.000000e+00> : vector<26x64xf32>
    %100 = tpu.matmul %97, %99, %cst_43 {dimension_numbers = #tpu.dot_dimension_numbers<[1], [0], [0], [1], [0, 0, 1, 1], [], []>} : vector<26x256xf32>, vector<256x64xf32>, vector<26x64xf32> -> vector<26x64xf32>
    %101 = vector.extract_strided_slice %1 {offsets = [2, 0], sizes = [1, 64], strides = [1, 1]} : vector<5x64xf32> to vector<1x64xf32>
    %102 = vector.broadcast %101 : vector<1x64xf32> to vector<26x64xf32>
    %103 = arith.addf %100, %102 : vector<26x64xf32>
    %cst_44 = arith.constant 0.000000e+00 : f32
    %104 = vector.broadcast %cst_44 : f32 to vector<26x64xf32>
    %105 = arith.cmpf oge, %103, %104 : vector<26x64xf32>
    %cst_45 = arith.constant 0.00999999977 : f32
    %106 = vector.broadcast %cst_45 : f32 to vector<26x64xf32>
    %107 = arith.mulf %106, %103 : vector<26x64xf32>
    %108 = arith.select %105, %103, %107 : vector<26x64xi1>, vector<26x64xf32>
    %cst_46 = arith.constant dense<0.000000e+00> : vector<64xf32>
    %109 = vector.multi_reduction <add>, %108, %cst_46 [0] : vector<26x64xf32> to vector<64xf32>
    %110 = vector.shape_cast %109 : vector<64xf32> to vector<1x64xf32>
    %cst_47 = arith.constant 2.600000e+01 : f32
    %111 = vector.broadcast %cst_47 : f32 to vector<1x64xf32>
    %112 = arith.divf %110, %111 : vector<1x64xf32>
    %c0_48 = arith.constant 0 : index
    %c0_49 = arith.constant 0 : index
    %c0_50 = arith.constant 0 : index
    %113 = vector.load %arg4[%c0_48, %c0_49, %c0_50] : memref<1x16x128xf32, #tpu.memory_space<vmem>>, vector<1x16x128xf32>
    %114 = vector.shape_cast %113 : vector<1x16x128xf32> to vector<16x128xf32>
    %115 = vector.extract_strided_slice %114 {offsets = [0, 0], sizes = [13, 128], strides = [1, 1]} : vector<16x128xf32> to vector<13x128xf32>
    %116 = vector.extract_strided_slice %114 {offsets = [1, 0], sizes = [13, 128], strides = [1, 1]} : vector<16x128xf32> to vector<13x128xf32>
    %117 = vector.extract_strided_slice %114 {offsets = [2, 0], sizes = [13, 128], strides = [1, 1]} : vector<16x128xf32> to vector<13x128xf32>
    %118 = vector.extract_strided_slice %114 {offsets = [3, 0], sizes = [13, 128], strides = [1, 1]} : vector<16x128xf32> to vector<13x128xf32>
    %119 = tpu.concatenate %115, %116, %117, %118 in 1 : vector<13x128xf32>, vector<13x128xf32>, vector<13x128xf32>, vector<13x128xf32> -> vector<13x512xf32>
    %c0_51 = arith.constant 0 : index
    %c0_52 = arith.constant 0 : index
    %120 = vector.load %arg9[%c0_51, %c0_52] : memref<512x64xf32, #tpu.memory_space<vmem>>, vector<512x64xf32>
    %cst_53 = arith.constant dense<0.000000e+00> : vector<13x64xf32>
    %121 = tpu.matmul %119, %120, %cst_53 {dimension_numbers = #tpu.dot_dimension_numbers<[1], [0], [0], [1], [0, 0, 1, 1], [], []>} : vector<13x512xf32>, vector<512x64xf32>, vector<13x64xf32> -> vector<13x64xf32>
    %122 = vector.extract_strided_slice %0 {offsets = [3, 0], sizes = [1, 64], strides = [1, 1]} : vector<5x64xf32> to vector<1x64xf32>
    %123 = vector.broadcast %122 : vector<1x64xf32> to vector<13x64xf32>
    %124 = arith.addf %121, %123 : vector<13x64xf32>
    %cst_54 = arith.constant 0.000000e+00 : f32
    %125 = vector.broadcast %cst_54 : f32 to vector<13x64xf32>
    %126 = arith.cmpf oge, %124, %125 : vector<13x64xf32>
    %cst_55 = arith.constant 0.00999999977 : f32
    %127 = vector.broadcast %cst_55 : f32 to vector<13x64xf32>
    %128 = arith.mulf %127, %124 : vector<13x64xf32>
    %129 = arith.select %126, %124, %128 : vector<13x64xi1>, vector<13x64xf32>
    %130 = vector.extract_strided_slice %129 {offsets = [0, 0], sizes = [10, 64], strides = [1, 1]} : vector<13x64xf32> to vector<10x64xf32>
    %131 = vector.extract_strided_slice %129 {offsets = [1, 0], sizes = [10, 64], strides = [1, 1]} : vector<13x64xf32> to vector<10x64xf32>
    %132 = vector.extract_strided_slice %129 {offsets = [2, 0], sizes = [10, 64], strides = [1, 1]} : vector<13x64xf32> to vector<10x64xf32>
    %133 = vector.extract_strided_slice %129 {offsets = [3, 0], sizes = [10, 64], strides = [1, 1]} : vector<13x64xf32> to vector<10x64xf32>
    %134 = tpu.concatenate %130, %131, %132, %133 in 1 : vector<10x64xf32>, vector<10x64xf32>, vector<10x64xf32>, vector<10x64xf32> -> vector<10x256xf32>
    %c3 = arith.constant 3 : index
    %c0_56 = arith.constant 0 : index
    %c0_57 = arith.constant 0 : index
    %135 = vector.load %arg12[%c3, %c0_56, %c0_57] : memref<5x256x64xf32, #tpu.memory_space<vmem>>, vector<1x256x64xf32>
    %136 = vector.shape_cast %135 : vector<1x256x64xf32> to vector<256x64xf32>
    %cst_58 = arith.constant dense<0.000000e+00> : vector<10x64xf32>
    %137 = tpu.matmul %134, %136, %cst_58 {dimension_numbers = #tpu.dot_dimension_numbers<[1], [0], [0], [1], [0, 0, 1, 1], [], []>} : vector<10x256xf32>, vector<256x64xf32>, vector<10x64xf32> -> vector<10x64xf32>
    %138 = vector.extract_strided_slice %1 {offsets = [3, 0], sizes = [1, 64], strides = [1, 1]} : vector<5x64xf32> to vector<1x64xf32>
    %139 = vector.broadcast %138 : vector<1x64xf32> to vector<10x64xf32>
    %140 = arith.addf %137, %139 : vector<10x64xf32>
    %cst_59 = arith.constant 0.000000e+00 : f32
    %141 = vector.broadcast %cst_59 : f32 to vector<10x64xf32>
    %142 = arith.cmpf oge, %140, %141 : vector<10x64xf32>
    %cst_60 = arith.constant 0.00999999977 : f32
    %143 = vector.broadcast %cst_60 : f32 to vector<10x64xf32>
    %144 = arith.mulf %143, %140 : vector<10x64xf32>
    %145 = arith.select %142, %140, %144 : vector<10x64xi1>, vector<10x64xf32>
    %cst_61 = arith.constant dense<0.000000e+00> : vector<64xf32>
    %146 = vector.multi_reduction <add>, %145, %cst_61 [0] : vector<10x64xf32> to vector<64xf32>
    %147 = vector.shape_cast %146 : vector<64xf32> to vector<1x64xf32>
    %cst_62 = arith.constant 1.000000e+01 : f32
    %148 = vector.broadcast %cst_62 : f32 to vector<1x64xf32>
    %149 = arith.divf %147, %148 : vector<1x64xf32>
    %c0_63 = arith.constant 0 : index
    %c0_64 = arith.constant 0 : index
    %c0_65 = arith.constant 0 : index
    %150 = vector.load %arg5[%c0_63, %c0_64, %c0_65] : memref<1x8x256xf32, #tpu.memory_space<vmem>>, vector<1x8x256xf32>
    %151 = vector.shape_cast %150 : vector<1x8x256xf32> to vector<8x256xf32>
    %152 = vector.extract_strided_slice %151 {offsets = [0, 0], sizes = [5, 256], strides = [1, 1]} : vector<8x256xf32> to vector<5x256xf32>
    %153 = vector.extract_strided_slice %151 {offsets = [1, 0], sizes = [5, 256], strides = [1, 1]} : vector<8x256xf32> to vector<5x256xf32>
    %154 = vector.extract_strided_slice %151 {offsets = [2, 0], sizes = [5, 256], strides = [1, 1]} : vector<8x256xf32> to vector<5x256xf32>
    %155 = vector.extract_strided_slice %151 {offsets = [3, 0], sizes = [5, 256], strides = [1, 1]} : vector<8x256xf32> to vector<5x256xf32>
    %156 = tpu.concatenate %152, %153, %154, %155 in 1 : vector<5x256xf32>, vector<5x256xf32>, vector<5x256xf32>, vector<5x256xf32> -> vector<5x1024xf32>
    %c0_66 = arith.constant 0 : index
    %c0_67 = arith.constant 0 : index
    %157 = vector.load %arg10[%c0_66, %c0_67] : memref<1024x64xf32, #tpu.memory_space<vmem>>, vector<1024x64xf32>
    %cst_68 = arith.constant dense<0.000000e+00> : vector<5x64xf32>
    %158 = tpu.matmul %156, %157, %cst_68 {dimension_numbers = #tpu.dot_dimension_numbers<[1], [0], [0], [1], [0, 0, 1, 1], [], []>} : vector<5x1024xf32>, vector<1024x64xf32>, vector<5x64xf32> -> vector<5x64xf32>
    %159 = vector.extract_strided_slice %0 {offsets = [4, 0], sizes = [1, 64], strides = [1, 1]} : vector<5x64xf32> to vector<1x64xf32>
    %160 = vector.broadcast %159 : vector<1x64xf32> to vector<5x64xf32>
    %161 = arith.addf %158, %160 : vector<5x64xf32>
    %cst_69 = arith.constant 0.000000e+00 : f32
    %162 = vector.broadcast %cst_69 : f32 to vector<5x64xf32>
    %163 = arith.cmpf oge, %161, %162 : vector<5x64xf32>
    %cst_70 = arith.constant 0.00999999977 : f32
    %164 = vector.broadcast %cst_70 : f32 to vector<5x64xf32>
    %165 = arith.mulf %164, %161 : vector<5x64xf32>
    %166 = arith.select %163, %161, %165 : vector<5x64xi1>, vector<5x64xf32>
    %167 = vector.extract_strided_slice %166 {offsets = [0, 0], sizes = [2, 64], strides = [1, 1]} : vector<5x64xf32> to vector<2x64xf32>
    %168 = vector.extract_strided_slice %166 {offsets = [1, 0], sizes = [2, 64], strides = [1, 1]} : vector<5x64xf32> to vector<2x64xf32>
    %169 = vector.extract_strided_slice %166 {offsets = [2, 0], sizes = [2, 64], strides = [1, 1]} : vector<5x64xf32> to vector<2x64xf32>
    %170 = vector.extract_strided_slice %166 {offsets = [3, 0], sizes = [2, 64], strides = [1, 1]} : vector<5x64xf32> to vector<2x64xf32>
    %171 = tpu.concatenate %167, %168, %169, %170 in 1 : vector<2x64xf32>, vector<2x64xf32>, vector<2x64xf32>, vector<2x64xf32> -> vector<2x256xf32>
    %c4 = arith.constant 4 : index
    %c0_71 = arith.constant 0 : index
    %c0_72 = arith.constant 0 : index
    %172 = vector.load %arg12[%c4, %c0_71, %c0_72] : memref<5x256x64xf32, #tpu.memory_space<vmem>>, vector<1x256x64xf32>
    %173 = vector.shape_cast %172 : vector<1x256x64xf32> to vector<256x64xf32>
    %cst_73 = arith.constant dense<0.000000e+00> : vector<2x64xf32>
    %174 = tpu.matmul %171, %173, %cst_73 {dimension_numbers = #tpu.dot_dimension_numbers<[1], [0], [0], [1], [0, 0, 1, 1], [], []>} : vector<2x256xf32>, vector<256x64xf32>, vector<2x64xf32> -> vector<2x64xf32>
    %175 = vector.extract_strided_slice %1 {offsets = [4, 0], sizes = [1, 64], strides = [1, 1]} : vector<5x64xf32> to vector<1x64xf32>
    %176 = vector.broadcast %175 : vector<1x64xf32> to vector<2x64xf32>
    %177 = arith.addf %174, %176 : vector<2x64xf32>
    %cst_74 = arith.constant 0.000000e+00 : f32
    %178 = vector.broadcast %cst_74 : f32 to vector<2x64xf32>
    %179 = arith.cmpf oge, %177, %178 : vector<2x64xf32>
    %cst_75 = arith.constant 0.00999999977 : f32
    %180 = vector.broadcast %cst_75 : f32 to vector<2x64xf32>
    %181 = arith.mulf %180, %177 : vector<2x64xf32>
    %182 = arith.select %179, %177, %181 : vector<2x64xi1>, vector<2x64xf32>
    %cst_76 = arith.constant dense<0.000000e+00> : vector<64xf32>
    %183 = vector.multi_reduction <add>, %182, %cst_76 [0] : vector<2x64xf32> to vector<64xf32>
    %184 = vector.shape_cast %183 : vector<64xf32> to vector<1x64xf32>
    %cst_77 = arith.constant 2.000000e+00 : f32
    %185 = vector.broadcast %cst_77 : f32 to vector<1x64xf32>
    %186 = arith.divf %184, %185 : vector<1x64xf32>
    %c0_78 = arith.constant 0 : index
    %c0_79 = arith.constant 0 : index
    %187 = vector.load %arg14[%c0_78, %c0_79] : memref<6x64xf32, #tpu.memory_space<vmem>>, vector<6x64xf32>
    %188 = vector.extract_strided_slice %187 {offsets = [0, 0], sizes = [1, 64], strides = [1, 1]} : vector<6x64xf32> to vector<1x64xf32>
    %189 = tpu.concatenate %38, %75, %112, %149, %186 in 0 : vector<1x64xf32>, vector<1x64xf32>, vector<1x64xf32>, vector<1x64xf32>, vector<1x64xf32> -> vector<5x64xf32>
    %190 = vector.extract_strided_slice %187 {offsets = [1, 0], sizes = [5, 64], strides = [1, 1]} : vector<6x64xf32> to vector<5x64xf32>
    %191 = arith.addf %189, %190 : vector<5x64xf32>
    %192 = tpu.concatenate %188, %191 in 0 : vector<1x64xf32>, vector<5x64xf32> -> vector<6x64xf32>
    %c0_80 = arith.constant 0 : index
    %c0_81 = arith.constant 0 : index
    %193 = vector.load %arg15[%c0_80, %c0_81] : memref<4x64xf32, #tpu.memory_space<vmem>>, vector<4x64xf32>
    %194 = vector.extract_strided_slice %193 {offsets = [0, 0], sizes = [1, 64], strides = [1, 1]} : vector<4x64xf32> to vector<1x64xf32>
    %195 = vector.extract_strided_slice %193 {offsets = [1, 0], sizes = [1, 64], strides = [1, 1]} : vector<4x64xf32> to vector<1x64xf32>
    %cst_82 = arith.constant dense<0.000000e+00> : vector<6xf32>
    %196 = vector.multi_reduction <add>, %192, %cst_82 [1] : vector<6x64xf32> to vector<6xf32>
    %197 = vector.shape_cast %196 : vector<6xf32> to vector<6x1xf32>
    %cst_83 = arith.constant 6.400000e+01 : f32
    %198 = vector.broadcast %cst_83 : f32 to vector<6x1xf32>
    %199 = arith.divf %197, %198 : vector<6x1xf32>
    %200 = vector.broadcast %199 : vector<6x1xf32> to vector<6x64xf32>
    %201 = arith.subf %192, %200 : vector<6x64xf32>
    %202 = arith.mulf %201, %201 : vector<6x64xf32>
    %cst_84 = arith.constant dense<0.000000e+00> : vector<6xf32>
    %203 = vector.multi_reduction <add>, %202, %cst_84 [1] : vector<6x64xf32> to vector<6xf32>
    %204 = vector.shape_cast %203 : vector<6xf32> to vector<6x1xf32>
    %cst_85 = arith.constant 6.400000e+01 : f32
    %205 = vector.broadcast %cst_85 : f32 to vector<6x1xf32>
    %206 = arith.divf %204, %205 : vector<6x1xf32>
    %207 = vector.broadcast %199 : vector<6x1xf32> to vector<6x64xf32>
    %208 = arith.subf %192, %207 : vector<6x64xf32>
    %cst_86 = arith.constant 9.99999974E-6 : f32
    %209 = vector.broadcast %cst_86 : f32 to vector<6x1xf32>
    %210 = arith.addf %206, %209 : vector<6x1xf32>
    %211 = math.rsqrt %210 : vector<6x1xf32>
    %212 = vector.broadcast %211 : vector<6x1xf32> to vector<6x64xf32>
    %213 = arith.mulf %208, %212 : vector<6x64xf32>
    %214 = vector.broadcast %194 : vector<1x64xf32> to vector<6x64xf32>
    %215 = arith.mulf %213, %214 : vector<6x64xf32>
    %216 = vector.broadcast %195 : vector<1x64xf32> to vector<6x64xf32>
    %217 = arith.addf %215, %216 : vector<6x64xf32>
    %c0_87 = arith.constant 0 : index
    %c0_88 = arith.constant 0 : index
    %218 = vector.load %arg16[%c0_87, %c0_88] : memref<64x192xf32, #tpu.memory_space<vmem>>, vector<64x192xf32>
    %cst_89 = arith.constant dense<0.000000e+00> : vector<6x192xf32>
    %219 = tpu.matmul %217, %218, %cst_89 {dimension_numbers = #tpu.dot_dimension_numbers<[1], [0], [0], [1], [0, 0, 1, 1], [], []>} : vector<6x64xf32>, vector<64x192xf32>, vector<6x192xf32> -> vector<6x192xf32>
    %c0_90 = arith.constant 0 : index
    %c0_91 = arith.constant 0 : index
    %220 = vector.load %arg17[%c0_90, %c0_91] : memref<1x192xf32, #tpu.memory_space<vmem>>, vector<1x192xf32>
    %221 = vector.broadcast %220 : vector<1x192xf32> to vector<6x192xf32>
    %222 = arith.addf %219, %221 : vector<6x192xf32>
    %223 = vector.extract_strided_slice %222 {offsets = [0, 0], sizes = [6, 64], strides = [1, 1]} : vector<6x192xf32> to vector<6x64xf32>
    %224 = vector.extract_strided_slice %222 {offsets = [0, 64], sizes = [6, 64], strides = [1, 1]} : vector<6x192xf32> to vector<6x64xf32>
    %225 = vector.extract_strided_slice %222 {offsets = [0, 128], sizes = [6, 64], strides = [1, 1]} : vector<6x192xf32> to vector<6x64xf32>
    %226 = vector.extract_strided_slice %223 {offsets = [0, 0], sizes = [6, 16], strides = [1, 1]} : vector<6x64xf32> to vector<6x16xf32>
    %227 = vector.extract_strided_slice %224 {offsets = [0, 0], sizes = [6, 16], strides = [1, 1]} : vector<6x64xf32> to vector<6x16xf32>
    %228 = vector.extract_strided_slice %225 {offsets = [0, 0], sizes = [6, 16], strides = [1, 1]} : vector<6x64xf32> to vector<6x16xf32>
    %229 = tpu.transpose %227, [1, 0] : vector<6x16xf32> -> vector<16x6xf32>
    %cst_92 = arith.constant dense<0.000000e+00> : vector<6x6xf32>
    %230 = tpu.matmul %226, %229, %cst_92 {dimension_numbers = #tpu.dot_dimension_numbers<[1], [0], [0], [1], [0, 0, 1, 1], [], []>} : vector<6x16xf32>, vector<16x6xf32>, vector<6x6xf32> -> vector<6x6xf32>
    %cst_93 = arith.constant 2.500000e-01 : f32
    %231 = vector.broadcast %cst_93 : f32 to vector<6x6xf32>
    %232 = arith.mulf %230, %231 : vector<6x6xf32>
    %cst_94 = arith.constant dense<0xFF800000> : vector<6xf32>
    %233 = vector.multi_reduction <maximumf>, %232, %cst_94 [1] : vector<6x6xf32> to vector<6xf32>
    %234 = vector.shape_cast %233 : vector<6xf32> to vector<6x1xf32>
    %235 = vector.broadcast %234 : vector<6x1xf32> to vector<6x6xf32>
    %236 = arith.subf %232, %235 : vector<6x6xf32>
    %237 = math.exp %236 : vector<6x6xf32>
    %cst_95 = arith.constant dense<0.000000e+00> : vector<6xf32>
    %238 = vector.multi_reduction <add>, %237, %cst_95 [1] : vector<6x6xf32> to vector<6xf32>
    %239 = vector.shape_cast %238 : vector<6xf32> to vector<6x1xf32>
    %240 = vector.broadcast %239 : vector<6x1xf32> to vector<6x6xf32>
    %241 = arith.divf %237, %240 : vector<6x6xf32>
    %cst_96 = arith.constant dense<0.000000e+00> : vector<6x16xf32>
    %242 = tpu.matmul %241, %228, %cst_96 {dimension_numbers = #tpu.dot_dimension_numbers<[1], [0], [0], [1], [0, 0, 1, 1], [], []>} : vector<6x6xf32>, vector<6x16xf32>, vector<6x16xf32> -> vector<6x16xf32>
    %243 = vector.extract_strided_slice %223 {offsets = [0, 16], sizes = [6, 16], strides = [1, 1]} : vector<6x64xf32> to vector<6x16xf32>
    %244 = vector.extract_strided_slice %224 {offsets = [0, 16], sizes = [6, 16], strides = [1, 1]} : vector<6x64xf32> to vector<6x16xf32>
    %245 = vector.extract_strided_slice %225 {offsets = [0, 16], sizes = [6, 16], strides = [1, 1]} : vector<6x64xf32> to vector<6x16xf32>
    %246 = tpu.transpose %244, [1, 0] : vector<6x16xf32> -> vector<16x6xf32>
    %cst_97 = arith.constant dense<0.000000e+00> : vector<6x6xf32>
    %247 = tpu.matmul %243, %246, %cst_97 {dimension_numbers = #tpu.dot_dimension_numbers<[1], [0], [0], [1], [0, 0, 1, 1], [], []>} : vector<6x16xf32>, vector<16x6xf32>, vector<6x6xf32> -> vector<6x6xf32>
    %cst_98 = arith.constant 2.500000e-01 : f32
    %248 = vector.broadcast %cst_98 : f32 to vector<6x6xf32>
    %249 = arith.mulf %247, %248 : vector<6x6xf32>
    %cst_99 = arith.constant dense<0xFF800000> : vector<6xf32>
    %250 = vector.multi_reduction <maximumf>, %249, %cst_99 [1] : vector<6x6xf32> to vector<6xf32>
    %251 = vector.shape_cast %250 : vector<6xf32> to vector<6x1xf32>
    %252 = vector.broadcast %251 : vector<6x1xf32> to vector<6x6xf32>
    %253 = arith.subf %249, %252 : vector<6x6xf32>
    %254 = math.exp %253 : vector<6x6xf32>
    %cst_100 = arith.constant dense<0.000000e+00> : vector<6xf32>
    %255 = vector.multi_reduction <add>, %254, %cst_100 [1] : vector<6x6xf32> to vector<6xf32>
    %256 = vector.shape_cast %255 : vector<6xf32> to vector<6x1xf32>
    %257 = vector.broadcast %256 : vector<6x1xf32> to vector<6x6xf32>
    %258 = arith.divf %254, %257 : vector<6x6xf32>
    %cst_101 = arith.constant dense<0.000000e+00> : vector<6x16xf32>
    %259 = tpu.matmul %258, %245, %cst_101 {dimension_numbers = #tpu.dot_dimension_numbers<[1], [0], [0], [1], [0, 0, 1, 1], [], []>} : vector<6x6xf32>, vector<6x16xf32>, vector<6x16xf32> -> vector<6x16xf32>
    %260 = vector.extract_strided_slice %223 {offsets = [0, 32], sizes = [6, 16], strides = [1, 1]} : vector<6x64xf32> to vector<6x16xf32>
    %261 = vector.extract_strided_slice %224 {offsets = [0, 32], sizes = [6, 16], strides = [1, 1]} : vector<6x64xf32> to vector<6x16xf32>
    %262 = vector.extract_strided_slice %225 {offsets = [0, 32], sizes = [6, 16], strides = [1, 1]} : vector<6x64xf32> to vector<6x16xf32>
    %263 = tpu.transpose %261, [1, 0] : vector<6x16xf32> -> vector<16x6xf32>
    %cst_102 = arith.constant dense<0.000000e+00> : vector<6x6xf32>
    %264 = tpu.matmul %260, %263, %cst_102 {dimension_numbers = #tpu.dot_dimension_numbers<[1], [0], [0], [1], [0, 0, 1, 1], [], []>} : vector<6x16xf32>, vector<16x6xf32>, vector<6x6xf32> -> vector<6x6xf32>
    %cst_103 = arith.constant 2.500000e-01 : f32
    %265 = vector.broadcast %cst_103 : f32 to vector<6x6xf32>
    %266 = arith.mulf %264, %265 : vector<6x6xf32>
    %cst_104 = arith.constant dense<0xFF800000> : vector<6xf32>
    %267 = vector.multi_reduction <maximumf>, %266, %cst_104 [1] : vector<6x6xf32> to vector<6xf32>
    %268 = vector.shape_cast %267 : vector<6xf32> to vector<6x1xf32>
    %269 = vector.broadcast %268 : vector<6x1xf32> to vector<6x6xf32>
    %270 = arith.subf %266, %269 : vector<6x6xf32>
    %271 = math.exp %270 : vector<6x6xf32>
    %cst_105 = arith.constant dense<0.000000e+00> : vector<6xf32>
    %272 = vector.multi_reduction <add>, %271, %cst_105 [1] : vector<6x6xf32> to vector<6xf32>
    %273 = vector.shape_cast %272 : vector<6xf32> to vector<6x1xf32>
    %274 = vector.broadcast %273 : vector<6x1xf32> to vector<6x6xf32>
    %275 = arith.divf %271, %274 : vector<6x6xf32>
    %cst_106 = arith.constant dense<0.000000e+00> : vector<6x16xf32>
    %276 = tpu.matmul %275, %262, %cst_106 {dimension_numbers = #tpu.dot_dimension_numbers<[1], [0], [0], [1], [0, 0, 1, 1], [], []>} : vector<6x6xf32>, vector<6x16xf32>, vector<6x16xf32> -> vector<6x16xf32>
    %277 = vector.extract_strided_slice %223 {offsets = [0, 48], sizes = [6, 16], strides = [1, 1]} : vector<6x64xf32> to vector<6x16xf32>
    %278 = vector.extract_strided_slice %224 {offsets = [0, 48], sizes = [6, 16], strides = [1, 1]} : vector<6x64xf32> to vector<6x16xf32>
    %279 = vector.extract_strided_slice %225 {offsets = [0, 48], sizes = [6, 16], strides = [1, 1]} : vector<6x64xf32> to vector<6x16xf32>
    %280 = tpu.transpose %278, [1, 0] : vector<6x16xf32> -> vector<16x6xf32>
    %cst_107 = arith.constant dense<0.000000e+00> : vector<6x6xf32>
    %281 = tpu.matmul %277, %280, %cst_107 {dimension_numbers = #tpu.dot_dimension_numbers<[1], [0], [0], [1], [0, 0, 1, 1], [], []>} : vector<6x16xf32>, vector<16x6xf32>, vector<6x6xf32> -> vector<6x6xf32>
    %cst_108 = arith.constant 2.500000e-01 : f32
    %282 = vector.broadcast %cst_108 : f32 to vector<6x6xf32>
    %283 = arith.mulf %281, %282 : vector<6x6xf32>
    %cst_109 = arith.constant dense<0xFF800000> : vector<6xf32>
    %284 = vector.multi_reduction <maximumf>, %283, %cst_109 [1] : vector<6x6xf32> to vector<6xf32>
    %285 = vector.shape_cast %284 : vector<6xf32> to vector<6x1xf32>
    %286 = vector.broadcast %285 : vector<6x1xf32> to vector<6x6xf32>
    %287 = arith.subf %283, %286 : vector<6x6xf32>
    %288 = math.exp %287 : vector<6x6xf32>
    %cst_110 = arith.constant dense<0.000000e+00> : vector<6xf32>
    %289 = vector.multi_reduction <add>, %288, %cst_110 [1] : vector<6x6xf32> to vector<6xf32>
    %290 = vector.shape_cast %289 : vector<6xf32> to vector<6x1xf32>
    %291 = vector.broadcast %290 : vector<6x1xf32> to vector<6x6xf32>
    %292 = arith.divf %288, %291 : vector<6x6xf32>
    %cst_111 = arith.constant dense<0.000000e+00> : vector<6x16xf32>
    %293 = tpu.matmul %292, %279, %cst_111 {dimension_numbers = #tpu.dot_dimension_numbers<[1], [0], [0], [1], [0, 0, 1, 1], [], []>} : vector<6x6xf32>, vector<6x16xf32>, vector<6x16xf32> -> vector<6x16xf32>
    %294 = tpu.concatenate %242, %259, %276, %293 in 1 : vector<6x16xf32>, vector<6x16xf32>, vector<6x16xf32>, vector<6x16xf32> -> vector<6x64xf32>
    %c0_112 = arith.constant 0 : index
    %c0_113 = arith.constant 0 : index
    %295 = vector.load %arg18[%c0_112, %c0_113] : memref<64x64xf32, #tpu.memory_space<vmem>>, vector<64x64xf32>
    %cst_114 = arith.constant dense<0.000000e+00> : vector<6x64xf32>
    %296 = tpu.matmul %294, %295, %cst_114 {dimension_numbers = #tpu.dot_dimension_numbers<[1], [0], [0], [1], [0, 0, 1, 1], [], []>} : vector<6x64xf32>, vector<64x64xf32>, vector<6x64xf32> -> vector<6x64xf32>
    %c0_115 = arith.constant 0 : index
    %c0_116 = arith.constant 0 : index
    %297 = vector.load %arg19[%c0_115, %c0_116] : memref<1x64xf32, #tpu.memory_space<vmem>>, vector<1x64xf32>
    %298 = vector.broadcast %297 : vector<1x64xf32> to vector<6x64xf32>
    %299 = arith.addf %296, %298 : vector<6x64xf32>
    %300 = arith.addf %192, %299 : vector<6x64xf32>
    %301 = vector.extract_strided_slice %193 {offsets = [2, 0], sizes = [1, 64], strides = [1, 1]} : vector<4x64xf32> to vector<1x64xf32>
    %302 = vector.extract_strided_slice %193 {offsets = [3, 0], sizes = [1, 64], strides = [1, 1]} : vector<4x64xf32> to vector<1x64xf32>
    %cst_117 = arith.constant dense<0.000000e+00> : vector<6xf32>
    %303 = vector.multi_reduction <add>, %300, %cst_117 [1] : vector<6x64xf32> to vector<6xf32>
    %304 = vector.shape_cast %303 : vector<6xf32> to vector<6x1xf32>
    %cst_118 = arith.constant 6.400000e+01 : f32
    %305 = vector.broadcast %cst_118 : f32 to vector<6x1xf32>
    %306 = arith.divf %304, %305 : vector<6x1xf32>
    %307 = vector.broadcast %306 : vector<6x1xf32> to vector<6x64xf32>
    %308 = arith.subf %300, %307 : vector<6x64xf32>
    %309 = arith.mulf %308, %308 : vector<6x64xf32>
    %cst_119 = arith.constant dense<0.000000e+00> : vector<6xf32>
    %310 = vector.multi_reduction <add>, %309, %cst_119 [1] : vector<6x64xf32> to vector<6xf32>
    %311 = vector.shape_cast %310 : vector<6xf32> to vector<6x1xf32>
    %cst_120 = arith.constant 6.400000e+01 : f32
    %312 = vector.broadcast %cst_120 : f32 to vector<6x1xf32>
    %313 = arith.divf %311, %312 : vector<6x1xf32>
    %314 = vector.broadcast %306 : vector<6x1xf32> to vector<6x64xf32>
    %315 = arith.subf %300, %314 : vector<6x64xf32>
    %cst_121 = arith.constant 9.99999974E-6 : f32
    %316 = vector.broadcast %cst_121 : f32 to vector<6x1xf32>
    %317 = arith.addf %313, %316 : vector<6x1xf32>
    %318 = math.rsqrt %317 : vector<6x1xf32>
    %319 = vector.broadcast %318 : vector<6x1xf32> to vector<6x64xf32>
    %320 = arith.mulf %315, %319 : vector<6x64xf32>
    %321 = vector.broadcast %301 : vector<1x64xf32> to vector<6x64xf32>
    %322 = arith.mulf %320, %321 : vector<6x64xf32>
    %323 = vector.broadcast %302 : vector<1x64xf32> to vector<6x64xf32>
    %324 = arith.addf %322, %323 : vector<6x64xf32>
    %c0_122 = arith.constant 0 : index
    %c0_123 = arith.constant 0 : index
    %325 = vector.load %arg20[%c0_122, %c0_123] : memref<64x128xf32, #tpu.memory_space<vmem>>, vector<64x128xf32>
    %cst_124 = arith.constant dense<0.000000e+00> : vector<6x128xf32>
    %326 = tpu.matmul %324, %325, %cst_124 {dimension_numbers = #tpu.dot_dimension_numbers<[1], [0], [0], [1], [0, 0, 1, 1], [], []>} : vector<6x64xf32>, vector<64x128xf32>, vector<6x128xf32> -> vector<6x128xf32>
    %c0_125 = arith.constant 0 : index
    %c0_126 = arith.constant 0 : index
    %327 = vector.load %arg21[%c0_125, %c0_126] : memref<1x128xf32, #tpu.memory_space<vmem>>, vector<1x128xf32>
    %328 = vector.broadcast %327 : vector<1x128xf32> to vector<6x128xf32>
    %329 = arith.addf %326, %328 : vector<6x128xf32>
    %cst_127 = arith.constant 5.000000e-01 : f32
    %330 = vector.broadcast %cst_127 : f32 to vector<6x128xf32>
    %331 = arith.mulf %330, %329 : vector<6x128xf32>
    %cst_128 = arith.constant 4.471500e-02 : f32
    %332 = vector.broadcast %cst_128 : f32 to vector<6x128xf32>
    %333 = arith.mulf %332, %329 : vector<6x128xf32>
    %334 = arith.mulf %333, %329 : vector<6x128xf32>
    %335 = arith.mulf %334, %329 : vector<6x128xf32>
    %336 = arith.addf %329, %335 : vector<6x128xf32>
    %cst_129 = arith.constant 0.797884583 : f32
    %337 = vector.broadcast %cst_129 : f32 to vector<6x128xf32>
    %338 = arith.mulf %337, %336 : vector<6x128xf32>
    %339 = math.tanh %338 : vector<6x128xf32>
    %cst_130 = arith.constant 1.000000e+00 : f32
    %340 = vector.broadcast %cst_130 : f32 to vector<6x128xf32>
    %341 = arith.addf %340, %339 : vector<6x128xf32>
    %342 = arith.mulf %331, %341 : vector<6x128xf32>
    %c0_131 = arith.constant 0 : index
    %c0_132 = arith.constant 0 : index
    %343 = vector.load %arg22[%c0_131, %c0_132] : memref<128x64xf32, #tpu.memory_space<vmem>>, vector<128x64xf32>
    %cst_133 = arith.constant dense<0.000000e+00> : vector<6x64xf32>
    %344 = tpu.matmul %342, %343, %cst_133 {dimension_numbers = #tpu.dot_dimension_numbers<[1], [0], [0], [1], [0, 0, 1, 1], [], []>} : vector<6x128xf32>, vector<128x64xf32>, vector<6x64xf32> -> vector<6x64xf32>
    %c0_134 = arith.constant 0 : index
    %c0_135 = arith.constant 0 : index
    %345 = vector.load %arg23[%c0_134, %c0_135] : memref<1x64xf32, #tpu.memory_space<vmem>>, vector<1x64xf32>
    %346 = vector.broadcast %345 : vector<1x64xf32> to vector<6x64xf32>
    %347 = arith.addf %344, %346 : vector<6x64xf32>
    %348 = arith.addf %300, %347 : vector<6x64xf32>
    %349 = vector.extract_strided_slice %348 {offsets = [0, 0], sizes = [1, 64], strides = [1, 1]} : vector<6x64xf32> to vector<1x64xf32>
    %c0_136 = arith.constant 0 : index
    %c0_137 = arith.constant 0 : index
    %350 = vector.load %arg24[%c0_136, %c0_137] : memref<64x3xf32, #tpu.memory_space<vmem>>, vector<64x3xf32>
    %cst_138 = arith.constant dense<0.000000e+00> : vector<1x3xf32>
    %351 = tpu.matmul %349, %350, %cst_138 {dimension_numbers = #tpu.dot_dimension_numbers<[1], [0], [0], [1], [0, 0, 1, 1], [], []>} : vector<1x64xf32>, vector<64x3xf32>, vector<1x3xf32> -> vector<1x3xf32>
    %c0_139 = arith.constant 0 : index
    %c0_140 = arith.constant 0 : index
    %352 = vector.load %arg25[%c0_139, %c0_140] : memref<1x3xf32, #tpu.memory_space<vmem>>, vector<1x3xf32>
    %353 = arith.addf %351, %352 : vector<1x3xf32>
    %cst_141 = arith.constant dense<0xFF800000> : vector<1xf32>
    %354 = vector.multi_reduction <maximumf>, %353, %cst_141 [1] : vector<1x3xf32> to vector<1xf32>
    %355 = vector.shape_cast %354 : vector<1xf32> to vector<1x1xf32>
    %356 = vector.broadcast %355 : vector<1x1xf32> to vector<1x3xf32>
    %357 = arith.subf %353, %356 : vector<1x3xf32>
    %358 = math.exp %357 : vector<1x3xf32>
    %cst_142 = arith.constant dense<0.000000e+00> : vector<1xf32>
    %359 = vector.multi_reduction <add>, %358, %cst_142 [1] : vector<1x3xf32> to vector<1xf32>
    %360 = vector.shape_cast %359 : vector<1xf32> to vector<1x1xf32>
    %361 = vector.broadcast %360 : vector<1x1xf32> to vector<1x3xf32>
    %362 = arith.divf %358, %361 : vector<1x3xf32>
    %c0_143 = arith.constant 0 : index
    %c0_144 = arith.constant 0 : index
    %c0_145 = arith.constant 0 : index
    %363 = vector.load %arg26[%c0_143, %c0_144, %c0_145] : memref<1x1x3xf32, #tpu.memory_space<vmem>>, vector<1x1x3xf32>
    %364 = vector.shape_cast %363 : vector<1x1x3xf32> to vector<1x3xf32>
    %365 = vector.shape_cast %362 : vector<1x3xf32> to vector<1x1x3xf32>
    tpu.vector_store %arg26[%c0_143, %c0_144, %c0_145], %365 {strides = array<i32>} : memref<1x1x3xf32, #tpu.memory_space<vmem>>, vector<1x1x3xf32>,
    return
  }
  func.func @transform_0(%arg0: i32) -> (i32, i32, i32) {
    %c0_i32 = arith.constant 0 : i32
    %c0_i32_0 = arith.constant 0 : i32
    %c0_i32_1 = arith.constant 0 : i32
    return %arg0, %c0_i32, %c0_i32_0 : i32, i32, i32
  }
  func.func @transform_1(%arg0: i32) -> (i32, i32, i32) {
    %c0_i32 = arith.constant 0 : i32
    %c0_i32_0 = arith.constant 0 : i32
    %c0_i32_1 = arith.constant 0 : i32
    return %arg0, %c0_i32, %c0_i32_0 : i32, i32, i32
  }
  func.func @transform_2(%arg0: i32) -> (i32, i32, i32) {
    %c0_i32 = arith.constant 0 : i32
    %c0_i32_0 = arith.constant 0 : i32
    %c0_i32_1 = arith.constant 0 : i32
    return %arg0, %c0_i32, %c0_i32_0 : i32, i32, i32
  }
  func.func @transform_3(%arg0: i32) -> (i32, i32, i32) {
    %c0_i32 = arith.constant 0 : i32
    %c0_i32_0 = arith.constant 0 : i32
    %c0_i32_1 = arith.constant 0 : i32
    return %arg0, %c0_i32, %c0_i32_0 : i32, i32, i32
  }
  func.func @transform_4(%arg0: i32) -> (i32, i32, i32) {
    %c0_i32 = arith.constant 0 : i32
    %c0_i32_0 = arith.constant 0 : i32
    %c0_i32_1 = arith.constant 0 : i32
    return %arg0, %c0_i32, %c0_i32_0 : i32, i32, i32
  }
  func.func @transform_5(%arg0: i32) -> (i32, i32) {
    %c0_i32 = arith.constant 0 : i32
    %c0_i32_0 = arith.constant 0 : i32
    %c0_i32_1 = arith.constant 0 : i32
    return %c0_i32, %c0_i32_0 : i32, i32
  }
  func.func @transform_6(%arg0: i32) -> (i32, i32) {
    %c0_i32 = arith.constant 0 : i32
    %c0_i32_0 = arith.constant 0 : i32
    %c0_i32_1 = arith.constant 0 : i32
    return %c0_i32, %c0_i32_0 : i32, i32
  }
  func.func @transform_7(%arg0: i32) -> (i32, i32) {
    %c0_i32 = arith.constant 0 : i32
    %c0_i32_0 = arith.constant 0 : i32
    %c0_i32_1 = arith.constant 0 : i32
    return %c0_i32, %c0_i32_0 : i32, i32
  }
  func.func @transform_8(%arg0: i32) -> (i32, i32) {
    %c0_i32 = arith.constant 0 : i32
    %c0_i32_0 = arith.constant 0 : i32
    %c0_i32_1 = arith.constant 0 : i32
    return %c0_i32, %c0_i32_0 : i32, i32
  }
  func.func @transform_9(%arg0: i32) -> (i32, i32) {
    %c0_i32 = arith.constant 0 : i32
    %c0_i32_0 = arith.constant 0 : i32
    %c0_i32_1 = arith.constant 0 : i32
    return %c0_i32, %c0_i32_0 : i32, i32
  }
  func.func @transform_10(%arg0: i32) -> (i32, i32) {
    %c0_i32 = arith.constant 0 : i32
    %c0_i32_0 = arith.constant 0 : i32
    %c0_i32_1 = arith.constant 0 : i32
    return %c0_i32, %c0_i32_0 : i32, i32
  }
  func.func @transform_11(%arg0: i32) -> (i32, i32, i32) {
    %c0_i32 = arith.constant 0 : i32
    %c0_i32_0 = arith.constant 0 : i32
    %c0_i32_1 = arith.constant 0 : i32
    %c0_i32_2 = arith.constant 0 : i32
    return %c0_i32, %c0_i32_0, %c0_i32_1 : i32, i32, i32
  }
  func.func @transform_12(%arg0: i32) -> (i32, i32) {
    %c0_i32 = arith.constant 0 : i32
    %c0_i32_0 = arith.constant 0 : i32
    %c0_i32_1 = arith.constant 0 : i32
    return %c0_i32, %c0_i32_0 : i32, i32
  }
  func.func @transform_13(%arg0: i32) -> (i32, i32) {
    %c0_i32 = arith.constant 0 : i32
    %c0_i32_0 = arith.constant 0 : i32
    %c0_i32_1 = arith.constant 0 : i32
    return %c0_i32, %c0_i32_0 : i32, i32
  }
  func.func @transform_14(%arg0: i32) -> (i32, i32) {
    %c0_i32 = arith.constant 0 : i32
    %c0_i32_0 = arith.constant 0 : i32
    %c0_i32_1 = arith.constant 0 : i32
    return %c0_i32, %c0_i32_0 : i32, i32
  }
  func.func @transform_15(%arg0: i32) -> (i32, i32) {
    %c0_i32 = arith.constant 0 : i32
    %c0_i32_0 = arith.constant 0 : i32
    %c0_i32_1 = arith.constant 0 : i32
    return %c0_i32, %c0_i32_0 : i32, i32
  }
  func.func @transform_16(%arg0: i32) -> (i32, i32) {
    %c0_i32 = arith.constant 0 : i32
    %c0_i32_0 = arith.constant 0 : i32
    %c0_i32_1 = arith.constant 0 : i32
    return %c0_i32, %c0_i32_0 : i32, i32
  }
  func.func @transform_17(%arg0: i32) -> (i32, i32) {
    %c0_i32 = arith.constant 0 : i32
    %c0_i32_0 = arith.constant 0 : i32
    %c0_i32_1 = arith.constant 0 : i32
    return %c0_i32, %c0_i32_0 : i32, i32
  }
  func.func @transform_18(%arg0: i32) -> (i32, i32) {
    %c0_i32 = arith.constant 0 : i32
    %c0_i32_0 = arith.constant 0 : i32
    %c0_i32_1 = arith.constant 0 : i32
    return %c0_i32, %c0_i32_0 : i32, i32
  }
  func.func @transform_19(%arg0: i32) -> (i32, i32) {
    %c0_i32 = arith.constant 0 : i32
    %c0_i32_0 = arith.constant 0 : i32
    %c0_i32_1 = arith.constant 0 : i32
    return %c0_i32, %c0_i32_0 : i32, i32
  }
  func.func @transform_20(%arg0: i32) -> (i32, i32) {
    %c0_i32 = arith.constant 0 : i32
    %c0_i32_0 = arith.constant 0 : i32
    %c0_i32_1 = arith.constant 0 : i32
    return %c0_i32, %c0_i32_0 : i32, i32
  }
  func.func @transform_21(%arg0: i32) -> (i32, i32) {
    %c0_i32 = arith.constant 0 : i32
    %c0_i32_0 = arith.constant 0 : i32
    %c0_i32_1 = arith.constant 0 : i32
    return %c0_i32, %c0_i32_0 : i32, i32
  }
  func.func @transform_22(%arg0: i32) -> (i32, i32) {
    %c0_i32 = arith.constant 0 : i32
    %c0_i32_0 = arith.constant 0 : i32
    %c0_i32_1 = arith.constant 0 : i32
    return %c0_i32, %c0_i32_0 : i32, i32
  }
  func.func @transform_23(%arg0: i32) -> (i32, i32) {
    %c0_i32 = arith.constant 0 : i32
    %c0_i32_0 = arith.constant 0 : i32
    %c0_i32_1 = arith.constant 0 : i32
    return %c0_i32, %c0_i32_0 : i32, i32
  }
  func.func @transform_24(%arg0: i32) -> (i32, i32) {
    %c0_i32 = arith.constant 0 : i32
    %c0_i32_0 = arith.constant 0 : i32
    %c0_i32_1 = arith.constant 0 : i32
    return %c0_i32, %c0_i32_0 : i32, i32
  }
  func.func @transform_25(%arg0: i32) -> (i32, i32, i32) {
    %c0_i32 = arith.constant 0 : i32
    %c0_i32_0 = arith.constant 0 : i32
    %c0_i32_1 = arith.constant 0 : i32
    return %arg0, %c0_i32, %c0_i32_0 : i32, i32, i32
  }
}

</mosaic_0001>

<bundles_post_ra>
// kernel: mscnn_tran_forward.1
= control target key start
LH: loop header
LB: loop body
LE: loop exit
PB: predicated region body
PF: predicated region fallthrough
CT: control target
= control target key end

     0   :  { %s10033_s0 = inlined_call_operand.vmem [shape: f32[2,128,16], index: 0, kind: input, shape index: {}]   ;;  %s10034_s1 = inlined_call_operand.vmem [shape: f32[2,64,32], index: 1, kind: input, shape index: {}]   ;;  %s10035_s2 = inlined_call_operand.vmem [shape: f32[2,32,64], index: 2, kind: input, shape index: {}]   ;;  %s10036_s3 = inlined_call_operand.vmem [shape: f32[2,16,128], index: 3, kind: input, shape index: {}]   ;;  %s10037_s4 = inlined_call_operand.vmem [shape: f32[2,8,256], index: 4, kind: input, shape index: {}]   ;;  %s10038_s5 = inlined_call_operand.vmem [shape: f32[64,64], index: 5, kind: input, shape index: {}]   ;;  %s10039_s6 = inlined_call_operand.vmem [shape: f32[128,64], index: 6, kind: input, shape index: {}]   ;;  %s10040_s7 = inlined_call_operand.vmem [shape: f32[256,64], index: 7, kind: input, shape index: {}]   ;;  %s10041_s8 = inlined_call_operand.vmem [shape: f32[512,64], index: 8, kind: input, shape index: {}]   ;;  %s10042_s9 = inlined_call_operand.vmem [shape: f32[1024,64], index: 9, kind: input, shape index: {}]   ;;  %s10043_s10 = inlined_call_operand.vmem [shape: f32[5,64], index: 10, kind: input, shape index: {}]   ;;  %s10044_s11 = inlined_call_operand.vmem [shape: f32[5,256,64], index: 11, kind: input, shape index: {}]   ;;  %s10045_s12 = inlined_call_operand.vmem [shape: f32[5,64], index: 12, kind: input, shape index: {}]   ;;  %s10046_s13 = inlined_call_operand.vmem [shape: f32[6,64], index: 13, kind: input, shape index: {}]   ;;  %s10047_s14 = inlined_call_operand.vmem [shape: f32[4,64], index: 14, kind: input, shape index: {}]   ;;  %s10048_s15 = inlined_call_operand.vmem [shape: f32[64,192], index: 15, kind: input, shape index: {}]   ;;  %s10049_s16 = inlined_call_operand.vmem [shape: f32[1,192], index: 16, kind: input, shape index: {}]   ;;  %s10050_s17 = inlined_call_operand.vmem [shape: f32[64,64], index: 17, kind: input, shape index: {}]   ;;  %s10051_s18 = inlined_call_operand.vmem [shape: f32[1,64], index: 18, kind: input, shape index: {}]   ;;  %s10052_s19 = inlined_call_operand.vmem [shape: f32[64,128], index: 19, kind: input, shape index: {}]   ;;  %s10053_s20 = inlined_call_operand.vmem [shape: f32[1,128], index: 20, kind: input, shape index: {}]   ;;  %s10054_s21 = inlined_call_operand.vmem [shape: f32[128,64], index: 21, kind: input, shape index: {}]   ;;  %s10055_s22 = inlined_call_operand.vmem [shape: f32[1,64], index: 22, kind: input, shape index: {}]   ;;  %s10056_s23 = inlined_call_operand.vmem [shape: f32[64,3], index: 23, kind: input, shape index: {}]   ;;  %s10057_s24 = inlined_call_operand.vmem [shape: f32[1,3], index: 24, kind: input, shape index: {}]   ;;  %s10058_s25 = inlined_call_operand.hbm [shape: f32[2,1,3], index: 25, kind: output, shape index: {}]  }
   0x1   :  { %10090 = sst [smem:[#allocation14_spill]] %s10033_s0 }
   0x2   :  { %10091 = sst [smem:[#allocation15_spill]] %s10034_s1 }
   0x3   :  { %10092 = sst [smem:[#allocation16_spill]] %s10035_s2 }
   0x4   :  { %10093 = sst [smem:[#allocation17_spill]] %s10036_s3 }
   0x5   :  { %10094 = sst [smem:[#allocation18_spill]] %s10037_s4 }
   0x6   :  { %10095 = sst [smem:[#allocation19_spill]] %s10038_s5 }
   0x7   :  { %10096 = sst [smem:[#allocation20_spill]] %s10039_s6 }
   0x8   :  { %10097 = sst [smem:[#allocation21_spill]] %s10040_s7 }
   0x9   :  { %10098 = sst [smem:[#allocation22_spill]] %s10041_s8 }
   0xa   :  { %10099 = sst [smem:[#allocation23_spill]] %s10042_s9 }
   0xb   :  { %10100 = sst [smem:[#allocation24_spill]] %s10058_s25 }
   0xc   :  { %30 = vsyncpa [#allocation3], 0 }
   0xd   :  { %32 = vsyncpa [#allocation3 + $0x1], 0  ;;  %s7331_s29 = smov 0   ;;  %s7333_s2 = smov 0  }
   0xe   :  { %s7335_s6 = smov 0   ;;  %s7337_s30 = smov 0  }
   0xf LB: > { %10101 = sst [smem:[#allocation5_spill]] %s7176_s29  ;;  %s7352_s7 = sadd.s32 4294967295, %s7188_s30   ;;  %s7188_s30 = sphi %s7337_s30, %s10137_s30   ;;  %s7184_s6 = sphi %s7335_s6, %s10140_s6   ;;  %s7180_s2 = sphi %s7333_s2, %s10139_s2   ;;  %s7176_s29 = sphi %s7331_s29, %s10138_s29  }
  0x10   : > { %10102 = sst [smem:[#allocation6_spill]] %s7180_s2  ;;  %s5278_s3 = sadd.s32 4294967294, %s7188_s30  }
  0x11   : > { %10103 = sst [smem:[#allocation7_spill]] %s7184_s6  ;;  %s7356_s26 = sadd.s32 1, %s7188_s30  }
  0x12   : > { %10104 = sst [smem:[#allocation8_spill]] %s7188_s30  ;;  %s595_s1 = sadd.s32 1, %s7184_s6 }
  0x13   : > { %10105 = sst [smem:[#allocation9_spill]] %s7352_s7  ;;  %s592_s8 = ssub.s32 %s7188_s30, %s7356_s26 }
  0x14   : > { %10106 = sst [smem:[#allocation10_spill]] %s7356_s26  ;;  %p605_p0 = scmp.ne.s32.totalorder %s7184_s6, %s7180_s2 }
  0x15   : > { %p593_p1 = scmp.eq.s32.totalorder %s592_s8, 0  ;;  %p606_p2 = scmp.eq.s32.totalorder %s7352_s7, 1 }
  0x16   : > { %p611_p3 = scmp.ne.s32.totalorder %s7180_s2, %s7176_s29  ;;  %p612_p4 = scmp.eq.s32.totalorder %s5278_s3, 1 }
  0x17   : > { %s7367_s27 = scalar_select %p593_p1, %s7184_s6, %s595_s1  }
  0x18   : > { %p7369_p5 = por %p606_p2, %p605_p0  ;;  %p7373_p6 = por %p612_p4, %p611_p3 }
  0x19   : > { %10107 = sst [smem:[#allocation11_spill]] %s7367_s27  ;;  %p5281_p7 = scmp.ge.s32.totalorder %s7188_s30, 1 }
  0x1a   : > { %s10108_s4 = scalar_select %p7369_p5, 1, 0 }
  0x1b   : > { %s10110_s28 = scalar_select %p7373_p6, 1, 0 }
  0x1c   : > { %10109 = sst [smem:[#allocation12_spill]] %s10108_s4  ;;  %p730_p8 = scmp.lt.s32.totalorder %s7188_s30, 3 }
  0x1d   : > { %10111 = sst [smem:[#allocation13_spill]] %s10110_s28 }
  0x1e   : > { %p731_p9 = pnand %p5281_p7, %p730_p8 }
  0x1f   : > { %p817_p10 = scmp.lt.s32.totalorder (!%p731_p9), %s7352_s7, 1  ;;  %s10112_s0 = sld [smem:[#allocation19_spill]] (!%p731_p9)  ;;  %vm956_vm0 = vcmask (!%p731_p9), 1045504   ;;  %vm876_vm1 = vcmask (!%p731_p9), 1046528   ;;  %vm1036_vm2 = vcmask (!%p731_p9), 1044480   ;;  %vm1116_vm3 = vcmask (!%p731_p9), 130048  }
  0x20   : > { %734 = sbr.rel (%p731_p9) target bundleno = 5564 (0x15bc), region = 120  ;;  %s10113_s30 = sld [smem:[#allocation14_spill]] (!%p731_p9)  ;;  %vm1133_vm4 = vcmask (!%p731_p9), 261120   ;;  %vm1150_vm5 = vcmask (!%p731_p9), 392192   ;;  %vm1179_vm6 = vcmask (!%p731_p9), 523264  }
  0x21   : > { %s10074_s5 = smov (!%p731_p9), 32   ;;  %s10072_s3 = smov (!%p731_p9), 16  }
  0x22   : > { %s10116_s8 = sld [smem:[#allocation15_spill]] (!%p731_p9)  ;;  %s10118_s25 = smov (!%p731_p9), 64  }
  0x23   : > { %s10080_s29 = smov (!%p731_p9), 96   ;;  %s10121_s9 = sld [smem:[#allocation22_spill]] (!%p731_p9) }
  0x24   : > { %s10126_s4 = sld [smem:[#allocation18_spill]] (!%p731_p9) }
  0x25   : > { %v1167_v0 = vld [vmem:[%s10112_s0] sm:$0xff] (!%p731_p9)  ;;  %v1168_v1 = vld [vmem:[%s10112_s0 + $0x8] sm:$0xff] (!%p731_p9)  ;;  %v1169_v2 = vld [vmem:[%s10112_s0 + $0x10] sm:$0xff] (!%p731_p9) }
  0x26   : > { %v1170_v3 = vld [vmem:[%s10112_s0 + $0x18] sm:$0xff] (!%p731_p9)  ;;  %v6304_v4 = vpack.c.bf16 (!%p731_p9), %v1168_v1, %v1167_v0  ;;  %v1171_v6 = vld [vmem:[%s10112_s0 + $0x20] sm:$0xff] (!%p731_p9)  ;;  %v1172_v7 = vld [vmem:[%s10112_s0 + $0x28] sm:$0xff] (!%p731_p9) }
  0x27   : > { %s7393_s28 = scalar_select %p817_p10, %s7352_s7, 1  ;;  %v6308_v5 = vpack.c.bf16 %v1170_v3, %v1169_v2  ;;  %v6312_v11 = vpack.c.bf16 %v1172_v7, %v1171_v6  ;;  %v1173_v16 = vld [vmem:[%s10112_s0 + $0x30] sm:$0xff]  ;;  %v1174_v17 = vld [vmem:[%s10112_s0 + $0x38] sm:$0xff] }
  0x28   : > { %6305 = vmatprep.subr.bf16.mxu0 %v6304_v4  ;;  %v6316_v23 = vpack.c.bf16 %v1174_v17, %v1173_v16 }
  0x29   : > { %s5462_s1 = sshll.u32 %s7393_s28, 7  ;;  %6307 = vmatpush3.bf16.msra.mxu0 %v6304_v4  ;;  %s10125_s2 = sshll.u32 %s7393_s28, 4 }
  0x2a   : > { %s7405_s6 = scalar_lea.vmem %s10113_s30, %s5462_s1  ;;  %6309 = vmatprep.subr.bf16.mxu0 %v6308_v5  ;;  %s10070_s1 = smov 48  }
  0x2b   : > { %v7408_v8 = vld [vmem:[%s7405_s6] sm:$0xff]  ;;  %v7411_v9 = vld [vmem:[%s7405_s6 + $0x8] sm:$0xff]  ;;  %v7414_v10 = vld [vmem:[%s7405_s6 + $0x10] sm:$0xff]  ;;  %s10114_s30 = sld [smem:[#allocation20_spill]] }
  0x2c   : > { %v957_v12 = vrot.slane %v7408_v8, 2  ;;  %v958_v13 = vrot.slane %v7411_v9, 2  ;;  %v877_v14 = vrot.slane %v7408_v8, 1  ;;  %v878_v15 = vrot.slane %v7411_v9, 1  ;;  %v7438_v28 = vld [vmem:[%s7405_s6 + $0x18] sm:$0xff]  ;;  %v7441_v29 = vld [vmem:[%s7405_s6 + $0x20] sm:$0xff] }
  0x2d   : > { %v960_v18 = vrot.slane %v7414_v10, 2  ;;  %v880_v19 = vrot.slane %v7414_v10, 1  ;;  %6311 = vmatpush3.bf16.msra.mxu0 %v6308_v5  ;;  %v1038_v22 = vrot.slane %v7411_v9, 3  ;;  %v1040_v26 = vrot.slane %v7414_v10, 3  ;;  %v7462_v42 = vld [vmem:[%s7405_s6 + $0x28] sm:$0xff]  ;;  %v7465_v43 = vld [vmem:[%s7405_s6 + $0x30] sm:$0xff] }
  0x2e   : > { %v959_v20 = vsel %vm956_vm0, %v957_v12, %v958_v13  ;;  %v879_v21 = vsel %vm876_vm1, %v877_v14, %v878_v15  ;;  %v1037_v27 = vrot.slane %v7408_v8, 3  ;;  %6313 = vmatprep.subr.bf16.mxu0 %v6312_v11  ;;  %v882_v32 = vrot.slane %v7438_v28, 1  ;;  %v7486_v56 = vld [vmem:[%s7405_s6 + $0x38] sm:$0xff]  ;;  %v7489_v57 = vld [vmem:[%s7405_s6 + $0x40] sm:$0xff]  ;;  %v7510_v6 = vld [vmem:[%s7405_s6 + $0x48] sm:$0xff] }
  0x2f   : > { %988 = vrot.lane.b32.xlu1 %v959_v20, %s10074_s5  ;;  %908 = vrot.lane.b32.xlu0 %v879_v21, %s10072_s3  ;;  %v961_v24 = vsel %vm956_vm0, %v958_v13, %v960_v18  ;;  %v881_v25 = vsel %vm876_vm1, %v878_v15, %v880_v19  ;;  %v1041_v30 = vsel %vm1036_vm2, %v1038_v22, %v1040_v26  ;;  %v884_v33 = vrot.slane %v7441_v29, 1  ;;  %v7513_v7 = vld [vmem:[%s7405_s6 + $0x50] sm:$0xff] }
  0x30   : > { %v1039_v31 = vsel %vm1036_vm2, %v1037_v27, %v1038_v22  ;;  %v883_v35 = vsel %vm876_vm1, %v880_v19, %v882_v32  ;;  %v962_v36 = vrot.slane %v7438_v28, 2  ;;  %v964_v37 = vrot.slane %v7441_v29, 2 }
  0x31   : > { %6315 = vmatpush3.bf16.msra.mxu0 %v6312_v11  ;;  %v885_v34 = vsel %vm876_vm1, %v882_v32, %v884_v33  ;;  %v1042_v40 = vrot.slane %v7438_v28, 3  ;;  %v1044_v41 = vrot.slane %v7441_v29, 3  ;;  %v886_v46 = vrot.slane %v7462_v42, 1  ;;  %s10115_s26 = smov %s10114_s30 }
  0x32   : > { %6317 = vmatprep.subr.bf16.mxu0 %v6316_v23  ;;  %v965_v38 = vsel %vm956_vm0, %v962_v36, %v964_v37  ;;  %v963_v39 = vsel %vm956_vm0, %v960_v18, %v962_v36  ;;  %v888_v47 = vrot.slane %v7465_v43, 1  ;;  %v966_v50 = vrot.slane %v7462_v42, 2 }
  0x33   : > { %990 = vrot.lane.b32.xlu1 %v961_v24, %s10074_s5  ;;  %910 = vrot.lane.b32.xlu0 %v881_v25, %s10072_s3  ;;  %v1045_v44 = vsel %vm1036_vm2, %v1042_v40, %v1044_v41  ;;  %v1043_v45 = vsel %vm1036_vm2, %v1040_v26, %v1042_v40  ;;  %v887_v49 = vsel %vm876_vm1, %v884_v33, %v886_v46  ;;  %v968_v51 = vrot.slane %v7465_v43, 2  ;;  %v7537_v24 = vld [vmem:[%s7405_s6 + $0x60] sm:$0xff]  ;;  %v7561_v40 = vld [vmem:[%s7405_s6 + $0x70] sm:$0xff] }
  0x34   : > { %v889_v48 = vsel %vm876_vm1, %v886_v46, %v888_v47  ;;  %v967_v53 = vsel %vm956_vm0, %v964_v37, %v966_v50  ;;  %v1046_v54 = vrot.slane %v7462_v42, 3  ;;  %v1048_v55 = vrot.slane %v7465_v43, 3 }
  0x35   : > { %6319 = vmatpush3.bf16.msra.mxu0 %v6316_v23  ;;  %v969_v52 = vsel %vm956_vm0, %v966_v50, %v968_v51  ;;  %v890_v60 = vrot.slane %v7486_v56, 1  ;;  %v892_v61 = vrot.slane %v7489_v57, 1  ;;  %v970_v0 = vrot.slane %v7486_v56, 2  ;;  %v7534_v23 = vld [vmem:[%s7405_s6 + $0x58] sm:$0xff] }
  0x36   : > { %v1049_v58 = vsel %vm1036_vm2, %v1046_v54, %v1048_v55  ;;  %v1047_v59 = vsel %vm1036_vm2, %v1044_v41, %v1046_v54  ;;  %v972_v1 = vrot.slane %v7489_v57, 2  ;;  %v1050_v4 = vrot.slane %v7486_v56, 3 }
  0x37   : > { %1070 = vrot.lane.b32.xlu1 %v1041_v30, %s10070_s1  ;;  %1068 = vrot.lane.b32.xlu0 %v1039_v31, %s10070_s1  ;;  %v893_v62 = vsel %vm876_vm1, %v890_v60, %v892_v61  ;;  %v891_v63 = vsel %vm876_vm1, %v888_v47, %v890_v60  ;;  %v971_v3 = vsel %vm956_vm0, %v968_v51, %v970_v0  ;;  %v1052_v5 = vrot.slane %v7489_v57, 3 }
  0x38   : > { %v973_v2 = vsel %vm956_vm0, %v970_v0, %v972_v1  ;;  %v1051_v12 = vsel %vm1036_vm2, %v1048_v55, %v1050_v4  ;;  %v894_v13 = vrot.slane %v7510_v6, 1  ;;  %v896_v14 = vrot.slane %v7513_v7, 1  ;;  %v7582_v55 = vld [vmem:[%s7405_s6 + $0x78] sm:$0xff] }
  0x39   : > { %v1053_v11 = vsel %vm1036_vm2, %v1050_v4, %v1052_v5  ;;  %v974_v17 = vrot.slane %v7510_v6, 2  ;;  %v976_v18 = vrot.slane %v7513_v7, 2  ;;  %v1054_v21 = vrot.slane %v7510_v6, 3 }
  0x3a   : > { %v897_v15 = vsel %vm876_vm1, %v894_v13, %v896_v14  ;;  %v895_v16 = vsel %vm876_vm1, %v892_v61, %v894_v13  ;;  %v1056_v22 = vrot.slane %v7513_v7, 3  ;;  %v898_v27 = vrot.slane %v7534_v23, 1 }
  0x3b   : > { %914 = vrot.lane.b32.xlu1 %v885_v34, %s10072_s3  ;;  %912 = vrot.lane.b32.xlu0 %v883_v35, %s10072_s3  ;;  %v977_v19 = vsel %vm956_vm0, %v974_v17, %v976_v18  ;;  %v975_v20 = vsel %vm956_vm0, %v972_v1, %v974_v17  ;;  %v1055_v26 = vsel %vm1036_vm2, %v1052_v5, %v1054_v21  ;;  %v900_v30 = vrot.slane %v7537_v24, 1 }
  0x3c   : > { %v1057_v25 = vsel %vm1036_vm2, %v1054_v21, %v1056_v22  ;;  %v899_v32 = vsel %vm876_vm1, %v896_v14, %v898_v27  ;;  %v978_v33 = vrot.slane %v7534_v23, 2  ;;  %v980_v34 = vrot.slane %v7537_v24, 2 }
  0x3d   : > { %v901_v31 = vsel %vm876_vm1, %v898_v27, %v900_v30  ;;  %v1058_v37 = vrot.slane %v7534_v23, 3  ;;  %v904_v46 = vrot.slane %v7561_v40, 1  ;;  %v984_v50 = vrot.slane %v7561_v40, 2 }
  0x3e   : > { %v981_v35 = vsel %vm956_vm0, %v978_v33, %v980_v34  ;;  %v979_v36 = vsel %vm956_vm0, %v976_v18, %v978_v33  ;;  %v1064_v54 = vrot.slane %v7561_v40, 3  ;;  %v906_v60 = vrot.slane %v7582_v55, 1 }
  0x3f   : > { %994 = vrot.lane.b32.xlu1 %v965_v38, %s10074_s5  ;;  %992 = vrot.lane.b32.xlu0 %v963_v39, %s10074_s5  ;;  %v1060_v38 = vrot.slane %v7537_v24, 3  ;;  %v7558_v39 = vld [vmem:[%s7405_s6 + $0x68] sm:$0xff]  ;;  %v1066_v0 = vrot.slane %v7582_v55, 3  ;;  %s5463_s6 = sshll.u32 %s7393_s28, 6 }
  0x40   : > { %v907_v61 = vsel %vm876_vm1, %v904_v46, %v906_v60  ;;  %s7834_s0 = scalar_lea.vmem %s10116_s8, %s5463_s6  ;;  %s10120_s6 = sld [smem:[#allocation16_spill]] }
  0x41   : > { %v1061_v41 = vsel %vm1036_vm2, %v1058_v37, %v1060_v38  ;;  %v1067_v1 = vsel %vm1036_vm2, %v1064_v54, %v1066_v0  ;;  %s7197_s8 = smov 112  }
  0x43   : > { %1074 = vrot.lane.b32.xlu1 %v1045_v44, %s10070_s1  ;;  %1072 = vrot.lane.b32.xlu0 %v1043_v45, %s10070_s1  ;;  %v1059_v44 = vsel %vm1036_vm2, %v1056_v22, %v1058_v37  ;;  %v902_v45 = vrot.slane %v7558_v39, 1 }
  0x45   : > { %v905_v47 = vsel %vm876_vm1, %v902_v45, %v904_v46 }
  0x47   : > { %918 = vrot.lane.b32.xlu1 %v889_v48, %s10072_s3  ;;  %916 = vrot.lane.b32.xlu0 %v887_v49, %s10072_s3  ;;  %v903_v48 = vsel %vm876_vm1, %v900_v30, %v902_v45  ;;  %v982_v49 = vrot.slane %v7558_v39, 2 }
  0x49   : > { %v985_v51 = vsel %vm956_vm0, %v982_v49, %v984_v50 }
  0x4b   : > { %998 = vrot.lane.b32.xlu1 %v969_v52, %s10074_s5  ;;  %996 = vrot.lane.b32.xlu0 %v967_v53, %s10074_s5  ;;  %v983_v52 = vsel %vm956_vm0, %v980_v34, %v982_v49  ;;  %v1062_v53 = vrot.slane %v7558_v39, 3 }
  0x4f   : > { %1078 = vrot.lane.b32.xlu1 %v1049_v58, %s10070_s1  ;;  %1076 = vrot.lane.b32.xlu0 %v1047_v59, %s10070_s1  ;;  %v1065_v58 = vsel %vm1036_vm2, %v1062_v53, %v1064_v54  ;;  %v1063_v59 = vsel %vm1036_vm2, %v1060_v38, %v1062_v53 }
  0x53   : > { %922 = vrot.lane.b32.xlu1 %v893_v62, %s10072_s3  ;;  %920 = vrot.lane.b32.xlu0 %v891_v63, %s10072_s3  ;;  %v986_v62 = vrot.slane %v7582_v55, 2 }
  0x55   : > { %v987_v63 = vsel %vm956_vm0, %v984_v50, %v986_v62 }
  0x57   : > { %1002 = vrot.lane.b32.xlu1 %v973_v2, %s10074_s5  ;;  %1000 = vrot.lane.b32.xlu0 %v971_v3, %s10074_s5 }
  0x5b   : > { %1082 = vrot.lane.b32.xlu1 %v1053_v11, %s10070_s1  ;;  %1080 = vrot.lane.b32.xlu0 %v1051_v12, %s10070_s1 }
  0x5f   : > { %926 = vrot.lane.b32.xlu1 %v897_v15, %s10072_s3  ;;  %924 = vrot.lane.b32.xlu0 %v895_v16, %s10072_s3 }
  0x63   : > { %1006 = vrot.lane.b32.xlu1 %v977_v19, %s10074_s5  ;;  %1004 = vrot.lane.b32.xlu0 %v975_v20, %s10074_s5 }
  0x67   : > { %1086 = vrot.lane.b32.xlu1 %v1057_v25, %s10070_s1  ;;  %1084 = vrot.lane.b32.xlu0 %v1055_v26, %s10070_s1 }
  0x6b   : > { %930 = vrot.lane.b32.xlu1 %v901_v31, %s10072_s3  ;;  %928 = vrot.lane.b32.xlu0 %v899_v32, %s10072_s3 }
  0x6f   : > { %1010 = vrot.lane.b32.xlu1 %v981_v35, %s10074_s5  ;;  %1008 = vrot.lane.b32.xlu0 %v979_v36, %s10074_s5 }
  0x73   : > { %1090 = vrot.lane.b32.xlu1 %v1061_v41, %s10070_s1  ;;  %1088 = vrot.lane.b32.xlu0 %v1059_v44, %s10070_s1 }
  0x77   : > { %934 = vrot.lane.b32.xlu1 %v905_v47, %s10072_s3  ;;  %932 = vrot.lane.b32.xlu0 %v903_v48, %s10072_s3 }
  0x7b   : > { %1014 = vrot.lane.b32.xlu1 %v985_v51, %s10074_s5  ;;  %1012 = vrot.lane.b32.xlu0 %v983_v52, %s10074_s5 }
  0x7f   : > { %1094 = vrot.lane.b32.xlu1 %v1065_v58, %s10070_s1  ;;  %1092 = vrot.lane.b32.xlu0 %v1063_v59, %s10070_s1 }
  0x83   : > { %938 = vrot.lane.b32.xlu1 %v906_v60, %s10072_s3  ;;  %936 = vrot.lane.b32.xlu0 %v907_v61, %s10072_s3 }
  0x87   : > { %1018 = vrot.lane.b32.xlu1 %v986_v62, %s10074_s5  ;;  %1016 = vrot.lane.b32.xlu0 %v987_v63, %s10074_s5  ;;  %s10077_s5 = smov 64  }
  0x8b   : > { %1098 = vrot.lane.b32.xlu1 %v1066_v0, %s10070_s1  ;;  %1096 = vrot.lane.b32.xlu0 %v1067_v1, %s10070_s1  ;;  %s10117_s1 = sld [smem:[#allocation21_spill]] }
  0xa1   : > { %v989_v2 = vpop.permute.xlu1 %988  ;;  %v909_v3 = vpop.permute.xlu0 %908 }
  0xa2   : > { %v1117_v11 = vsel %vm1116_vm3, %v7408_v8, %v909_v3 }
  0xa3   : > { %v1134_v16 = vsel %vm1133_vm4, %v1117_v11, %v989_v2 }
  0xa5   : > { %v991_v4 = vpop.permute.xlu1 %990  ;;  %v911_v5 = vpop.permute.xlu0 %910 }
  0xa6   : > { %v1118_v12 = vsel %vm1116_vm3, %v7411_v9, %v911_v5 }
  0xa7   : > { %v1135_v14 = vsel %vm1133_vm4, %v1118_v12, %v991_v4 }
  0xa9   : > { %v1071_v13 = vpop.permute.xlu1 %1070  ;;  %v1069_v15 = vpop.permute.xlu0 %1068 }
  0xaa   : > { %v1152_v17 = vsel %vm1150_vm5, %v1135_v14, %v1071_v13  ;;  %v1151_v18 = vsel %vm1150_vm5, %v1134_v16, %v1069_v15 }
  0xab   : > { %6104 = vmatprep.mubr.msk.f32.mxu0 %vm1179_vm6, %v1151_v18 }
  0xac   : > { %6105 = vmatmul.mubr.msk.f32.vlgmr.msra.gmra.mrb[0].mxu0 %vm1179_vm6, %v1152_v17 }
  0xad   : > { %v915_v8 = vpop.permute.xlu1 %914  ;;  %v913_v19 = vpop.permute.xlu0 %912 }
  0xae   : > { %v1120_v21 = vsel %vm1116_vm3, %v7438_v28, %v915_v8  ;;  %v1119_v22 = vsel %vm1116_vm3, %v7414_v10, %v913_v19 }
  0xb1   : > { %v995_v9 = vpop.permute.xlu1 %994  ;;  %v993_v20 = vpop.permute.xlu0 %992 }
  0xb2   : > { %v1137_v25 = vsel %vm1133_vm4, %v1120_v21, %v995_v9  ;;  %v1136_v26 = vsel %vm1133_vm4, %v1119_v22, %v993_v20 }
  0xb5   : > { %v1075_v27 = vpop.permute.xlu1 %1074  ;;  %v1073_v30 = vpop.permute.xlu0 %1072 }
  0xb6   : > { %v1154_v31 = vsel %vm1150_vm5, %v1137_v25, %v1075_v27  ;;  %v1153_v32 = vsel %vm1150_vm5, %v1136_v26, %v1073_v30 }
  0xb7   : > { %6107 = vmatprep.mubr.msk.f32.mxu0 %vm1179_vm6, %v1153_v32 }
  0xb8   : > { %6108 = vmatmul.mubr.msk.f32.gmra.mrb[2].mxu0 %vm1179_vm6, %v1154_v31 }
  0xb9   : > { %v919_v33 = vpop.permute.xlu1 %918  ;;  %v917_v34 = vpop.permute.xlu0 %916 }
  0xba   : > { %v1122_v10 = vsel %vm1116_vm3, %v7462_v42, %v919_v33  ;;  %v1121_v36 = vsel %vm1116_vm3, %v7441_v29, %v917_v34 }
  0xbd   : > { %v999_v28 = vpop.permute.xlu1 %998  ;;  %v997_v35 = vpop.permute.xlu0 %996 }
  0xbe   : > { %v1139_v37 = vsel %vm1133_vm4, %v1122_v10, %v999_v28  ;;  %v1138_v38 = vsel %vm1133_vm4, %v1121_v36, %v997_v35 }
  0xc1   : > { %v1079_v41 = vpop.permute.xlu1 %1078  ;;  %v1077_v44 = vpop.permute.xlu0 %1076 }
  0xc2   : > { %v1156_v45 = vsel %vm1150_vm5, %v1139_v37, %v1079_v41  ;;  %v1155_v46 = vsel %vm1150_vm5, %v1138_v38, %v1077_v44 }
  0xc3   : > { %6110 = vmatprep.mubr.msk.f32.mxu0 %vm1179_vm6, %v1155_v46 }
  0xc4   : > { %6111 = vmatmul.mubr.msk.f32.gmra.mrb[4].mxu0 %vm1179_vm6, %v1156_v45  ;;  %v1674_v45 = vld [vmem:[%s10044_s11] sm:$0xff] }
  0xc5   : > { %v923_v47 = vpop.permute.xlu1 %922  ;;  %v921_v48 = vpop.permute.xlu0 %920 }
  0xc6   : > { %v1124_v29 = vsel %vm1116_vm3, %v7486_v56, %v923_v47  ;;  %v1123_v50 = vsel %vm1116_vm3, %v7465_v43, %v921_v48  ;;  %v1675_v47 = vld [vmem:[%s10044_s11 + $0x8] sm:$0xff] }
  0xc7   : > { %v6322_v48 = vpack.c.bf16 %v1675_v47, %v1674_v45  ;;  %v2102_v45 = vld [vmem:[%s10115_s26 + $0x8] sm:$0xff] }
  0xc9   : > { %v1003_v42 = vpop.permute.xlu1 %1002  ;;  %v1001_v49 = vpop.permute.xlu0 %1000 }
  0xca   : > { %v1141_v51 = vsel %vm1133_vm4, %v1124_v29, %v1003_v42  ;;  %v1140_v52 = vsel %vm1133_vm4, %v1123_v50, %v1001_v49  ;;  %v1692_v42 = vld [vmem:[%s10044_s11 + $0x90] sm:$0xff]  ;;  %v1693_v49 = vld [vmem:[%s10044_s11 + $0x98] sm:$0xff] }
  0xcb   : > { %v1676_v29 = vld [vmem:[%s10044_s11 + $0x10] sm:$0xff]  ;;  %v6324_v50 = vpack.c.bf16 %v1693_v49, %v1692_v42 }
  0xcd   : > { %v1083_v53 = vpop.permute.xlu1 %1082  ;;  %v1081_v54 = vpop.permute.xlu0 %1080 }
  0xce   : > { %v1158_v58 = vsel %vm1150_vm5, %v1141_v51, %v1083_v53  ;;  %v1157_v59 = vsel %vm1150_vm5, %v1140_v52, %v1081_v54  ;;  %v1677_v51 = vld [vmem:[%s10044_s11 + $0x18] sm:$0xff]  ;;  %v1694_v53 = vld [vmem:[%s10044_s11 + $0xa0] sm:$0xff]  ;;  %v1695_v54 = vld [vmem:[%s10044_s11 + $0xa8] sm:$0xff] }
  0xcf   : > { %6113 = vmatprep.mubr.msk.f32.mxu0 %vm1179_vm6, %v1157_v59  ;;  %v6326_v52 = vpack.c.bf16 %v1677_v51, %v1676_v29  ;;  %v6328_v59 = vpack.c.bf16 %v1695_v54, %v1694_v53  ;;  %v2103_v51 = vld [vmem:[%s10115_s26 + $0x10] sm:$0xff] }
  0xd0   : > { %6114 = vmatmul.mubr.msk.f32.gmra.mrb[6].mxu0 %vm1179_vm6, %v1158_v58  ;;  %v1678_v58 = vld [vmem:[%s10044_s11 + $0x20] sm:$0xff] }
  0xd1   : > { %v927_v60 = vpop.permute.xlu1 %926  ;;  %v925_v61 = vpop.permute.xlu0 %924 }
  0xd2   : > { %v1126_v43 = vsel %vm1116_vm3, %v7510_v6, %v927_v60  ;;  %v1125_v63 = vsel %vm1116_vm3, %v7489_v57, %v925_v61  ;;  %v1679_v60 = vld [vmem:[%s10044_s11 + $0x28] sm:$0xff] }
  0xd3   : > { %v6330_v61 = vpack.c.bf16 %v1679_v60, %v1678_v58 }
  0xd5   : > { %v1007_v56 = vpop.permute.xlu1 %1006  ;;  %v1005_v62 = vpop.permute.xlu0 %1004 }
  0xd6   : > { %v1143_v0 = vsel %vm1133_vm4, %v1126_v43, %v1007_v56  ;;  %v1142_v1 = vsel %vm1133_vm4, %v1125_v63, %v1005_v62  ;;  %v1696_v56 = vld [vmem:[%s10044_s11 + $0xb0] sm:$0xff]  ;;  %v1697_v62 = vld [vmem:[%s10044_s11 + $0xb8] sm:$0xff] }
  0xd7   : > { %v1680_v43 = vld [vmem:[%s10044_s11 + $0x30] sm:$0xff]  ;;  %v6332_v63 = vpack.c.bf16 %v1697_v62, %v1696_v56  ;;  %v2106_v56 = vld [vmem:[%s10115_s26 + $0x28] sm:$0xff] }
  0xd9   : > { %v1087_v2 = vpop.permute.xlu1 %1086  ;;  %v1085_v3 = vpop.permute.xlu0 %1084 }
  0xda   : > { %v1160_v4 = vsel %vm1150_vm5, %v1143_v0, %v1087_v2  ;;  %v1159_v5 = vsel %vm1150_vm5, %v1142_v1, %v1085_v3  ;;  %v1681_v0 = vld [vmem:[%s10044_s11 + $0x38] sm:$0xff]  ;;  %v1698_v1 = vld [vmem:[%s10044_s11 + $0xc0] sm:$0xff]  ;;  %v1699_v2 = vld [vmem:[%s10044_s11 + $0xc8] sm:$0xff] }
  0xdb   : > { %6116 = vmatprep.mubr.msk.f32.mxu0 %vm1179_vm6, %v1159_v5  ;;  %v6334_v3 = vpack.c.bf16 %v1681_v0, %v1680_v43  ;;  %v1682_v5 = vld [vmem:[%s10044_s11 + $0x40] sm:$0xff] }
  0xdc   : > { %6117 = vmatmul.mubr.msk.f32.gmra.mrb[8].mxu0 %vm1179_vm6, %v1160_v4  ;;  %v6336_v4 = vpack.c.bf16 %v1699_v2, %v1698_v1 }
  0xdd   : > { %v931_v11 = vpop.permute.xlu1 %930  ;;  %v929_v12 = vpop.permute.xlu0 %928 }
  0xde   : > { %v1128_v57 = vsel %vm1116_vm3, %v7534_v23, %v931_v11  ;;  %v1127_v14 = vsel %vm1116_vm3, %v7513_v7, %v929_v12  ;;  %v1683_v11 = vld [vmem:[%s10044_s11 + $0x48] sm:$0xff] }
  0xdf   : > { %v6338_v12 = vpack.c.bf16 %v1683_v11, %v1682_v5 }
  0xe1   : > { %v1011_v6 = vpop.permute.xlu1 %1010  ;;  %v1009_v13 = vpop.permute.xlu0 %1008 }
  0xe2   : > { %v1145_v15 = vsel %vm1133_vm4, %v1128_v57, %v1011_v6  ;;  %v1144_v16 = vsel %vm1133_vm4, %v1127_v14, %v1009_v13  ;;  %v1700_v6 = vld [vmem:[%s10044_s11 + $0xd0] sm:$0xff]  ;;  %v1701_v13 = vld [vmem:[%s10044_s11 + $0xd8] sm:$0xff]  ;;  %v1175_v57 = vlaneseq }
  0xe3   : > { %v6340_v14 = vpack.c.bf16 %v1701_v13, %v1700_v6  ;;  %v2108_v6 = vld [vmem:[%s10115_s26 + $0x38] sm:$0xff] }
  0xe5   : > { %v1091_v17 = vpop.permute.xlu1 %1090  ;;  %v1089_v18 = vpop.permute.xlu0 %1088 }
  0xe6   : > { %v1162_v8 = vsel %vm1150_vm5, %v1145_v15, %v1091_v17  ;;  %v1161_v19 = vsel %vm1150_vm5, %v1144_v16, %v1089_v18  ;;  %v1684_v15 = vld [vmem:[%s10044_s11 + $0x50] sm:$0xff]  ;;  %v1685_v16 = vld [vmem:[%s10044_s11 + $0x58] sm:$0xff]  ;;  %v1702_v17 = vld [vmem:[%s10044_s11 + $0xe0] sm:$0xff] }
  0xe7   : > { %6119 = vmatprep.mubr.msk.f32.mxu0 %vm1179_vm6, %v1161_v19  ;;  %v1703_v18 = vld [vmem:[%s10044_s11 + $0xe8] sm:$0xff]  ;;  %v7760_v19 = vshrl.u32 %v1175_v57, 7 }
  0xe8   : > { %6120 = vmatmul.mubr.msk.f32.gmra.mrb[10].mxu0 %vm1179_vm6, %v1162_v8  ;;  %v6342_v8 = vpack.c.bf16 %v1685_v16, %v1684_v15  ;;  %v7850_v15 = vld [vmem:[%s7834_s0 + $0x8] sm:$0xff] }
  0xe9   : > { %v935_v9 = vpop.permute.xlu1 %934  ;;  %v933_v20 = vpop.permute.xlu0 %932 }
  0xea   : > { %v1130_v7 = vsel %vm1116_vm3, %v7558_v39, %v935_v9  ;;  %v1129_v22 = vsel %vm1116_vm3, %v7537_v24, %v933_v20  ;;  %v6344_v9 = vpack.c.bf16 %v1703_v18, %v1702_v17  ;;  %v1686_v20 = vld [vmem:[%s10044_s11 + $0x60] sm:$0xff]  ;;  %v7855_v18 = vld [vmem:[%s7834_s0 + $0x10] sm:$0xff] }
  0xed   : > { %v1015_v23 = vpop.permute.xlu1 %1014  ;;  %v1013_v21 = vpop.permute.xlu0 %1012 }
  0xee   : > { %v1147_v25 = vsel %vm1133_vm4, %v1130_v7, %v1015_v23  ;;  %v1146_v26 = vsel %vm1133_vm4, %v1129_v22, %v1013_v21  ;;  %v1687_v23 = vld [vmem:[%s10044_s11 + $0x68] sm:$0xff]  ;;  %v7769_v7 = vsub.s32 0, %v7760_v19  ;;  %v842_v22 = vld [vmem:[%s10043_s10] sm:$0x1f] }
  0xef   : > { %v6346_v21 = vpack.c.bf16 %v1687_v23, %v1686_v20  ;;  %v2109_v20 = vld [vmem:[%s10115_s26 + $0x40] sm:$0xff]  ;;  %v2110_v23 = vld [vmem:[%s10115_s26 + $0x48] sm:$0xff] }
  0xf1   : > { %v1095_v27 = vpop.permute.xlu1 %1094  ;;  %v1093_v30 = vpop.permute.xlu0 %1092 }
  0xf2   : > { %v1164_v31 = vsel %vm1150_vm5, %v1147_v25, %v1095_v27  ;;  %v1163_v32 = vsel %vm1150_vm5, %v1146_v26, %v1093_v30  ;;  %v1704_v25 = vld [vmem:[%s10044_s11 + $0xf0] sm:$0xff]  ;;  %v1705_v26 = vld [vmem:[%s10044_s11 + $0xf8] sm:$0xff]  ;;  %v7781_v27 = vrot.slane %v842_v22, %v7769_v7 }
  0xf3   : > { %6122 = vmatprep.mubr.msk.f32.mxu0 %vm1179_vm6, %v1163_v32  ;;  %v6348_v30 = vpack.c.bf16 %v1705_v26, %v1704_v25  ;;  %v1689_v32 = vld [vmem:[%s10044_s11 + $0x78] sm:$0xff]  ;;  %v1960_v25 = vrot.slane %v7850_v15, 1  ;;  %v6368_v26 = vpack.c.bf16 %v2110_v23, %v2109_v20 }
  0xf4   : > { %6123 = vmatmul.mubr.msk.f32.gmra.mrb[12].mxu0 %vm1179_vm6, %v1164_v31  ;;  %v1688_v31 = vld [vmem:[%s10044_s11 + $0x70] sm:$0xff] }
  0xf5   : > { %v939_v33 = vpop.permute.xlu1 %938  ;;  %v937_v34 = vpop.permute.xlu0 %936 }
  0xf6   : > { %v1132_v24 = vsel %vm1116_vm3, %v7582_v55, %v939_v33  ;;  %v1131_v35 = vsel %vm1116_vm3, %v7561_v40, %v937_v34  ;;  %v1690_v55 = vld [vmem:[%s10044_s11 + $0x80] sm:$0xff]  ;;  %v1691_v40 = vld [vmem:[%s10044_s11 + $0x88] sm:$0xff]  ;;  %v6350_v33 = vpack.c.bf16 %v1689_v32, %v1688_v31  ;;  %v1962_v31 = vrot.slane %v7855_v18, 1 }
  0xf7   : > { %v6320_v46 = vpack.c.bf16 %v1691_v40, %v1690_v55  ;;  %v2101_v40 = vld [vmem:[%s10114_s30] sm:$0xff] }
  0xf9   : > { %v1019_v39 = vpop.permute.xlu1 %1018  ;;  %v1017_v28 = vpop.permute.xlu0 %1016  ;;  %6321 = vmatprep.subr.bf16.mxu1 %v6320_v46 }
  0xfa   : > { %v1149_v10 = vsel %vm1133_vm4, %v1132_v24, %v1019_v39  ;;  %v1148_v36 = vsel %vm1133_vm4, %v1131_v35, %v1017_v28  ;;  %6323 = vmatpush3.bf16.msra.mxu1 %v6322_v48  ;;  %v6352_v48 = vpack.c.bf16 %v2102_v45, %v2101_v40 }
  0xfb   : > { %6325 = vmatprep.subr.bf16.mxu1 %v6324_v50 }
  0xfc   : > { %6353 = vmatprep.subr.bf16.mxu0 %v6352_v48 }
  0xfd   : > { %v1099_v37 = vpop.permute.xlu1 %1098  ;;  %v1097_v38 = vpop.permute.xlu0 %1096  ;;  %6355 = vmatpush3.bf16.msra.mxu0 %v6352_v48 }
  0xfe   : > { %v1166_v41 = vsel %vm1150_vm5, %v1149_v10, %v1099_v37  ;;  %v1165_v44 = vsel %vm1150_vm5, %v1148_v36, %v1097_v38  ;;  %6327 = vmatpush3.bf16.msra.mxu1 %v6326_v52  ;;  %v2104_v52 = vld [vmem:[%s10115_s26 + $0x18] sm:$0xff] }
  0xff   : > { %6125 = vmatprep.mubr.msk.f32.mxu0 %vm1179_vm6, %v1165_v44  ;;  %6329 = vmatprep.subr.bf16.mxu1 %v6328_v59  ;;  %v6356_v54 = vpack.c.bf16 %v2104_v52, %v2103_v51  ;;  %v2113_v51 = vld [vmem:[%s10115_s26 + $0x60] sm:$0xff]  ;;  %v2114_v52 = vld [vmem:[%s10115_s26 + $0x68] sm:$0xff] }
 0x100   : > { %6126 = vmatmul.mubr.msk.f32.gmra.mrb[14].mxu0 %vm1179_vm6, %v1166_v41 }
 0x101   : > { %6357 = vmatprep.subr.bf16.mxu0 %v6356_v54 }
 0x102   : > { %6331 = vmatpush3.bf16.msra.mxu1 %v6330_v61  ;;  %6359 = vmatpush3.bf16.msra.mxu0 %v6356_v54  ;;  %v2105_v61 = vld [vmem:[%s10115_s26 + $0x20] sm:$0xff] }
 0x103   : > { %6333 = vmatprep.subr.bf16.mxu1 %v6332_v63  ;;  %v6360_v2 = vpack.c.bf16 %v2106_v56, %v2105_v61  ;;  %v2646_v61 = vld [vmem:[%s10117_s1 + $0x88] sm:$0xff] }
 0x105   : > { %6361 = vmatprep.subr.bf16.mxu0 %v6360_v2 }
 0x106   : > { %6335 = vmatpush3.bf16.msra.mxu1 %v6334_v3  ;;  %6363 = vmatpush3.bf16.msra.mxu0 %v6360_v2 }
 0x107   : > { %6337 = vmatprep.subr.bf16.mxu1 %v6336_v4 }
 0x10a   : > { %6339 = vmatpush3.bf16.msra.mxu1 %v6338_v12  ;;  %v2107_v12 = vld [vmem:[%s10115_s26 + $0x30] sm:$0xff] }
 0x10b   : > { %6341 = vmatprep.subr.bf16.mxu1 %v6340_v14  ;;  %v7847_v14 = vld [vmem:[%s7834_s0] sm:$0xff]  ;;  %v6364_v16 = vpack.c.bf16 %v2108_v6, %v2107_v12 }
 0x10c   : > { %v1959_v22 = vrot.slane %v7847_v14, 1  ;;  %v1998_v32 = vrot.slane %v7847_v14, 2  ;;  %v2037_v6 = vrot.slane %v7847_v14, 3 }
 0x10d   : > { %6365 = vmatprep.subr.bf16.mxu0 %v6364_v16 }
 0x10e   : > { %6343 = vmatpush3.bf16.msra.mxu1 %v6342_v8  ;;  %6367 = vmatpush3.bf16.msra.mxu0 %v6364_v16  ;;  %v1961_v45 = vsel %vm876_vm1, %v1959_v22, %v1960_v25  ;;  %v2040_v16 = vrot.slane %v7855_v18, 3 }
 0x10f   : > { %6345 = vmatprep.subr.bf16.mxu1 %v6344_v9  ;;  %6369 = vmatprep.subr.bf16.mxu0 %v6368_v26 }
 0x112   : > { %6347 = vmatpush3.bf16.msra.mxu1 %v6346_v21  ;;  %6371 = vmatpush3.bf16.msra.mxu0 %v6368_v26 }
 0x113   : > { %6349 = vmatprep.subr.bf16.mxu1 %v6348_v30 }
 0x116   : > { %6351 = vmatpush3.bf16.msra.mxu1 %v6350_v33 }
 0x17f   : > { %v6106_v34 = vpop.f32.mrb[0].mxu0 }
 0x180   : > { %v1300_v39 = vadd.f32 %v6106_v34, %v7781_v27  ;;  %v1294_v28 = vpop.f32.mrb[1].mxu0  ;;  %v1999_v34 = vrot.slane %v7850_v15, 2 }
 0x181   : > { %v1295_v24 = vadd.f32 %v1294_v28, %v7781_v27 }
 0x182   : > { %vm1374_vm7 = vcmp.ge.f32.partialorder %v1300_v39, 0.0  ;;  %v1390_v35 = vmul.f32 0.01, %v1300_v39 }
 0x183   : > { %vm1373_vm8 = vcmp.ge.f32.partialorder %v1295_v24, 0.0  ;;  %v1389_v10 = vmul.f32 0.01, %v1295_v24 }
 0x184   : > { %v7791_v36 = vsel %vm1374_vm7, %v1300_v39, %v1390_v35  ;;  %v2001_v39 = vrot.slane %v7855_v18, 2  ;;  %v2112_v35 = vld [vmem:[%s10115_s26 + $0x58] sm:$0xff] }
 0x185   : > { %v1438_v37 = vrot.slane %v7791_v36, 1  ;;  %v1564_v38 = vrot.slane %v7791_v36, 3  ;;  %v7795_v41 = vsel %vm1373_vm8, %v1295_v24, %v1389_v10  ;;  %v2111_v24 = vld [vmem:[%s10115_s26 + $0x50] sm:$0xff] }
 0x186   : > { %v1437_v44 = vrot.slane %v7795_v41, 1  ;;  %v1563_v55 = vrot.slane %v7795_v41, 3  ;;  %v6372_v40 = vpack.c.bf16 %v2112_v35, %v2111_v24  ;;  %v2002_v48 = vsel %vm956_vm0, %v1999_v34, %v2001_v39  ;;  %v7941_v35 = vld [vmem:[%s7834_s0 + $0x18] sm:$0xff] }
 0x188   : > { %v1439_v46 = vsel %vm876_vm1, %v1437_v44, %v1438_v37  ;;  %v1565_v47 = vsel %vm1036_vm2, %v1563_v55, %v1564_v38  ;;  %6373 = vmatprep.subr.bf16.mxu0 %v6372_v40 }
 0x189   : > { %v6861_v42 = vpack.i.bf16 %v1439_v46, %v1565_v47  ;;  %v1963_v46 = vsel %vm876_vm1, %v1960_v25, %v1962_v31  ;;  %v2000_v47 = vsel %vm956_vm0, %v1998_v32, %v1999_v34  ;;  %6375 = vmatpush3.bf16.msra.mxu0 %v6372_v40 }
 0x18b   : > { %6862 = vrot.lane.b32.xlu0 %v6861_v42, %s10077_s5  ;;  %v6109_v49 = vpop.f32.mrb[2].mxu0 }
 0x18c   : > { %v1310_v29 = vadd.f32 %v6109_v49, %v7781_v27  ;;  %v1304_v50 = vpop.f32.mrb[3].mxu0 }
 0x18d   : > { %v1305_v53 = vadd.f32 %v1304_v50, %v7781_v27 }
 0x18e   : > { %vm1376_vm9 = vcmp.ge.f32.partialorder %v1310_v29, 0.0  ;;  %v1392_v58 = vmul.f32 0.01, %v1310_v29 }
 0x18f   : > { %vm1375_vm10 = vcmp.ge.f32.partialorder %v1305_v53, 0.0  ;;  %v1391_v59 = vmul.f32 0.01, %v1305_v53 }
 0x190   : > { %v7816_v60 = vsel %vm1376_vm9, %v1310_v29, %v1392_v58  ;;  %v6376_v58 = vpack.c.bf16 %v2114_v52, %v2113_v51  ;;  %v7961_v52 = vld [vmem:[%s7834_s0 + $0x28] sm:$0xff] }
 0x191   : > { %v1442_v62 = vrot.slane %v7816_v60, 1  ;;  %v1568_v43 = vrot.slane %v7816_v60, 3  ;;  %v7827_v63 = vsel %vm1375_vm10, %v1305_v53, %v1391_v59  ;;  %v2645_v59 = vld [vmem:[%s10117_s1 + $0x80] sm:$0xff] }
 0x192   : > { %v1440_v0 = vrot.slane %v7827_v63, 1  ;;  %v1566_v1 = vrot.slane %v7827_v63, 3  ;;  %6377 = vmatprep.subr.bf16.mxu0 %v6376_v58 }
 0x193   : > { %6379 = vmatpush3.bf16.msra.mxu0 %v6376_v58 }
 0x194   : > { %v1443_v3 = vsel %vm876_vm1, %v1440_v0, %v1442_v62  ;;  %v1569_v4 = vsel %vm1036_vm2, %v1566_v1, %v1568_v43  ;;  %v1441_v5 = vsel %vm876_vm1, %v1438_v37, %v1440_v0  ;;  %v1567_v11 = vsel %vm1036_vm2, %v1564_v38, %v1566_v1 }
 0x195   : > { %v6871_v13 = vpack.i.bf16 %v1443_v3, %v1569_v4  ;;  %v6866_v57 = vpack.i.bf16 %v1441_v5, %v1567_v11  ;;  %v6416_v0 = vpack.c.bf16 %v2646_v61, %v2645_v59  ;;  %v2115_v3 = vld [vmem:[%s10115_s26 + $0x70] sm:$0xff]  ;;  %v2116_v4 = vld [vmem:[%s10115_s26 + $0x78] sm:$0xff]  ;;  %s10130_s26 = sld [smem:[#allocation6_spill]] }
 0x196   : > { %v6380_v11 = vpack.c.bf16 %v2116_v4, %v2115_v3 }
 0x197   : > { %6872 = vrot.lane.b32.xlu0 %v6871_v13, %s10077_s5  ;;  %6867 = vrot.lane.b32.xlu1 %v6866_v57, %s10077_s5  ;;  %v6112_v17 = vpop.f32.mrb[4].mxu0  ;;  %s10119_s5 = smov 32   ;;  %v2038_v57 = vrot.slane %v7850_v15, 3 }
 0x198   : > { %v1320_v8 = vadd.f32 %v6112_v17, %v7781_v27  ;;  %v1314_v9 = vpop.f32.mrb[5].mxu0  ;;  %6417 = vmatprep.subr.bf16.mxu1 %v6416_v0  ;;  %6381 = vmatprep.subr.bf16.mxu0 %v6380_v11  ;;  %v2042_v0 = vrot.slane %v7941_v35, 3 }
 0x199   : > { %v1315_v21 = vadd.f32 %v1314_v9, %v7781_v27  ;;  %6383 = vmatpush3.bf16.msra.mxu0 %v6380_v11  ;;  %v2039_v22 = vsel %vm1036_vm2, %v2037_v6, %v2038_v57  ;;  %v2041_v25 = vsel %vm1036_vm2, %v2038_v57, %v2040_v16 }
 0x19a   : > { %vm1378_vm11 = vcmp.ge.f32.partialorder %v1320_v8, 0.0  ;;  %v1394_v30 = vmul.f32 0.01, %v1320_v8  ;;  %v6906_v40 = vpack.i.bf16 %v2041_v25, %v2039_v22 }
 0x19b   : > { %vm1377_vm12 = vcmp.ge.f32.partialorder %v1315_v21, 0.0  ;;  %v1393_v33 = vmul.f32 0.01, %v1315_v21 }
 0x19c   : > { %v7871_v28 = vsel %vm1378_vm11, %v1320_v8, %v1394_v30 }
 0x19d   : > { %v1446_v10 = vrot.slane %v7871_v28, 1  ;;  %v1572_v37 = vrot.slane %v7871_v28, 3  ;;  %v7881_v38 = vsel %vm1377_vm12, %v1315_v21, %v1393_v33 }
 0x19e   : > { %v1444_v44 = vrot.slane %v7881_v38, 1  ;;  %v1570_v55 = vrot.slane %v7881_v38, 3 }
 0x1a0   : > { %v1447_v42 = vsel %vm876_vm1, %v1444_v44, %v1446_v10  ;;  %v1573_v49 = vsel %vm1036_vm2, %v1570_v55, %v1572_v37  ;;  %v1445_v29 = vsel %vm876_vm1, %v1442_v62, %v1444_v44  ;;  %v1571_v50 = vsel %vm1036_vm2, %v1568_v43, %v1570_v55  ;;  %v7944_v44 = vld [vmem:[%s7834_s0 + $0x20] sm:$0xff] }
 0x1a1   : > { %v6881_v53 = vpack.i.bf16 %v1447_v42, %v1573_v49  ;;  %v6876_v54 = vpack.i.bf16 %v1445_v29, %v1571_v50  ;;  %v6886_v62 = vpack.i.bf16 %v1963_v46, %v1961_v45  ;;  %v6891_v43 = vpack.i.bf16 %v2002_v48, %v2000_v47 }
 0x1a2   : > { %v1966_v47 = vrot.slane %v7944_v44, 1  ;;  %v2003_v42 = vrot.slane %v7941_v35, 2  ;;  %v2005_v49 = vrot.slane %v7944_v44, 2 }
 0x1a3   : > { %6882 = vrot.lane.b32.xlu0 %v6881_v53, %s10118_s25  ;;  %6877 = vrot.lane.b32.xlu1 %v6876_v54, %s10118_s25  ;;  %v6115_v56 = vpop.f32.mrb[6].mxu0  ;;  %v7964_v53 = vld [vmem:[%s7834_s0 + $0x30] sm:$0xff] }
 0x1a4   : > { %v1330_v1 = vadd.f32 %v6115_v56, %v7781_v27  ;;  %v1324_v2 = vpop.f32.mrb[7].mxu0  ;;  %v1970_v3 = vrot.slane %v7964_v53, 1 }
 0x1a5   : > { %v1325_v5 = vadd.f32 %v1324_v2, %v7781_v27  ;;  %v1968_v2 = vrot.slane %v7961_v52, 1 }
 0x1a6   : > { %vm1380_vm13 = vcmp.ge.f32.partialorder %v1330_v1, 0.0  ;;  %v1396_v12 = vmul.f32 0.01, %v1330_v1 }
 0x1a7   : > { %vm1379_vm14 = vcmp.ge.f32.partialorder %v1325_v5, 0.0  ;;  %v1395_v13 = vmul.f32 0.01, %v1325_v5  ;;  %6887 = vrot.lane.b32.xlu0 %v6886_v62, %s10119_s5  ;;  %6892 = vrot.lane.b32.xlu1 %v6891_v43, %s10118_s25  ;;  %v2006_v43 = vsel %vm956_vm0, %v2003_v42, %v2005_v49 }
 0x1a8   : > { %v7924_v17 = vsel %vm1380_vm13, %v1330_v1, %v1396_v12  ;;  %v2044_v1 = vrot.slane %v7944_v44, 3 }
 0x1a9   : > { %v1450_v8 = vrot.slane %v7924_v17, 1  ;;  %v1576_v9 = vrot.slane %v7924_v17, 3  ;;  %v7928_v20 = vsel %vm1379_vm14, %v1325_v5, %v1395_v13  ;;  %vm2092_vm14 = vcmask 785408  }
 0x1aa   : > { %v1448_v23 = vrot.slane %v7928_v20, 1  ;;  %v1574_v21 = vrot.slane %v7928_v20, 3  ;;  %v2045_v22 = vsel %vm1036_vm2, %v2042_v0, %v2044_v1 }
 0x1ac   : > { %v1451_v26 = vsel %vm876_vm1, %v1448_v23, %v1450_v8  ;;  %v1577_v30 = vsel %vm1036_vm2, %v1574_v21, %v1576_v9  ;;  %v1449_v32 = vsel %vm876_vm1, %v1446_v10, %v1448_v23  ;;  %v1575_v33 = vsel %vm1036_vm2, %v1572_v37, %v1574_v21 }
 0x1ad   : > { %v6901_v34 = vpack.i.bf16 %v1451_v26, %v1577_v30  ;;  %v6896_v24 = vpack.i.bf16 %v1449_v32, %v1575_v33  ;;  %v1964_v10 = vrot.slane %v7941_v35, 1  ;;  %v2043_v21 = vsel %vm1036_vm2, %v2040_v16, %v2042_v0 }
 0x1ae   : > { %v1971_v26 = vsel %vm876_vm1, %v1968_v2, %v1970_v3  ;;  %v2007_v30 = vrot.slane %v7961_v52, 2  ;;  %v2009_v32 = vrot.slane %v7964_v53, 2 }
 0x1af   : > { %6902 = vrot.lane.b32.xlu0 %v6901_v34, %s10118_s25  ;;  %6897 = vrot.lane.b32.xlu1 %v6896_v24, %s10118_s25  ;;  %v6118_v55 = vpop.f32.mrb[8].mxu0  ;;  %v1965_v51 = vsel %vm876_vm1, %v1962_v31, %v1964_v10  ;;  %v1967_v61 = vsel %vm876_vm1, %v1964_v10, %v1966_v47  ;;  %v2004_v31 = vsel %vm956_vm0, %v2001_v39, %v2003_v42 }
 0x1b0   : > { %v1340_v45 = vadd.f32 %v6118_v55, %v7781_v27  ;;  %v1334_v46 = vpop.f32.mrb[9].mxu0  ;;  %v6921_v13 = vpack.i.bf16 %v1967_v61, %v1965_v51  ;;  %v6926_v57 = vpack.i.bf16 %v2006_v43, %v2004_v31  ;;  %v6931_v24 = vpack.i.bf16 %v2045_v22, %v2043_v21 }
 0x1b1   : > { %v1335_v37 = vadd.f32 %v1334_v46, %v7781_v27  ;;  %v2010_v46 = vsel %vm956_vm0, %v2007_v30, %v2009_v32 }
 0x1b2   : > { %vm1382_vm15 = vcmp.ge.f32.partialorder %v1340_v45, 0.0  ;;  %v1398_v48 = vmul.f32 0.01, %v1340_v45 }
 0x1b3   : > { %vm1381_vm7 = vcmp.ge.f32.partialorder %v1335_v37, 0.0  ;;  %v1397_v29 = vmul.f32 0.01, %v1335_v37  ;;  %6907 = vrot.lane.b32.xlu0 %v6906_v40, %s10080_s29 }
 0x1b4   : > { %v7955_v50 = vsel %vm1382_vm15, %v1340_v45, %v1398_v48  ;;  %v2008_v45 = vsel %vm956_vm0, %v2005_v49, %v2007_v30 }
 0x1b5   : > { %v1454_v54 = vrot.slane %v7955_v50, 1  ;;  %v1580_v58 = vrot.slane %v7955_v50, 3  ;;  %v7968_v59 = vsel %vm1381_vm7, %v1335_v37, %v1397_v29  ;;  %v6941_v29 = vpack.i.bf16 %v2010_v46, %v2008_v45 }
 0x1b6   : > { %v1452_v56 = vrot.slane %v7968_v59, 1  ;;  %v1578_v62 = vrot.slane %v7968_v59, 3 }
 0x1b8   : > { %v1455_v4 = vsel %vm876_vm1, %v1452_v56, %v1454_v54  ;;  %v1581_v5 = vsel %vm1036_vm2, %v1578_v62, %v1580_v58  ;;  %v1453_v11 = vsel %vm876_vm1, %v1450_v8, %v1452_v56  ;;  %v1579_v12 = vsel %vm1036_vm2, %v1576_v9, %v1578_v62 }
 0x1b9   : > { %v6916_v6 = vpack.i.bf16 %v1455_v4, %v1581_v5  ;;  %v6911_v39 = vpack.i.bf16 %v1453_v11, %v1579_v12  ;;  %v1969_v8 = vsel %vm876_vm1, %v1966_v47, %v1968_v2  ;;  %v2046_v5 = vrot.slane %v7961_v52, 3 }
 0x1ba   : > { %v6936_v55 = vpack.i.bf16 %v1971_v26, %v1969_v8  ;;  %v2048_v11 = vrot.slane %v7964_v53, 3 }
 0x1bb   : > { %6917 = vrot.lane.b32.xlu0 %v6916_v6, %s10118_s25  ;;  %6912 = vrot.lane.b32.xlu1 %v6911_v39, %s10118_s25  ;;  %v6121_v23 = vpop.f32.mrb[10].mxu0  ;;  %v8031_v6 = vld [vmem:[%s7834_s0 + $0x38] sm:$0xff]  ;;  %v2047_v22 = vsel %vm1036_vm2, %v2044_v1, %v2046_v5  ;;  %s5464_s0 = sshll.u32 %s7393_s28, 5 }
 0x1bc   : > { %v1350_v9 = vadd.f32 %v6121_v23, %v7781_v27  ;;  %v1344_v25 = vpop.f32.mrb[11].mxu0  ;;  %v2049_v8 = vsel %vm1036_vm2, %v2046_v5, %v2048_v11  ;;  %s8061_s3 = scalar_lea.vmem %s10120_s6, %s5464_s0  ;;  %s10122_s0 = sld [smem:[#allocation17_spill]] }
 0x1bd   : > { %v1345_v33 = vadd.f32 %v1344_v25, %v7781_v27  ;;  %s841_s6 = scalar_lea.vmem %s10126_s4, %s10125_s2  ;;  %s10131_s2 = sld [smem:[#allocation9_spill]] }
 0x1be   : > { %vm1384_vm8 = vcmp.ge.f32.partialorder %v1350_v9, 0.0  ;;  %v1400_v16 = vmul.f32 0.01, %v1350_v9 }
 0x1bf   : > { %vm1383_vm9 = vcmp.ge.f32.partialorder %v1345_v33, 0.0  ;;  %v1399_v34 = vmul.f32 0.01, %v1345_v33  ;;  %6922 = vrot.lane.b32.xlu0 %v6921_v13, %s10119_s5  ;;  %6927 = vrot.lane.b32.xlu1 %v6926_v57, %s10118_s25 }
 0x1c0   : > { %v8003_v40 = vsel %vm1384_vm8, %v1350_v9, %v1400_v16  ;;  %v2011_v9 = vrot.slane %v8031_v6, 2 }
 0x1c1   : > { %v8009_v10 = vsel %vm1383_vm9, %v1345_v33, %v1399_v34  ;;  %v1458_v37 = vrot.slane %v8003_v40, 1  ;;  %v1584_v47 = vrot.slane %v8003_v40, 3 }
 0x1c2   : > { %v1456_v48 = vrot.slane %v8009_v10, 1  ;;  %v1582_v42 = vrot.slane %v8009_v10, 3  ;;  %v2012_v46 = vsel %vm956_vm0, %v2009_v32, %v2011_v9 }
 0x1c3   : > { %6932 = vrot.lane.b32.xlu0 %v6931_v24, %s10080_s29  ;;  %6937 = vrot.lane.b32.xlu1 %v6936_v55, %s10119_s5  ;;  %v6961_v24 = vpack.i.bf16 %v2049_v8, %v2047_v22 }
 0x1c4   : > { %v1457_v49 = vsel %vm876_vm1, %v1454_v54, %v1456_v48  ;;  %v1583_v51 = vsel %vm1036_vm2, %v1580_v58, %v1582_v42  ;;  %v1459_v56 = vsel %vm876_vm1, %v1456_v48, %v1458_v37  ;;  %v1585_v62 = vsel %vm1036_vm2, %v1582_v42, %v1584_v47 }
 0x1c5   : > { %v6946_v61 = vpack.i.bf16 %v1457_v49, %v1583_v51  ;;  %v6951_v4 = vpack.i.bf16 %v1459_v56, %v1585_v62  ;;  %v6981_v42 = vpack.i.bf16 %v2011_v9, %v2012_v46  ;;  %v8066_v49 = vld [vmem:[%s8061_s3 + $0x10] sm:$0xff] }
 0x1c7   : > { %6947 = vrot.lane.b32.xlu1 %v6946_v61, %s10118_s25  ;;  %v6124_v31 = vpop.f32.mrb[12].mxu0  ;;  %6942 = vrot.lane.b32.xlu0 %v6941_v29, %s10118_s25  ;;  %v1972_v29 = vrot.slane %v8031_v6, 1 }
 0x1c8   : > { %v1360_v43 = vadd.f32 %v6124_v31, %v7781_v27  ;;  %v1354_v0 = vpop.f32.mrb[13].mxu0 }
 0x1c9   : > { %v1355_v2 = vadd.f32 %v1354_v0, %v7781_v27  ;;  %v1973_v31 = vsel %vm876_vm1, %v1970_v3, %v1972_v29  ;;  %v8080_v0 = vld [vmem:[%s8061_s3 + $0x8] sm:$0xff]  ;;  %v8089_v3 = vld [vmem:[%s8061_s3] sm:$0xff] }
 0x1ca   : > { %vm1386_vm10 = vcmp.ge.f32.partialorder %v1360_v43, 0.0  ;;  %v1402_v54 = vmul.f32 0.01, %v1360_v43  ;;  %v2573_v8 = vrot.slane %v8080_v0, 1  ;;  %v2603_v9 = vrot.slane %v8080_v0, 3 }
 0x1cb   : > { %vm1385_vm11 = vcmp.ge.f32.partialorder %v1355_v2, 0.0  ;;  %v1401_v58 = vmul.f32 0.01, %v1355_v2  ;;  %6952 = vrot.lane.b32.xlu1 %v6951_v4, %s10118_s25  ;;  %v2605_v4 = vrot.slane %v8066_v49, 3 }
 0x1cc   : > { %v8028_v12 = vsel %vm1386_vm10, %v1360_v43, %v1402_v54  ;;  %v2050_v43 = vrot.slane %v8031_v6, 3 }
 0x1cd   : > { %v1462_v39 = vrot.slane %v8028_v12, 1  ;;  %v1588_v13 = vrot.slane %v8028_v12, 3  ;;  %v8035_v57 = vsel %vm1385_vm11, %v1355_v2, %v1401_v58  ;;  %v2575_v2 = vrot.slane %v8066_v49, 1 }
 0x1ce   : > { %v1460_v23 = vrot.slane %v8035_v57, 1  ;;  %v1586_v21 = vrot.slane %v8035_v57, 3 }
 0x1d0   : > { %v1463_v25 = vsel %vm876_vm1, %v1460_v23, %v1462_v39  ;;  %v1589_v26 = vsel %vm1036_vm2, %v1586_v21, %v1588_v13  ;;  %v1461_v30 = vsel %vm876_vm1, %v1458_v37, %v1460_v23  ;;  %v1587_v33 = vsel %vm1036_vm2, %v1584_v47, %v1586_v21 }
 0x1d1   : > { %v6966_v16 = vpack.i.bf16 %v1463_v25, %v1589_v26  ;;  %v6956_v34 = vpack.i.bf16 %v1461_v30, %v1587_v33  ;;  %v6976_v25 = vpack.i.bf16 %v1972_v29, %v1973_v31  ;;  %v2051_v26 = vsel %vm1036_vm2, %v2048_v11, %v2050_v43 }
 0x1d2   : > { %v2602_v30 = vrot.slane %v8089_v3, 3  ;;  %v2606_v33 = vsel %vm1036_vm2, %v2603_v9, %v2605_v4 }
 0x1d3   : > { %6967 = vrot.lane.b32.xlu0 %v6966_v16, %s10118_s25  ;;  %6957 = vrot.lane.b32.xlu1 %v6956_v34, %s10118_s25  ;;  %v6127_v1 = vpop.f32.mrb[14].mxu0  ;;  %v8101_v34 = vld [vmem:[%s8061_s3 + $0x18] sm:$0xff]  ;;  %s10133_s3 = sld [smem:[#allocation24_spill]] }
 0x1d4   : > { %v1370_v55 = vadd.f32 %v6127_v1, %v7781_v27  ;;  %v1364_v45 = vpop.f32.mrb[15].mxu0  ;;  %v6986_v1 = vpack.i.bf16 %v2050_v43, %v2051_v26  ;;  %v2604_v11 = vsel %vm1036_vm2, %v2602_v30, %v2603_v9  ;;  %v2607_v46 = vrot.slane %v8101_v34, 3  ;;  %v2647_v43 = vld [vmem:[%s10117_s1 + $0x90] sm:$0xff]  ;;  %v2632_v9 = vld [vmem:[%s10117_s1 + $0x18] sm:$0xff]  ;;  %v2650_v26 = vld [vmem:[%s10117_s1 + $0xa8] sm:$0xff] }
 0x1d5   : > { %v1365_v37 = vadd.f32 %v1364_v45, %v7781_v27  ;;  %v2577_v45 = vrot.slane %v8101_v34, 1  ;;  %v2633_v30 = vld [vmem:[%s10117_s1 + $0x20] sm:$0xff] }
 0x1d6   : > { %vm1388_vm12 = vcmp.ge.f32.partialorder %v1370_v55, 0.0  ;;  %v1404_v47 = vmul.f32 0.01, %v1370_v55 }
 0x1d7   : > { %vm1387_vm13 = vcmp.ge.f32.partialorder %v1365_v37, 0.0  ;;  %v1403_v48 = vmul.f32 0.01, %v1365_v37  ;;  %6962 = vrot.lane.b32.xlu1 %v6961_v24, %s10080_s29 }
 0x1d8   : > { %v8063_v32 = vsel %vm1388_vm12, %v1370_v55, %v1404_v47  ;;  %v7016_v47 = vpack.i.bf16 %v2577_v45, %v2607_v46 }
 0x1d9   : > { %v1466_v27 = vrot.slane %v8063_v32, 1  ;;  %v1592_v51 = vrot.slane %v8063_v32, 3  ;;  %v8070_v61 = vsel %vm1387_vm13, %v1365_v37, %v1403_v48  ;;  %v2578_v48 = vsel %vm876_vm1, %v2575_v2, %v2577_v45  ;;  %v2636_v45 = vld [vmem:[%s10117_s1 + $0x38] sm:$0xff] }
 0x1da   : > { %v1464_v56 = vrot.slane %v8070_v61, 1  ;;  %v1590_v62 = vrot.slane %v8070_v61, 3 }
 0x1db   : > { %6982 = vrot.lane.b32.xlu1 %v6981_v42, %s10118_s25  ;;  %v6996_v16 = vpack.i.bf16 %v1466_v27, %v1592_v51  ;;  %v2608_v42 = vsel %vm1036_vm2, %v2605_v4, %v2607_v46 }
 0x1dc   : > { %v1467_v54 = vsel %vm876_vm1, %v1464_v56, %v1466_v27  ;;  %v1593_v58 = vsel %vm1036_vm2, %v1590_v62, %v1592_v51  ;;  %v1465_v5 = vsel %vm876_vm1, %v1462_v39, %v1464_v56  ;;  %v1591_v23 = vsel %vm1036_vm2, %v1588_v13, %v1590_v62  ;;  %v2629_v56 = vld [vmem:[%s10117_s1] sm:$0xff]  ;;  %v2630_v62 = vld [vmem:[%s10117_s1 + $0x8] sm:$0xff] }
 0x1dd   : > { %v6991_v21 = vpack.i.bf16 %v1467_v54, %v1593_v58  ;;  %v6971_v22 = vpack.i.bf16 %v1465_v5, %v1591_v23  ;;  %v2572_v39 = vrot.slane %v8089_v3, 1  ;;  %v2576_v13 = vsel %vm876_vm1, %v2573_v8, %v2575_v2  ;;  %v2648_v2 = vld [vmem:[%s10117_s1 + $0x98] sm:$0xff] }
 0x1de   : > { %v7006_v24 = vpack.i.bf16 %v2576_v13, %v2606_v33  ;;  %v7011_v29 = vpack.i.bf16 %v2578_v48, %v2608_v42  ;;  %v1516_v27 = vrot.slane %v7795_v41, 2  ;;  %v1517_v51 = vrot.slane %v7791_v36, 2  ;;  %v2634_v13 = vld [vmem:[%s10117_s1 + $0x28] sm:$0xff]  ;;  %v2651_v33 = vld [vmem:[%s10117_s1 + $0xb0] sm:$0xff]  ;;  %v2653_v48 = vld [vmem:[%s10117_s1 + $0xc0] sm:$0xff] }
 0x1df   : > { %6992 = vrot.lane.b32.xlu1 %v6991_v21, %s10118_s25  ;;  %6972 = vrot.lane.b32.xlu0 %v6971_v22, %s10118_s25  ;;  %v2574_v55 = vsel %vm876_vm1, %v2572_v39, %v2573_v8  ;;  %v6418_v5 = vpack.c.bf16 %v2630_v62, %v2629_v56  ;;  %v6420_v22 = vpack.c.bf16 %v2648_v2, %v2647_v43  ;;  %v2631_v8 = vld [vmem:[%s10117_s1 + $0x10] sm:$0xff]  ;;  %v2654_v42 = vld [vmem:[%s10117_s1 + $0xc8] sm:$0xff] }
 0x1e0   : > { %v7001_v37 = vpack.i.bf16 %v2574_v55, %v2604_v11  ;;  %v1518_v58 = vsel %vm956_vm0, %v1516_v27, %v1517_v51  ;;  %v2635_v11 = vld [vmem:[%s10117_s1 + $0x30] sm:$0xff] }
 0x1e3   : > { %6997 = vrot.lane.b32.xlu1 %v6996_v16, %s10118_s25  ;;  %6977 = vrot.lane.b32.xlu0 %v6976_v25, %s10119_s5  ;;  %v2649_v25 = vld [vmem:[%s10117_s1 + $0xa0] sm:$0xff]  ;;  %v2652_v16 = vld [vmem:[%s10117_s1 + $0xb8] sm:$0xff] }
 0x1e4   : > { %v6424_v39 = vpack.c.bf16 %v2650_v26, %v2649_v25  ;;  %v6428_v55 = vpack.c.bf16 %v2652_v16, %v2651_v33  ;;  %v2640_v25 = vld [vmem:[%s10117_s1 + $0x58] sm:$0xff]  ;;  %v2641_v16 = vld [vmem:[%s10117_s1 + $0x60] sm:$0xff] }
 0x1e7   : > { %6987 = vrot.lane.b32.xlu0 %v6986_v1, %s10080_s29  ;;  %7007 = vrot.lane.b32.xlu1 %v7006_v24, %s10118_s25  ;;  %v1519_v1 = vrot.slane %v7827_v63, 2  ;;  %v6426_v24 = vpack.c.bf16 %v2634_v13, %v2633_v30  ;;  %v1523_v30 = vrot.slane %v7881_v38, 2  ;;  %s10087_s29 = sshll.u32 %s7393_s28, 4  ;;  %s10129_s28 = smov 96  }
 0x1e8   : > { %s836_s7 = scalar_lea.vmem %s10122_s0, %s10087_s29  ;;  %s10123_s29 = sld [smem:[#allocation23_spill]] }
 0x1e9   : > { %v1520_v62 = vsel %vm956_vm0, %v1517_v51, %v1519_v1  ;;  %s10127_s0 = smov 16  }
 0x1eb   : > { %7002 = vrot.lane.b32.xlu0 %v7001_v37, %s10118_s25  ;;  %7017 = vrot.lane.b32.xlu1 %v7016_v47, %s10118_s25  ;;  %v1521_v47 = vrot.slane %v7816_v60, 2 }
 0x1ed   : > { %v1522_v51 = vsel %vm956_vm0, %v1519_v1, %v1521_v47 }
 0x1ef   : > { %7012 = vrot.lane.b32.xlu0 %v7011_v29, %s10118_s25 }
 0x1fd   : > { %v6863_v31 = vpop.permute.xlu0 %6862 }
 0x1fe   : > { %v6865_v4 = vunpack.i.h.bf16 %v6863_v31  ;;  %v6864_v54 = vunpack.i.l.bf16 %v6863_v31  ;;  %v6430_v31 = vpack.c.bf16 %v2636_v45, %v2635_v11  ;;  %v2659_v11 = vld [vmem:[%s10117_s1 + $0xf0] sm:$0xff]  ;;  %v2660_v45 = vld [vmem:[%s10117_s1 + $0xf8] sm:$0xff] }
 0x200   : > { %v1658_v23 = vsel %vm1179_vm6, %v1518_v58, %v6864_v54  ;;  %v1642_v21 = vsel %vm1179_vm6, %v7795_v41, %v6865_v4  ;;  %v6422_v41 = vpack.c.bf16 %v2632_v9, %v2631_v8  ;;  %v6432_v4 = vpack.c.bf16 %v2654_v42, %v2653_v48  ;;  %v2637_v54 = vld [vmem:[%s10117_s1 + $0x40] sm:$0xff]  ;;  %v2638_v58 = vld [vmem:[%s10117_s1 + $0x48] sm:$0xff]  ;;  %v2639_v9 = vld [vmem:[%s10117_s1 + $0x50] sm:$0xff] }
 0x201   : > { %1774 = vmatprep.mubr.f32.mxu1 %v1658_v23  ;;  %v2655_v23 = vld [vmem:[%s10117_s1 + $0xd0] sm:$0xff]  ;;  %v6438_v13 = vpack.c.bf16 %v2640_v25, %v2639_v9  ;;  %v1524_v42 = vsel %vm956_vm0, %v1521_v47, %v1523_v30 }
 0x202   : > { %1775 = vmatmul.mubr.f32.vlgmr.msra.gmra.mrb[0].mxu1 %v1642_v21 }
 0x203   : > { %6419 = vmatpush3.bf16.msra.mxu1 %v6418_v5 }
 0x204   : > { %6421 = vmatprep.subr.bf16.mxu1 %v6420_v22  ;;  %v6434_v22 = vpack.c.bf16 %v2638_v58, %v2637_v54 }
 0x207   : > { %6423 = vmatpush3.bf16.msra.mxu1 %v6422_v41  ;;  %v2657_v41 = vld [vmem:[%s10117_s1 + $0xe0] sm:$0xff] }
 0x208   : > { %6425 = vmatprep.subr.bf16.mxu1 %v6424_v39  ;;  %v2658_v39 = vld [vmem:[%s10117_s1 + $0xe8] sm:$0xff] }
 0x209   : > { %v6868_v46 = vpop.permute.xlu1 %6867  ;;  %v6873_v37 = vpop.permute.xlu0 %6872  ;;  %v6440_v33 = vpack.c.bf16 %v2658_v39, %v2657_v41 }
 0x20a   : > { %v6870_v29 = vunpack.i.h.bf16 %v6868_v46  ;;  %v6869_v27 = vunpack.i.l.bf16 %v6868_v46  ;;  %v6874_v56 = vunpack.i.l.bf16 %v6873_v37  ;;  %v6875_v5 = vunpack.i.h.bf16 %v6873_v37 }
 0x20b   : > { %6427 = vmatpush3.bf16.msra.mxu1 %v6426_v24 }
 0x20c   : > { %v1659_v43 = vsel %vm1179_vm6, %v1520_v62, %v6869_v27  ;;  %v1643_v2 = vsel %vm1179_vm6, %v7791_v36, %v6870_v29  ;;  %6429 = vmatprep.subr.bf16.mxu1 %v6428_v55  ;;  %v2656_v36 = vld [vmem:[%s10117_s1 + $0xd8] sm:$0xff]  ;;  %v1660_v21 = vsel %vm1179_vm6, %v1522_v51, %v6874_v56  ;;  %v1644_v26 = vsel %vm1179_vm6, %v7827_v63, %v6875_v5  ;;  %v2642_v63 = vld [vmem:[%s10117_s1 + $0x68] sm:$0xff] }
 0x20d   : > { %1779 = vmatprep.mubr.f32.mxu1 %v1659_v43  ;;  %v6436_v8 = vpack.c.bf16 %v2656_v36, %v2655_v23  ;;  %v1525_v55 = vrot.slane %v7871_v28, 2  ;;  %v6442_v29 = vpack.c.bf16 %v2642_v63, %v2641_v16  ;;  %v6444_v62 = vpack.c.bf16 %v2660_v45, %v2659_v11  ;;  %v2644_v43 = vld [vmem:[%s10117_s1 + $0x78] sm:$0xff] }
 0x20e   : > { %1780 = vmatmul.mubr.f32.gmra.mrb[2].mxu1 %v1643_v2  ;;  %v1527_v36 = vrot.slane %v7928_v20, 2 }
 0x20f   : > { %1784 = vmatprep.mubr.f32.mxu1 %v1660_v21  ;;  %6431 = vmatpush3.bf16.msra.mxu1 %v6430_v31  ;;  %v2643_v31 = vld [vmem:[%s10117_s1 + $0x70] sm:$0xff]  ;;  %v1526_v47 = vsel %vm956_vm0, %v1523_v30, %v1525_v55 }
 0x210   : > { %6433 = vmatprep.subr.bf16.mxu1 %v6432_v4  ;;  %v6446_v58 = vpack.c.bf16 %v2644_v43, %v2643_v31 }
 0x212   : > { %1785 = vmatmul.mubr.f32.gmra.mrb[4].mxu1 %v1644_v26  ;;  %v1529_v26 = vrot.slane %v7924_v17, 2 }
 0x213   : > { %6435 = vmatpush3.bf16.msra.mxu1 %v6434_v22 }
 0x214   : > { %6437 = vmatprep.subr.bf16.mxu1 %v6436_v8 }
 0x215   : > { %v6878_v1 = vpop.permute.xlu1 %6877  ;;  %v6883_v24 = vpop.permute.xlu0 %6882 }
 0x216   : > { %v6880_v46 = vunpack.i.h.bf16 %v6878_v1  ;;  %v6879_v37 = vunpack.i.l.bf16 %v6878_v1  ;;  %v6884_v48 = vunpack.i.l.bf16 %v6883_v24  ;;  %v6885_v2 = vunpack.i.h.bf16 %v6883_v24 }
 0x217   : > { %6439 = vmatpush3.bf16.msra.mxu1 %v6438_v13  ;;  %v1528_v13 = vsel %vm956_vm0, %v1525_v55, %v1527_v36  ;;  %v1530_v1 = vsel %vm956_vm0, %v1527_v36, %v1529_v26 }
 0x218   : > { %v1661_v27 = vsel %vm1179_vm6, %v1524_v42, %v6879_v37  ;;  %v1645_v56 = vsel %vm1179_vm6, %v7816_v60, %v6880_v46  ;;  %6441 = vmatprep.subr.bf16.mxu1 %v6440_v33  ;;  %v1662_v4 = vsel %vm1179_vm6, %v1526_v47, %v6884_v48  ;;  %v1646_v51 = vsel %vm1179_vm6, %v7881_v38, %v6885_v2 }
 0x219   : > { %1789 = vmatprep.mubr.f32.mxu1 %v1661_v27  ;;  %v6893_v54 = vpop.permute.xlu1 %6892  ;;  %v6888_v60 = vpop.permute.xlu0 %6887  ;;  %v1531_v48 = vrot.slane %v7968_v59, 2  ;;  %v1533_v42 = vrot.slane %v7955_v50, 2 }
 0x21a   : > { %1790 = vmatmul.mubr.f32.gmra.mrb[6].mxu1 %v1645_v56  ;;  %v6890_v5 = vunpack.i.h.bf16 %v6888_v60  ;;  %v6889_v23 = vunpack.i.l.bf16 %v6888_v60  ;;  %v6895_v21 = vunpack.i.h.bf16 %v6893_v54  ;;  %v6894_v22 = vunpack.i.l.bf16 %v6893_v54 }
 0x21b   : > { %1794 = vmatprep.mubr.f32.mxu1 %v1662_v4  ;;  %6443 = vmatpush3.bf16.msra.mxu1 %v6442_v29  ;;  %v1532_v43 = vsel %vm956_vm0, %v1529_v26, %v1531_v48 }
 0x21c   : > { %6445 = vmatprep.subr.bf16.mxu1 %v6444_v62  ;;  %v2077_v8 = vsel %vm1133_vm4, %v7850_v15, %v6890_v5  ;;  %v2076_v38 = vsel %vm1133_vm4, %v7847_v14, %v6889_v23 }
 0x21d   : > { %v2084_v24 = vsel %vm1179_vm6, %v2076_v38, %v6894_v22  ;;  %v2085_v11 = vsel %vm1179_vm6, %v2077_v8, %v6895_v21 }
 0x21e   : > { %1795 = vmatmul.mubr.f32.gmra.mrb[8].mxu1 %v1646_v51 }
 0x21f   : > { %6447 = vmatpush3.bf16.msra.mxu1 %v6446_v58 }
 0x221   : > { %v6898_v9 = vpop.permute.xlu1 %6897  ;;  %v6903_v25 = vpop.permute.xlu0 %6902 }
 0x222   : > { %v6900_v41 = vunpack.i.h.bf16 %v6898_v9  ;;  %v6899_v39 = vunpack.i.l.bf16 %v6898_v9  ;;  %v6904_v30 = vunpack.i.l.bf16 %v6903_v25  ;;  %v6905_v63 = vunpack.i.h.bf16 %v6903_v25 }
 0x224   : > { %v1663_v33 = vsel %vm1179_vm6, %v1528_v13, %v6899_v39  ;;  %v1647_v16 = vsel %vm1179_vm6, %v7871_v28, %v6900_v41  ;;  %v1664_v14 = vsel %vm1179_vm6, %v1530_v1, %v6904_v30  ;;  %v1648_v37 = vsel %vm1179_vm6, %v7928_v20, %v6905_v63 }
 0x225   : > { %v6908_v15 = vpop.permute.xlu0 %6907  ;;  %1799 = vmatprep.mubr.f32.mxu1 %v1663_v33  ;;  %v1534_v20 = vsel %vm956_vm0, %v1531_v48, %v1533_v42  ;;  %v1535_v30 = vrot.slane %v8009_v10, 2 }
 0x226   : > { %v6910_v45 = vunpack.i.h.bf16 %v6908_v15  ;;  %v6909_v46 = vunpack.i.l.bf16 %v6908_v15  ;;  %1800 = vmatmul.mubr.f32.gmra.mrb[10].mxu1 %v1647_v16  ;;  %v1537_v16 = vrot.slane %v8003_v40, 2 }
 0x227   : > { %1804 = vmatprep.mubr.f32.mxu1 %v1664_v14 }
 0x228   : > { %v2093_v55 = vsel %vm2092_vm14, %v2084_v24, %v6909_v46  ;;  %v2094_v28 = vsel %vm2092_vm14, %v2085_v11, %v6910_v45  ;;  %v1538_v46 = vsel %vm956_vm0, %v1535_v30, %v1537_v16 }
 0x229   : > { %6160 = vmatprep.mubr.f32.mxu0 %v2093_v55 }
 0x22a   : > { %1805 = vmatmul.mubr.f32.gmra.mrb[12].mxu1 %v1648_v37  ;;  %6161 = vmatmul.mubr.f32.vlgmr.msra.gmra.mrb[16].mxu0 %v2094_v28  ;;  %v1539_v28 = vrot.slane %v8035_v57, 2 }
 0x22d   : > { %v6913_v29 = vpop.permute.xlu1 %6912  ;;  %v6918_v27 = vpop.permute.xlu0 %6917 }
 0x22e   : > { %v6915_v56 = vunpack.i.h.bf16 %v6913_v29  ;;  %v6914_v62 = vunpack.i.l.bf16 %v6913_v29  ;;  %v6919_v31 = vunpack.i.l.bf16 %v6918_v27  ;;  %v6920_v4 = vunpack.i.h.bf16 %v6918_v27 }
 0x22f   : > { %v1541_v29 = vrot.slane %v8028_v12, 2 }
 0x230   : > { %v1665_v2 = vsel %vm1179_vm6, %v1532_v43, %v6914_v62  ;;  %v1649_v47 = vsel %vm1179_vm6, %v7924_v17, %v6915_v56  ;;  %v1666_v58 = vsel %vm1179_vm6, %v1534_v20, %v6919_v31  ;;  %v1650_v9 = vsel %vm1179_vm6, %v7968_v59, %v6920_v4 }
 0x231   : > { %v6928_v54 = vpop.permute.xlu1 %6927  ;;  %v6923_v60 = vpop.permute.xlu0 %6922  ;;  %1809 = vmatprep.mubr.f32.mxu1 %v1665_v2  ;;  %v1536_v59 = vsel %vm956_vm0, %v1533_v42, %v1535_v30  ;;  %v1540_v2 = vsel %vm956_vm0, %v1537_v16, %v1539_v28 }
 0x232   : > { %v6930_v5 = vunpack.i.h.bf16 %v6928_v54  ;;  %v6929_v51 = vunpack.i.l.bf16 %v6928_v54  ;;  %v6925_v23 = vunpack.i.h.bf16 %v6923_v60  ;;  %v6924_v36 = vunpack.i.l.bf16 %v6923_v60  ;;  %1810 = vmatmul.mubr.f32.gmra.mrb[14].mxu1 %v1649_v47 }
 0x233   : > { %1814 = vmatprep.mubr.f32.mxu1 %v1666_v58  ;;  %v1542_v58 = vsel %vm956_vm0, %v1539_v28, %v1541_v29 }
 0x234   : > { %v2078_v21 = vsel %vm1133_vm4, %v7855_v18, %v6924_v36  ;;  %v2079_v17 = vsel %vm1133_vm4, %v7941_v35, %v6925_v23 }
 0x235   : > { %v6938_v22 = vpop.permute.xlu1 %6937  ;;  %v6933_v8 = vpop.permute.xlu0 %6932  ;;  %v2086_v25 = vsel %vm1179_vm6, %v2078_v21, %v6929_v51  ;;  %v2087_v26 = vsel %vm1179_vm6, %v2079_v17, %v6930_v5 }
 0x236   : > { %v6935_v41 = vunpack.i.h.bf16 %v6933_v8  ;;  %v6934_v39 = vunpack.i.l.bf16 %v6933_v8  ;;  %1815 = vmatmul.mubr.f32.gmra.mrb[16].mxu1 %v1650_v9  ;;  %v6940_v37 = vunpack.i.h.bf16 %v6938_v22  ;;  %v6939_v48 = vunpack.i.l.bf16 %v6938_v22 }
 0x237   : > { %v1543_v22 = vrot.slane %v8070_v61, 2 }
 0x238   : > { %v2095_v38 = vsel %vm2092_vm14, %v2086_v25, %v6934_v39  ;;  %v2096_v18 = vsel %vm2092_vm14, %v2087_v26, %v6935_v41  ;;  %v2080_v20 = vsel %vm1133_vm4, %v7944_v44, %v6939_v48  ;;  %v2081_v4 = vsel %vm1133_vm4, %v7961_v52, %v6940_v37 }
 0x239   : > { %v6948_v13 = vpop.permute.xlu1 %6947  ;;  %6163 = vmatprep.mubr.f32.mxu0 %v2095_v38  ;;  %v6943_v45 = vpop.permute.xlu0 %6942  ;;  %v1545_v25 = vrot.slane %v8063_v32, 2  ;;  %v1544_v30 = vsel %vm956_vm0, %v1541_v29, %v1543_v22 }
 0x23a   : > { %v6950_v35 = vunpack.i.h.bf16 %v6948_v13  ;;  %v6949_v33 = vunpack.i.l.bf16 %v6948_v13  ;;  %6164 = vmatmul.mubr.f32.gmra.mrb[18].mxu0 %v2096_v18  ;;  %v6945_v31 = vunpack.i.h.bf16 %v6943_v45  ;;  %v6944_v43 = vunpack.i.l.bf16 %v6943_v45 }
 0x23b   : > { %v2594_v45 = vrot.slane %v8066_v49, 2 }
 0x23c   : > { %v1667_v63 = vsel %vm1179_vm6, %v1536_v59, %v6949_v33  ;;  %v1651_v15 = vsel %vm1179_vm6, %v7955_v50, %v6950_v35  ;;  %v2088_v36 = vsel %vm1179_vm6, %v2080_v20, %v6944_v43  ;;  %v1546_v33 = vsel %vm956_vm0, %v1543_v22, %v1545_v25 }
 0x23d   : > { %v6953_v1 = vpop.permute.xlu1 %6952  ;;  %1819 = vmatprep.mubr.f32.mxu1 %v1667_v63 }
 0x23e   : > { %v6955_v24 = vunpack.i.h.bf16 %v6953_v1  ;;  %v6954_v11 = vunpack.i.l.bf16 %v6953_v1  ;;  %1820 = vmatmul.mubr.f32.gmra.mrb[18].mxu1 %v1651_v15  ;;  %v2591_v1 = vrot.slane %v8089_v3, 2 }
 0x240   : > { %v1668_v14 = vsel %vm1179_vm6, %v1538_v46, %v6954_v11  ;;  %v1652_v55 = vsel %vm1179_vm6, %v8009_v10, %v6955_v24  ;;  %v2592_v11 = vrot.slane %v8080_v0, 2 }
 0x241   : > { %1824 = vmatprep.mubr.f32.mxu1 %v1668_v14 }
 0x242   : > { %1825 = vmatmul.mubr.f32.gmra.mrb[20].mxu1 %v1652_v55  ;;  %v2593_v43 = vsel %vm956_vm0, %v2591_v1, %v2592_v11 }
 0x245   : > { %v6958_v50 = vpop.permute.xlu1 %6957  ;;  %v6968_v42 = vpop.permute.xlu0 %6967 }
 0x246   : > { %v6960_v27 = vunpack.i.h.bf16 %v6958_v50  ;;  %v6959_v56 = vunpack.i.l.bf16 %v6958_v50  ;;  %v6969_v62 = vunpack.i.l.bf16 %v6968_v42  ;;  %v6970_v54 = vunpack.i.h.bf16 %v6968_v42 }
 0x248   : > { %v1669_v47 = vsel %vm1179_vm6, %v1540_v2, %v6959_v56  ;;  %v1653_v10 = vsel %vm1179_vm6, %v8003_v40, %v6960_v27  ;;  %v1670_v23 = vsel %vm1179_vm6, %v1542_v58, %v6969_v62  ;;  %v2089_v40 = vsel %vm1179_vm6, %v2081_v4, %v6945_v31 }
 0x249   : > { %v6963_v60 = vpop.permute.xlu1 %6962  ;;  %1829 = vmatprep.mubr.f32.mxu1 %v1669_v47  ;;  %v1654_v17 = vsel %vm1179_vm6, %v8035_v57, %v6970_v54  ;;  %v2595_v2 = vsel %vm956_vm0, %v2592_v11, %v2594_v45  ;;  %v2596_v47 = vrot.slane %v8101_v34, 2  ;;  %v843_v11 = vld [vmem:[%s10045_s12] sm:$0x1f] }
 0x24a   : > { %v6965_v5 = vunpack.i.h.bf16 %v6963_v60  ;;  %v6964_v51 = vunpack.i.l.bf16 %v6963_v60  ;;  %1830 = vmatmul.mubr.f32.gmra.mrb[22].mxu1 %v1653_v10 }
 0x24b   : > { %1834 = vmatprep.mubr.f32.mxu1 %v1670_v23 }
 0x24c   : > { %v2097_v44 = vsel %vm2092_vm14, %v2088_v36, %v6964_v51  ;;  %v2098_v21 = vsel %vm2092_vm14, %v2089_v40, %v6965_v5  ;;  %v2597_v51 = vsel %vm956_vm0, %v2594_v45, %v2596_v47 }
 0x24d   : > { %v6983_v52 = vpop.permute.xlu1 %6982  ;;  %6166 = vmatprep.mubr.f32.mxu0 %v2097_v44 }
 0x24e   : > { %1835 = vmatmul.mubr.f32.gmra.mrb[24].mxu1 %v1654_v17  ;;  %6167 = vmatmul.mubr.f32.gmra.mrb[20].mxu0 %v2098_v21  ;;  %v6985_v46 = vunpack.i.h.bf16 %v6983_v52  ;;  %v6984_v14 = vunpack.i.l.bf16 %v6983_v52 }
 0x251   : > { %v6993_v8 = vpop.permute.xlu1 %6992  ;;  %v6973_v9 = vpop.permute.xlu0 %6972 }
 0x252   : > { %v6994_v26 = vunpack.i.l.bf16 %v6993_v8  ;;  %v6975_v41 = vunpack.i.h.bf16 %v6973_v9  ;;  %v6974_v39 = vunpack.i.l.bf16 %v6973_v9  ;;  %v6995_v13 = vunpack.i.h.bf16 %v6993_v8  ;;  %v5325_v8 = vld [vmem:[%s10044_s11 + $0x188] sm:$0xff] }
 0x254   : > { %v1671_v38 = vsel %vm1179_vm6, %v1544_v30, %v6974_v39  ;;  %v1655_v18 = vsel %vm1179_vm6, %v8028_v12, %v6975_v41  ;;  %v1672_v15 = vsel %vm1179_vm6, %v1546_v33, %v6994_v26  ;;  %v1656_v37 = vsel %vm1179_vm6, %v8070_v61, %v6995_v13  ;;  %v5327_v26 = vld [vmem:[%s10044_s11 + $0x198] sm:$0xff]  ;;  %v5310_v30 = vld [vmem:[%s10044_s11 + $0x110] sm:$0xff]  ;;  %v5329_v13 = vld [vmem:[%s10044_s11 + $0x1a8] sm:$0xff] }
 0x255   : > { %v6998_v57 = vpop.permute.xlu1 %6997  ;;  %v6978_v35 = vpop.permute.xlu0 %6977  ;;  %1839 = vmatprep.mubr.f32.mxu1 %v1671_v38  ;;  %v5311_v38 = vld [vmem:[%s10044_s11 + $0x118] sm:$0xff]  ;;  %v5312_v33 = vld [vmem:[%s10044_s11 + $0x120] sm:$0xff] }
 0x256   : > { %v6999_v59 = vunpack.i.l.bf16 %v6998_v57  ;;  %v6980_v16 = vunpack.i.h.bf16 %v6978_v35  ;;  %v6979_v63 = vunpack.i.l.bf16 %v6978_v35  ;;  %1840 = vmatmul.mubr.f32.gmra.mrb[26].mxu1 %v1655_v18  ;;  %v7000_v55 = vunpack.i.h.bf16 %v6998_v57  ;;  %v5328_v18 = vld [vmem:[%s10044_s11 + $0x1a0] sm:$0xff] }
 0x257   : > { %1844 = vmatprep.mubr.f32.mxu1 %v1672_v15  ;;  %v6390_v57 = vpack.c.bf16 %v5311_v38, %v5310_v30  ;;  %v6392_v35 = vpack.c.bf16 %v5329_v13, %v5328_v18  ;;  %v5331_v15 = vld [vmem:[%s10044_s11 + $0x1b8] sm:$0xff] }
 0x258   : > { %v2082_v24 = vsel %vm1133_vm4, %v7964_v53, %v6979_v63  ;;  %v2083_v12 = vsel %vm1133_vm4, %v8031_v6, %v6980_v16  ;;  %v1673_v53 = vsel %vm1179_vm6, %v1545_v25, %v6999_v59  ;;  %v1657_v61 = vsel %vm1179_vm6, %v8063_v32, %v7000_v55  ;;  %v5309_v25 = vld [vmem:[%s10044_s11 + $0x108] sm:$0xff]  ;;  %v5330_v63 = vld [vmem:[%s10044_s11 + $0x1b0] sm:$0xff]  ;;  %v5332_v55 = vld [vmem:[%s10044_s11 + $0x1c0] sm:$0xff] }
 0x259   : > { %v6988_v28 = vpop.permute.xlu0 %6987  ;;  %v7008_v48 = vpop.permute.xlu1 %7007  ;;  %v2090_v6 = vsel %vm1179_vm6, %v2082_v24, %v6984_v14  ;;  %v2091_v29 = vsel %vm1179_vm6, %v2083_v12, %v6985_v46  ;;  %v5313_v59 = vld [vmem:[%s10044_s11 + $0x128] sm:$0xff]  ;;  %v6396_v45 = vpack.c.bf16 %v5331_v15, %v5330_v63  ;;  %v5314_v46 = vld [vmem:[%s10044_s11 + $0x130] sm:$0xff]  ;;  %v5315_v14 = vld [vmem:[%s10044_s11 + $0x138] sm:$0xff] }
 0x25a   : > { %v6990_v50 = vunpack.i.h.bf16 %v6988_v28  ;;  %v6989_v42 = vunpack.i.l.bf16 %v6988_v28  ;;  %1845 = vmatmul.mubr.f32.gmra.mrb[28].mxu1 %v1656_v37  ;;  %v7009_v62 = vunpack.i.l.bf16 %v7008_v48  ;;  %v7010_v4 = vunpack.i.h.bf16 %v7008_v48  ;;  %v5333_v28 = vld [vmem:[%s10044_s11 + $0x1c8] sm:$0xff] }
 0x25b   : > { %1849 = vmatprep.mubr.f32.mxu1 %v1673_v53  ;;  %v6394_v12 = vpack.c.bf16 %v5313_v59, %v5312_v33  ;;  %v8394_v37 = vrot.slane %v843_v11, %v7769_v7  ;;  %v6398_v48 = vpack.c.bf16 %v5315_v14, %v5314_v46  ;;  %v5317_v53 = vld [vmem:[%s10044_s11 + $0x148] sm:$0xff]  ;;  %v8436_v59 = vsub.s32 1, %v7760_v19  ;;  %v8442_v11 = vld [vmem:[%s10043_s10] sm:$0x1f] }
 0x25c   : > { %v2099_v27 = vsel %vm2092_vm14, %v2090_v6, %v6989_v42  ;;  %v2100_v56 = vsel %vm2092_vm14, %v2091_v29, %v6990_v50  ;;  %v2626_v58 = vsel %vm1179_vm6, %v2595_v2, %v7009_v62  ;;  %v2622_v40 = vsel %vm1179_vm6, %v8080_v0, %v7010_v4  ;;  %v5324_v0 = vld [vmem:[%s10044_s11 + $0x180] sm:$0xff]  ;;  %v5334_v6 = vld [vmem:[%s10044_s11 + $0x1d0] sm:$0xff]  ;;  %v5335_v29 = vld [vmem:[%s10044_s11 + $0x1d8] sm:$0xff] }
 0x25d   : > { %v7003_v31 = vpop.permute.xlu0 %7002  ;;  %6169 = vmatprep.mubr.f32.mxu0 %v2099_v27  ;;  %v7018_v5 = vpop.permute.xlu1 %7017  ;;  %v6384_v9 = vpack.c.bf16 %v5325_v8, %v5324_v0  ;;  %v6400_v50 = vpack.c.bf16 %v5333_v28, %v5332_v55  ;;  %v5316_v42 = vld [vmem:[%s10044_s11 + $0x140] sm:$0xff]  ;;  %v6404_v62 = vpack.c.bf16 %v5335_v29, %v5334_v6  ;;  %v5338_v55 = vld [vmem:[%s10044_s11 + $0x1f0] sm:$0xff]  ;;  %v5339_v28 = vld [vmem:[%s10044_s11 + $0x1f8] sm:$0xff] }
 0x25e   : > { %v7005_v10 = vunpack.i.h.bf16 %v7003_v31  ;;  %v7004_v20 = vunpack.i.l.bf16 %v7003_v31  ;;  %1850 = vmatmul.mubr.f32.gmra.mrb[30].mxu1 %v1657_v61  ;;  %6170 = vmatmul.mubr.f32.gmra.mrb[22].mxu0 %v2100_v56  ;;  %v7019_v44 = vunpack.i.l.bf16 %v7018_v5  ;;  %v7020_v52 = vunpack.i.h.bf16 %v7018_v5  ;;  %v5318_v31 = vld [vmem:[%s10044_s11 + $0x150] sm:$0xff]  ;;  %v5319_v61 = vld [vmem:[%s10044_s11 + $0x158] sm:$0xff]  ;;  %v5336_v2 = vld [vmem:[%s10044_s11 + $0x1e0] sm:$0xff] }
 0x25f   : > { %6385 = vmatprep.subr.bf16.mxu0 %v6384_v9  ;;  %v6402_v56 = vpack.c.bf16 %v5317_v53, %v5316_v42  ;;  %v6412_v53 = vpack.c.bf16 %v5339_v28, %v5338_v55  ;;  %v5322_v6 = vld [vmem:[%s10044_s11 + $0x170] sm:$0xff]  ;;  %v5323_v29 = vld [vmem:[%s10044_s11 + $0x178] sm:$0xff] }
 0x260   : > { %v2625_v54 = vsel %vm1179_vm6, %v2593_v43, %v7004_v20  ;;  %v2621_v60 = vsel %vm1179_vm6, %v8089_v3, %v7005_v10  ;;  %v2628_v17 = vsel %vm1179_vm6, %v2596_v47, %v7019_v44  ;;  %v2624_v22 = vsel %vm1179_vm6, %v8101_v34, %v7020_v52  ;;  %v5326_v34 = vld [vmem:[%s10044_s11 + $0x190] sm:$0xff]  ;;  %v5337_v47 = vld [vmem:[%s10044_s11 + $0x1e8] sm:$0xff] }
 0x261   : > { %2729 = vmatprep.mubr.f32.mxu1 %v2625_v54  ;;  %v7013_v32 = vpop.permute.xlu0 %7012  ;;  %v6388_v39 = vpack.c.bf16 %v5327_v26, %v5326_v34  ;;  %v6406_v54 = vpack.c.bf16 %v5319_v61, %v5318_v31  ;;  %v6414_v31 = vpack.c.bf16 %v5323_v29, %v5322_v6  ;;  %v5356_v29 = vld [vmem:[%s10044_s11 + $0x280] sm:$0xff] }
 0x262   : > { %2730 = vmatmul.mubr.f32.vlgmr.msra.gmra.mrb[32].mxu1 %v2621_v60  ;;  %v7014_v23 = vunpack.i.l.bf16 %v7013_v32  ;;  %v7015_v36 = vunpack.i.h.bf16 %v7013_v32  ;;  %v5320_v60 = vld [vmem:[%s10044_s11 + $0x160] sm:$0xff]  ;;  %v6408_v32 = vpack.c.bf16 %v5337_v47, %v5336_v2 }
 0x263   : > { %2734 = vmatprep.mubr.f32.mxu1 %v2626_v58  ;;  %v5321_v58 = vld [vmem:[%s10044_s11 + $0x168] sm:$0xff] }
 0x264   : > { %v2627_v21 = vsel %vm1179_vm6, %v2597_v51, %v7014_v23  ;;  %v2623_v3 = vsel %vm1179_vm6, %v8066_v49, %v7015_v36  ;;  %v5308_v49 = vld [vmem:[%s10044_s11 + $0x100] sm:$0xff]  ;;  %v6410_v36 = vpack.c.bf16 %v5321_v58, %v5320_v60 }
 0x265   : > { %v6386_v41 = vpack.c.bf16 %v5309_v25, %v5308_v49 }
 0x266   : > { %2735 = vmatmul.mubr.f32.gmra.mrb[34].mxu1 %v2622_v40 }
 0x267   : > { %2739 = vmatprep.mubr.f32.mxu1 %v2627_v21  ;;  %6387 = vmatpush3.bf16.msra.mxu0 %v6386_v41 }
 0x268   : > { %6389 = vmatprep.subr.bf16.mxu0 %v6388_v39 }
 0x26a   : > { %2740 = vmatmul.mubr.f32.gmra.mrb[36].mxu1 %v2623_v3 }
 0x26b   : > { %2744 = vmatprep.mubr.f32.mxu1 %v2628_v17  ;;  %6391 = vmatpush3.bf16.msra.mxu0 %v6390_v57 }
 0x26c   : > { %6393 = vmatprep.subr.bf16.mxu0 %v6392_v35 }
 0x26e   : > { %2745 = vmatmul.mubr.f32.gmra.mrb[38].mxu1 %v2624_v22 }
 0x26f   : > { %6395 = vmatpush3.bf16.msra.mxu0 %v6394_v12 }
 0x270   : > { %6397 = vmatprep.subr.bf16.mxu0 %v6396_v45  ;;  %v8446_v45 = vrot.slane %v8442_v11, %v8436_v59 }
 0x273   : > { %6399 = vmatpush3.bf16.msra.mxu0 %v6398_v48 }
 0x274   : > { %6401 = vmatprep.subr.bf16.mxu0 %v6400_v50 }
 0x277   : > { %6403 = vmatpush3.bf16.msra.mxu0 %v6402_v56 }
 0x278   : > { %6405 = vmatprep.subr.bf16.mxu0 %v6404_v62 }
 0x27b   : > { %6407 = vmatpush3.bf16.msra.mxu0 %v6406_v54 }
 0x27c   : > { %6409 = vmatprep.subr.bf16.mxu0 %v6408_v32 }
 0x27f   : > { %6411 = vmatpush3.bf16.msra.mxu0 %v6410_v36 }
 0x280   : > { %6413 = vmatprep.subr.bf16.mxu0 %v6412_v53 }
 0x283   : > { %6415 = vmatpush3.bf16.msra.mxu0 %v6414_v31 }
 0x2d5   : > { %v5523_v16 = vpop.f32.mrb[0].mxu1 }
 0x2d6   : > { %v5524_v1 = vpop.f32.mrb[1].mxu1 }
 0x2d7   : > { %v5525_v24 = vadd.f32 %v5524_v1, %v5523_v16 }
 0x2d9   : > { %v1777_v27 = vadd.f32 %v5525_v24, %v8394_v37 }
 0x2db   : > { %v1871_v20 = vmul.f32 0.01, %v1777_v27  ;;  %vm1855_vm15 = vcmp.ge.f32.partialorder %v1777_v27, 0.0 }
 0x2dd   : > { %v1887_v40 = vsel %vm1855_vm15, %v1777_v27, %v1871_v20 }
 0x2de   : > { %v1903_v17 = vsel %vm1179_vm6, %v1887_v40, 0.0 }
 0x2e1   : > { %v5526_v43 = vpop.f32.mrb[2].mxu1 }
 0x2e2   : > { %v5527_v10 = vpop.f32.mrb[3].mxu1 }
 0x2e3   : > { %v5528_v4 = vadd.f32 %v5527_v10, %v5526_v43 }
 0x2e5   : > { %v1782_v5 = vadd.f32 %v5528_v4, %v8394_v37  ;;  %v5529_v51 = vpop.f32.mrb[4].mxu1 }
 0x2e6   : > { %v5530_v23 = vpop.f32.mrb[5].mxu1 }
 0x2e7   : > { %vm1856_vm7 = vcmp.ge.f32.partialorder %v1782_v5, 0.0  ;;  %v1872_v44 = vmul.f32 0.01, %v1782_v5  ;;  %v5531_v21 = vadd.f32 %v5530_v23, %v5529_v51 }
 0x2e9   : > { %v1888_v52 = vsel %vm1856_vm7, %v1782_v5, %v1872_v44  ;;  %v1787_v3 = vadd.f32 %v5531_v21, %v8394_v37 }
 0x2ea   : > { %v1904_v22 = vsel %vm1179_vm6, %v1888_v52, 0.0 }
 0x2eb   : > { %v1905_v0 = vadd.f32 %v1904_v22, %v1903_v17  ;;  %vm1857_vm8 = vcmp.ge.f32.partialorder %v1787_v3, 0.0  ;;  %v1873_v8 = vmul.f32 0.01, %v1787_v3 }
 0x2ed   : > { %v1889_v49 = vsel %vm1857_vm8, %v1787_v3, %v1873_v8  ;;  %v5532_v9 = vpop.f32.mrb[6].mxu1 }
 0x2ee   : > { %v1906_v25 = vsel %vm1179_vm6, %v1889_v49, 0.0  ;;  %v5533_v34 = vpop.f32.mrb[7].mxu1 }
 0x2ef   : > { %v1907_v26 = vadd.f32 %v1906_v25, %v1905_v0  ;;  %v5534_v41 = vadd.f32 %v5533_v34, %v5532_v9 }
 0x2f1   : > { %v1792_v39 = vadd.f32 %v5534_v41, %v8394_v37  ;;  %v5535_v30 = vpop.f32.mrb[8].mxu1 }
 0x2f2   : > { %v5536_v38 = vpop.f32.mrb[9].mxu1 }
 0x2f3   : > { %vm1858_vm9 = vcmp.ge.f32.partialorder %v1792_v39, 0.0  ;;  %v1874_v18 = vmul.f32 0.01, %v1792_v39  ;;  %v5537_v13 = vadd.f32 %v5536_v38, %v5535_v30 }
 0x2f5   : > { %v1890_v57 = vsel %vm1858_vm9, %v1792_v39, %v1874_v18  ;;  %v1797_v35 = vadd.f32 %v5537_v13, %v8394_v37 }
 0x2f6   : > { %v1908_v33 = vsel %vm1179_vm6, %v1890_v57, 0.0 }
 0x2f7   : > { %v1909_v16 = vadd.f32 %v1908_v33, %v1907_v26  ;;  %vm1859_vm10 = vcmp.ge.f32.partialorder %v1797_v35, 0.0  ;;  %v1875_v63 = vmul.f32 0.01, %v1797_v35 }
 0x2f9   : > { %v1891_v15 = vsel %vm1859_vm10, %v1797_v35, %v1875_v63  ;;  %v5538_v1 = vpop.f32.mrb[10].mxu1 }
 0x2fa   : > { %v1910_v24 = vsel %vm1179_vm6, %v1891_v15, 0.0  ;;  %v5539_v12 = vpop.f32.mrb[11].mxu1 }
 0x2fb   : > { %v1911_v46 = vadd.f32 %v1910_v24, %v1909_v16  ;;  %v5540_v14 = vadd.f32 %v5539_v12, %v5538_v1 }
 0x2fd   : > { %v1802_v48 = vadd.f32 %v5540_v14, %v8394_v37  ;;  %v5541_v50 = vpop.f32.mrb[12].mxu1  ;;  %v6162_v42 = vpop.f32.mrb[16].mxu0 }
 0x2fe   : > { %v2193_v27 = vadd.f32 %v6162_v42, %v8446_v45  ;;  %v5542_v56 = vpop.f32.mrb[13].mxu1  ;;  %v2187_v62 = vpop.f32.mrb[17].mxu0 }
 0x2ff   : > { %vm1860_vm11 = vcmp.ge.f32.partialorder %v1802_v48, 0.0  ;;  %v1876_v61 = vmul.f32 0.01, %v1802_v48  ;;  %v5543_v43 = vadd.f32 %v5542_v56, %v5541_v50  ;;  %v2188_v2 = vadd.f32 %v2187_v62, %v8446_v45 }
 0x300   : > { %vm2227_vm12 = vcmp.ge.f32.partialorder %v2193_v27, 0.0  ;;  %v2235_v47 = vmul.f32 0.01, %v2193_v27 }
 0x301   : > { %v1892_v10 = vsel %vm1860_vm11, %v1802_v48, %v1876_v61  ;;  %v1807_v20 = vadd.f32 %v5543_v43, %v8394_v37  ;;  %vm2226_vm13 = vcmp.ge.f32.partialorder %v2188_v2, 0.0  ;;  %v2234_v4 = vmul.f32 0.01, %v2188_v2 }
 0x302   : > { %v1912_v54 = vsel %vm1179_vm6, %v1892_v10, 0.0  ;;  %v8465_v60 = vsel %vm2227_vm12, %v2193_v27, %v2235_v47  ;;  %v5357_v27 = vld [vmem:[%s10044_s11 + $0x288] sm:$0xff] }
 0x303   : > { %v1913_v58 = vadd.f32 %v1912_v54, %v1911_v46  ;;  %v2259_v32 = vrot.slane %v8465_v60, 1  ;;  %v2321_v5 = vrot.slane %v8465_v60, 3  ;;  %vm1861_vm14 = vcmp.ge.f32.partialorder %v1807_v20, 0.0 }
 0x304   : > { %v1877_v51 = vmul.f32 0.01, %v1807_v20  ;;  %v8469_v23 = vsel %vm2226_vm13, %v2188_v2, %v2234_v4  ;;  %v6448_v62 = vpack.c.bf16 %v5357_v27, %v5356_v29 }
 0x305   : > { %v2258_v36 = vrot.slane %v8469_v23, 1  ;;  %v2320_v40 = vrot.slane %v8469_v23, 3  ;;  %v5544_v44 = vpop.f32.mrb[14].mxu1 }
 0x306   : > { %v1893_v21 = vsel %vm1861_vm14, %v1807_v20, %v1877_v51  ;;  %v5545_v52 = vpop.f32.mrb[15].mxu1  ;;  %6449 = vmatprep.subr.bf16.mxu0 %v6448_v62 }
 0x307   : > { %v1914_v3 = vsel %vm1179_vm6, %v1893_v21, 0.0  ;;  %v5546_v17 = vadd.f32 %v5545_v52, %v5544_v44  ;;  %v2260_v22 = vsel %vm876_vm1, %v2258_v36, %v2259_v32  ;;  %v2322_v0 = vsel %vm1036_vm2, %v2320_v40, %v2321_v5 }
 0x308   : > { %v1915_v8 = vadd.f32 %v1914_v3, %v1913_v58  ;;  %v7021_v49 = vpack.i.bf16 %v2260_v22, %v2322_v0 }
 0x309   : > { %v1812_v9 = vadd.f32 %v5546_v17, %v8394_v37  ;;  %v5547_v25 = vpop.f32.mrb[16].mxu1 }
 0x30a   : > { %7022 = vrot.lane.b32.xlu0 %v7021_v49, %s10118_s25  ;;  %v5548_v34 = vpop.f32.mrb[17].mxu1 }
 0x30b   : > { %vm1862_vm15 = vcmp.ge.f32.partialorder %v1812_v9, 0.0  ;;  %v1878_v26 = vmul.f32 0.01, %v1812_v9  ;;  %v5549_v41 = vadd.f32 %v5548_v34, %v5547_v25 }
 0x30d   : > { %v1894_v39 = vsel %vm1862_vm15, %v1812_v9, %v1878_v26  ;;  %v1817_v30 = vadd.f32 %v5549_v41, %v8394_v37  ;;  %v6165_v38 = vpop.f32.mrb[18].mxu0 }
 0x30e   : > { %v1916_v18 = vsel %vm1179_vm6, %v1894_v39, 0.0  ;;  %v2203_v13 = vadd.f32 %v6165_v38, %v8446_v45  ;;  %v2197_v57 = vpop.f32.mrb[19].mxu0 }
 0x30f   : > { %v1917_v35 = vadd.f32 %v1916_v18, %v1915_v8  ;;  %vm1863_vm7 = vcmp.ge.f32.partialorder %v1817_v30, 0.0  ;;  %v1879_v33 = vmul.f32 0.01, %v1817_v30  ;;  %v2198_v16 = vadd.f32 %v2197_v57, %v8446_v45 }
 0x310   : > { %vm2229_vm8 = vcmp.ge.f32.partialorder %v2203_v13, 0.0  ;;  %v2237_v63 = vmul.f32 0.01, %v2203_v13 }
 0x311   : > { %v1895_v15 = vsel %vm1863_vm7, %v1817_v30, %v1879_v33  ;;  %vm2228_vm9 = vcmp.ge.f32.partialorder %v2198_v16, 0.0  ;;  %v2236_v1 = vmul.f32 0.01, %v2198_v16  ;;  %v5550_v24 = vpop.f32.mrb[18].mxu1 }
 0x312   : > { %v1918_v12 = vsel %vm1179_vm6, %v1895_v15, 0.0  ;;  %v8483_v46 = vsel %vm2229_vm8, %v2203_v13, %v2237_v63  ;;  %v5551_v14 = vpop.f32.mrb[19].mxu1 }
 0x313   : > { %v1919_v55 = vadd.f32 %v1918_v12, %v1917_v35  ;;  %v2263_v28 = vrot.slane %v8483_v46, 1  ;;  %v2325_v48 = vrot.slane %v8483_v46, 3  ;;  %v8487_v50 = vsel %vm2228_vm9, %v2198_v16, %v2236_v1 }
 0x314   : > { %v2261_v42 = vrot.slane %v8487_v50, 1  ;;  %v2323_v53 = vrot.slane %v8487_v50, 3  ;;  %v5552_v6 = vadd.f32 %v5551_v14, %v5550_v24 }
 0x315   : > { %v5553_v56 = vpop.f32.mrb[20].mxu1 }
 0x316   : > { %v1822_v31 = vadd.f32 %v5552_v6, %v8394_v37  ;;  %v5554_v61 = vpop.f32.mrb[21].mxu1  ;;  %v2262_v43 = vsel %vm876_vm1, %v2259_v32, %v2261_v42  ;;  %v2324_v2 = vsel %vm1036_vm2, %v2321_v5, %v2323_v53  ;;  %v2264_v47 = vsel %vm876_vm1, %v2261_v42, %v2263_v28 }
 0x317   : > { %v5555_v10 = vadd.f32 %v5554_v61, %v5553_v56  ;;  %v7026_v20 = vpack.i.bf16 %v2262_v43, %v2324_v2  ;;  %v2326_v4 = vsel %vm1036_vm2, %v2323_v53, %v2325_v48 }
 0x318   : > { %vm1864_vm10 = vcmp.ge.f32.partialorder %v1822_v31, 0.0  ;;  %v1880_v54 = vmul.f32 0.01, %v1822_v31  ;;  %v7031_v58 = vpack.i.bf16 %v2264_v47, %v2326_v4 }
 0x319   : > { %v1827_v51 = vadd.f32 %v5555_v10, %v8394_v37  ;;  %7027 = vrot.lane.b32.xlu1 %v7026_v20, %s10118_s25 }
 0x31a   : > { %v1896_v32 = vsel %vm1864_vm10, %v1822_v31, %v1880_v54  ;;  %7032 = vrot.lane.b32.xlu0 %v7031_v58, %s10118_s25 }
 0x31b   : > { %v1920_v5 = vsel %vm1179_vm6, %v1896_v32, 0.0  ;;  %vm1865_vm11 = vcmp.ge.f32.partialorder %v1827_v51, 0.0  ;;  %v1881_v36 = vmul.f32 0.01, %v1827_v51 }
 0x31c   : > { %v1921_v40 = vadd.f32 %v1920_v5, %v1919_v55 }
 0x31d   : > { %v1897_v44 = vsel %vm1865_vm11, %v1827_v51, %v1881_v36  ;;  %v5556_v21 = vpop.f32.mrb[22].mxu1  ;;  %v8542_v51 = vsub.s32 2, %v7760_v19 }
 0x31e   : > { %v1922_v52 = vsel %vm1179_vm6, %v1897_v44, 0.0  ;;  %v5557_v3 = vpop.f32.mrb[23].mxu1 }
 0x31f   : > { %v1923_v17 = vadd.f32 %v1922_v52, %v1921_v40  ;;  %v5558_v22 = vadd.f32 %v5557_v3, %v5556_v21 }
 0x321   : > { %v1832_v0 = vadd.f32 %v5558_v22, %v8394_v37  ;;  %v5559_v8 = vpop.f32.mrb[24].mxu1  ;;  %v6168_v49 = vpop.f32.mrb[20].mxu0 }
 0x322   : > { %v2213_v9 = vadd.f32 %v6168_v49, %v8446_v45  ;;  %v5560_v25 = vpop.f32.mrb[25].mxu1  ;;  %v2207_v34 = vpop.f32.mrb[21].mxu0  ;;  %v8550_v49 = vrot.slane %v8442_v11, %v8542_v51 }
 0x323   : > { %vm1866_vm12 = vcmp.ge.f32.partialorder %v1832_v0, 0.0  ;;  %v1882_v26 = vmul.f32 0.01, %v1832_v0  ;;  %v5561_v41 = vadd.f32 %v5560_v25, %v5559_v8  ;;  %v2208_v39 = vadd.f32 %v2207_v34, %v8446_v45 }
 0x324   : > { %vm2231_vm13 = vcmp.ge.f32.partialorder %v2213_v9, 0.0  ;;  %v2239_v30 = vmul.f32 0.01, %v2213_v9 }
 0x325   : > { %v1898_v38 = vsel %vm1866_vm12, %v1832_v0, %v1882_v26  ;;  %v1837_v18 = vadd.f32 %v5561_v41, %v8394_v37  ;;  %vm2230_vm14 = vcmp.ge.f32.partialorder %v2208_v39, 0.0  ;;  %v2238_v13 = vmul.f32 0.01, %v2208_v39 }
 0x326   : > { %v1924_v57 = vsel %vm1179_vm6, %v1898_v38, 0.0  ;;  %v8516_v35 = vsel %vm2231_vm13, %v2213_v9, %v2239_v30  ;;  %vm1932_vm12 = vcmask 517120  }
 0x327   : > { %v1925_v33 = vadd.f32 %v1924_v57, %v1923_v17  ;;  %vm1867_vm15 = vcmp.ge.f32.partialorder %v1837_v18, 0.0  ;;  %v2267_v16 = vrot.slane %v8516_v35, 1  ;;  %v2329_v63 = vrot.slane %v8516_v35, 3 }
 0x328   : > { %v1883_v15 = vmul.f32 0.01, %v1837_v18  ;;  %v8520_v1 = vsel %vm2230_vm14, %v2208_v39, %v2238_v13 }
 0x329   : > { %v2265_v24 = vrot.slane %v8520_v1, 1  ;;  %v2327_v12 = vrot.slane %v8520_v1, 3  ;;  %v5562_v14 = vpop.f32.mrb[26].mxu1 }
 0x32a   : > { %v1899_v55 = vsel %vm1867_vm15, %v1837_v18, %v1883_v15  ;;  %v5563_v42 = vpop.f32.mrb[27].mxu1 }
 0x32b   : > { %v1926_v53 = vsel %vm1179_vm6, %v1899_v55, 0.0  ;;  %v5564_v6 = vadd.f32 %v5563_v42, %v5562_v14  ;;  %v2266_v29 = vsel %vm876_vm1, %v2263_v28, %v2265_v24  ;;  %v2328_v27 = vsel %vm1036_vm2, %v2325_v48, %v2327_v12 }
 0x32c   : > { %v1927_v56 = vadd.f32 %v1926_v53, %v1925_v33  ;;  %v7036_v62 = vpack.i.bf16 %v2266_v29, %v2328_v27  ;;  %v2268_v31 = vsel %vm876_vm1, %v2265_v24, %v2267_v16  ;;  %v2330_v61 = vsel %vm1036_vm2, %v2327_v12, %v2329_v63 }
 0x32d   : > { %v1842_v43 = vadd.f32 %v5564_v6, %v8394_v37  ;;  %v7041_v2 = vpack.i.bf16 %v2268_v31, %v2330_v61  ;;  %v5565_v47 = vpop.f32.mrb[28].mxu1  ;;  %v3008_v61 = vld [vmem:[%s10121_s9 + $0x88] sm:$0xff] }
 0x32e   : > { %7037 = vrot.lane.b32.xlu1 %v7036_v62, %s10118_s25  ;;  %v5566_v28 = vpop.f32.mrb[29].mxu1 }
 0x32f   : > { %vm1868_vm7 = vcmp.ge.f32.partialorder %v1842_v43, 0.0  ;;  %v1884_v10 = vmul.f32 0.01, %v1842_v43  ;;  %7042 = vrot.lane.b32.xlu0 %v7041_v2, %s10118_s25  ;;  %v5567_v48 = vadd.f32 %v5566_v28, %v5565_v47  ;;  %v2992_v2 = vld [vmem:[%s10121_s9 + $0x8] sm:$0xff] }
 0x331   : > { %v1900_v20 = vsel %vm1868_vm7, %v1842_v43, %v1884_v10  ;;  %v1847_v4 = vadd.f32 %v5567_v48, %v8394_v37  ;;  %v5568_v54 = vpop.f32.mrb[30].mxu1  ;;  %v6171_v58 = vpop.f32.mrb[22].mxu0  ;;  %v2991_v43 = vld [vmem:[%s10121_s9] sm:$0xff] }
 0x332   : > { %v1928_v32 = vsel %vm1179_vm6, %v1900_v20, 0.0  ;;  %v2223_v5 = vadd.f32 %v6171_v58, %v8446_v45  ;;  %v5569_v36 = vpop.f32.mrb[31].mxu1  ;;  %v2217_v40 = vpop.f32.mrb[23].mxu0 }
 0x333   : > { %v1929_v44 = vadd.f32 %v1928_v32, %v1927_v56  ;;  %vm1869_vm8 = vcmp.ge.f32.partialorder %v1847_v4, 0.0  ;;  %v1885_v21 = vmul.f32 0.01, %v1847_v4  ;;  %v5570_v52 = vadd.f32 %v5569_v36, %v5568_v54 }
 0x334   : > { %vm2233_vm9 = vcmp.ge.f32.partialorder %v2223_v5, 0.0  ;;  %v2241_v3 = vmul.f32 0.01, %v2223_v5  ;;  %v2218_v17 = vadd.f32 %v2217_v40, %v8446_v45  ;;  %v6482_v32 = vpack.c.bf16 %v2992_v2, %v2991_v43 }
 0x335   : > { %v1901_v22 = vsel %vm1869_vm8, %v1847_v4, %v1885_v21  ;;  %v1852_v0 = vadd.f32 %v5570_v52, %v8394_v37  ;;  %v5683_v8 = vpop.f32.mrb[32].mxu1 }
 0x336   : > { %v1930_v9 = vsel %vm1179_vm6, %v1901_v22, 0.0  ;;  %v8553_v25 = vsel %vm2233_vm9, %v2223_v5, %v2241_v3  ;;  %vm2232_vm10 = vcmp.ge.f32.partialorder %v2218_v17, 0.0  ;;  %v2240_v34 = vmul.f32 0.01, %v2218_v17  ;;  %v5684_v26 = vpop.f32.mrb[33].mxu1  ;;  %v3010_v22 = vld [vmem:[%s10121_s9 + $0x98] sm:$0xff] }
 0x337   : > { %v1931_v41 = vadd.f32 %v1930_v9, %v1929_v44  ;;  %vm1870_vm11 = vcmp.ge.f32.partialorder %v1852_v0, 0.0  ;;  %v1886_v39 = vmul.f32 0.01, %v1852_v0  ;;  %v5685_v30 = vadd.f32 %v5684_v26, %v5683_v8  ;;  %v2993_v9 = vld [vmem:[%s10121_s9 + $0x10] sm:$0xff] }
 0x338   : > { %v8555_v45 = vsel %vm2232_vm10, %v2218_v17, %v2240_v34  ;;  %v2271_v37 = vrot.slane %v8553_v25, 1  ;;  %v2333_v38 = vrot.slane %v8553_v25, 3  ;;  %v3009_v17 = vld [vmem:[%s10121_s9 + $0x90] sm:$0xff]  ;;  %v2994_v34 = vld [vmem:[%s10121_s9 + $0x18] sm:$0xff] }
 0x339   : > { %v2269_v11 = vrot.slane %v8555_v45, 1  ;;  %v2331_v18 = vrot.slane %v8555_v45, 3  ;;  %v5686_v13 = vpop.f32.mrb[34].mxu1  ;;  %v1902_v57 = vsel %vm1870_vm11, %v1852_v0, %v1886_v39  ;;  %v2732_v33 = vadd.f32 %v5685_v30, %v8550_v49  ;;  %v3011_v30 = vld [vmem:[%s10121_s9 + $0xa0] sm:$0xff] }
 0x33a   : > { %v5687_v15 = vpop.f32.mrb[35].mxu1  ;;  %v1933_v24 = vsel %vm1932_vm12, %v1902_v57, 0.0  ;;  %v7056_v48 = vpack.i.bf16 %v2271_v37, %v2333_v38  ;;  %v6486_v57 = vpack.c.bf16 %v2994_v34, %v2993_v9  ;;  %v3021_v9 = vld [vmem:[%s10121_s9 + $0xf0] sm:$0xff]  ;;  %v3022_v34 = vld [vmem:[%s10121_s9 + $0xf8] sm:$0xff] }
 0x33b   : > { %v5688_v12 = vadd.f32 %v5687_v15, %v5686_v13  ;;  %v2270_v14 = vsel %vm876_vm1, %v2267_v16, %v2269_v11  ;;  %v2332_v55 = vsel %vm1036_vm2, %v2329_v63, %v2331_v18  ;;  %v8569_v42 = vadd.f32 %v1933_v24, %v1931_v41  ;;  %v3007_v16 = vld [vmem:[%s10121_s9 + $0x80] sm:$0xff] }
 0x33c   : > { %vm2750_vm13 = vcmp.ge.f32.partialorder %v2732_v33, 0.0  ;;  %v2754_v53 = vmul.f32 0.01, %v2732_v33  ;;  %v7046_v6 = vpack.i.bf16 %v2270_v14, %v2332_v55  ;;  %v2272_v27 = vsel %vm876_vm1, %v2269_v11, %v2271_v37  ;;  %v3012_v37 = vld [vmem:[%s10121_s9 + $0xa8] sm:$0xff] }
 0x33d   : > { %v2737_v29 = vadd.f32 %v5688_v12, %v8550_v49  ;;  %v2334_v56 = vsel %vm1036_vm2, %v2331_v18, %v2333_v38  ;;  %v5689_v62 = vpop.f32.mrb[36].mxu1  ;;  %v6480_v58 = vpack.c.bf16 %v3008_v61, %v3007_v16  ;;  %v6484_v18 = vpack.c.bf16 %v3010_v22, %v3009_v17  ;;  %v2998_v16 = vld [vmem:[%s10121_s9 + $0x38] sm:$0xff] }
 0x33e   : > { %7047 = vrot.lane.b32.xlu1 %v7046_v6, %s10118_s25  ;;  %v7051_v31 = vpack.i.bf16 %v2272_v27, %v2334_v56  ;;  %v5690_v63 = vpop.f32.mrb[37].mxu1  ;;  %v8587_v47 = vsel %vm2750_vm13, %v2732_v33, %v2754_v53  ;;  %v2996_v33 = vld [vmem:[%s10121_s9 + $0x28] sm:$0xff]  ;;  %v6488_v12 = vpack.c.bf16 %v3012_v37, %v3011_v30  ;;  %v3013_v53 = vld [vmem:[%s10121_s9 + $0xb0] sm:$0xff]  ;;  %v3014_v6 = vld [vmem:[%s10121_s9 + $0xb8] sm:$0xff] }
 0x33f   : > { %vm2751_vm14 = vcmp.ge.f32.partialorder %v2737_v29, 0.0  ;;  %v2755_v28 = vmul.f32 0.01, %v2737_v29  ;;  %v5691_v10 = vadd.f32 %v5690_v63, %v5689_v62  ;;  %v2766_v36 = vrot.slane %v8587_v47, 1  ;;  %6481 = vmatprep.subr.bf16.mxu1 %v6480_v58  ;;  %v2997_v62 = vld [vmem:[%s10121_s9 + $0x30] sm:$0xff]  ;;  %v3000_v58 = vld [vmem:[%s10121_s9 + $0x48] sm:$0xff] }
 0x340   : > { %7052 = vrot.lane.b32.xlu0 %v7051_v31, %s10118_s25  ;;  %v2796_v44 = vrot.slane %v8587_v47, 3  ;;  %6483 = vmatpush3.bf16.msra.mxu1 %v6482_v32  ;;  %v6492_v31 = vpack.c.bf16 %v3014_v6, %v3013_v53  ;;  %v3017_v32 = vld [vmem:[%s10121_s9 + $0xd0] sm:$0xff]  ;;  %v3006_v37 = vld [vmem:[%s10121_s9 + $0x78] sm:$0xff]  ;;  %v2297_v6 = vrot.slane %v8469_v23, 2 }
 0x341   : > { %v8590_v20 = vsel %vm2751_vm14, %v2737_v29, %v2755_v28  ;;  %v2742_v4 = vadd.f32 %v5691_v10, %v8550_v49  ;;  %v5692_v54 = vpop.f32.mrb[38].mxu1  ;;  %6485 = vmatprep.subr.bf16.mxu1 %v6484_v18  ;;  %v6494_v28 = vpack.c.bf16 %v2998_v16, %v2997_v62  ;;  %v3015_v10 = vld [vmem:[%s10121_s9 + $0xc0] sm:$0xff]  ;;  %v3005_v30 = vld [vmem:[%s10121_s9 + $0x70] sm:$0xff] }
 0x342   : > { %7057 = vrot.lane.b32.xlu1 %v7056_v48, %s10118_s25  ;;  %v5693_v5 = vpop.f32.mrb[39].mxu1  ;;  %v2767_v40 = vrot.slane %v8590_v20, 1  ;;  %v2797_v21 = vrot.slane %v8590_v20, 3  ;;  %v3016_v48 = vld [vmem:[%s10121_s9 + $0xc8] sm:$0xff]  ;;  %v5358_v16 = vld [vmem:[%s10044_s11 + $0x290] sm:$0xff] }
 0x343   : > { %vm2752_vm15 = vcmp.ge.f32.partialorder %v2742_v4, 0.0  ;;  %v2756_v52 = vmul.f32 0.01, %v2742_v4  ;;  %v5694_v3 = vadd.f32 %v5693_v5, %v5692_v54  ;;  %v2999_v54 = vld [vmem:[%s10121_s9 + $0x40] sm:$0xff]  ;;  %v3018_v5 = vld [vmem:[%s10121_s9 + $0xd8] sm:$0xff] }
 0x344   : > { %v2768_v0 = vsel %vm876_vm1, %v2766_v36, %v2767_v40  ;;  %v2798_v8 = vsel %vm1036_vm2, %v2796_v44, %v2797_v21  ;;  %6487 = vmatpush3.bf16.msra.mxu1 %v6486_v57  ;;  %v6498_v36 = vpack.c.bf16 %v3000_v58, %v2999_v54  ;;  %v3001_v44 = vld [vmem:[%s10121_s9 + $0x50] sm:$0xff]  ;;  %v6510_v57 = vpack.c.bf16 %v3006_v37, %v3005_v30  ;;  %v5343_v54 = vld [vmem:[%s10044_s11 + $0x218] sm:$0xff]  ;;  %v5360_v58 = vld [vmem:[%s10044_s11 + $0x2a0] sm:$0xff] }
 0x345   : > { %v8612_v26 = vsel %vm2752_vm15, %v2742_v4, %v2756_v52  ;;  %v2747_v41 = vadd.f32 %v5694_v3, %v8550_v49  ;;  %v7061_v39 = vpack.i.bf16 %v2768_v0, %v2798_v8  ;;  %v2995_v49 = vld [vmem:[%s10121_s9 + $0x20] sm:$0xff]  ;;  %6489 = vmatprep.subr.bf16.mxu1 %v6488_v12  ;;  %v6496_v4 = vpack.c.bf16 %v3016_v48, %v3015_v10  ;;  %v3020_v3 = vld [vmem:[%s10121_s9 + $0xe8] sm:$0xff] }
 0x346   : > { %v2769_v38 = vrot.slane %v8612_v26, 1  ;;  %v2799_v11 = vrot.slane %v8612_v26, 3  ;;  %v6490_v56 = vpack.c.bf16 %v2996_v33, %v2995_v49  ;;  %v3019_v52 = vld [vmem:[%s10121_s9 + $0xe0] sm:$0xff]  ;;  %v3004_v8 = vld [vmem:[%s10121_s9 + $0x68] sm:$0xff] }
 0x347   : > { %vm2753_vm7 = vcmp.ge.f32.partialorder %v2747_v41, 0.0  ;;  %v2757_v13 = vmul.f32 0.01, %v2747_v41  ;;  %7062 = vrot.lane.b32.xlu0 %v7061_v39, %s10118_s25  ;;  %v6504_v22 = vpack.c.bf16 %v3020_v3, %v3019_v52  ;;  %v3003_v0 = vld [vmem:[%s10121_s9 + $0x60] sm:$0xff]  ;;  %v6508_v39 = vpack.c.bf16 %v3022_v34, %v3021_v9 }
 0x348   : > { %v2770_v15 = vsel %vm876_vm1, %v2767_v40, %v2769_v38  ;;  %v2800_v24 = vsel %vm1036_vm2, %v2797_v21, %v2799_v11  ;;  %6491 = vmatpush3.bf16.msra.mxu1 %v6490_v56  ;;  %v6500_v40 = vpack.c.bf16 %v3018_v5, %v3017_v32  ;;  %v3002_v21 = vld [vmem:[%s10121_s9 + $0x58] sm:$0xff]  ;;  %v5341_v56 = vld [vmem:[%s10044_s11 + $0x208] sm:$0xff]  ;;  %v2300_v9 = vrot.slane %v8487_v50, 2  ;;  %v5348_v37 = vld [vmem:[%s10044_s11 + $0x240] sm:$0xff] }
 0x349   : > { %v8632_v14 = vsel %vm2753_vm7, %v2747_v41, %v2757_v13  ;;  %v7066_v55 = vpack.i.bf16 %v2770_v15, %v2800_v24  ;;  %6493 = vmatprep.subr.bf16.mxu1 %v6492_v31  ;;  %v6502_v17 = vpack.c.bf16 %v3002_v21, %v3001_v44  ;;  %v6506_v41 = vpack.c.bf16 %v3004_v8, %v3003_v0  ;;  %v5359_v31 = vld [vmem:[%s10044_s11 + $0x298] sm:$0xff]  ;;  %v5361_v32 = vld [vmem:[%s10044_s11 + $0x2a8] sm:$0xff]  ;;  %v5362_v44 = vld [vmem:[%s10044_s11 + $0x2b0] sm:$0xff] }
 0x34a   : > { %v2771_v29 = vrot.slane %v8632_v14, 1  ;;  %v2801_v27 = vrot.slane %v8632_v14, 3  ;;  %v6452_v48 = vpack.c.bf16 %v5359_v31, %v5358_v16  ;;  %v6456_v5 = vpack.c.bf16 %v5361_v32, %v5360_v58  ;;  %v5363_v21 = vld [vmem:[%s10044_s11 + $0x2b8] sm:$0xff]  ;;  %v5364_v0 = vld [vmem:[%s10044_s11 + $0x2c0] sm:$0xff]  ;;  %v5365_v8 = vld [vmem:[%s10044_s11 + $0x2c8] sm:$0xff] }
 0x34b   : > { %7067 = vrot.lane.b32.xlu1 %v7066_v55, %s10118_s25  ;;  %v6460_v3 = vpack.c.bf16 %v5363_v21, %v5362_v44  ;;  %v6464_v30 = vpack.c.bf16 %v5365_v8, %v5364_v0  ;;  %v5370_v58 = vld [vmem:[%s10044_s11 + $0x2f0] sm:$0xff]  ;;  %v5371_v32 = vld [vmem:[%s10044_s11 + $0x2f8] sm:$0xff]  ;;  %v3040_v44 = vld [vmem:[%s10121_s9 + $0x188] sm:$0xff] }
 0x34c   : > { %v7076_v63 = vpack.i.bf16 %v2771_v29, %v2801_v27  ;;  %v2772_v61 = vsel %vm876_vm1, %v2769_v38, %v2771_v29  ;;  %v2802_v43 = vsel %vm1036_vm2, %v2799_v11, %v2801_v27  ;;  %6495 = vmatpush3.bf16.msra.mxu1 %v6494_v28  ;;  %v2972_v38 = vld [vmem:[%s836_s7] sm:$0xff]  ;;  %v8707_v11 = vld [vmem:[%s836_s7 + $0x8] sm:$0xff]  ;;  %v2298_v29 = vrot.slane %v8465_v60, 2  ;;  %s7198_s7 = smov 80  }
 0x34d   : > { %v7071_v2 = vpack.i.bf16 %v2772_v61, %v2802_v43  ;;  %6497 = vmatprep.subr.bf16.mxu1 %v6496_v4  ;;  %v2976_v18 = vrot.slane %v2972_v38, 1  ;;  %v2977_v13 = vrot.slane %v8707_v11, 1  ;;  %v2986_v33 = vrot.slane %v2972_v38, 3  ;;  %v5340_v27 = vld [vmem:[%s10044_s11 + $0x200] sm:$0xff]  ;;  %v5342_v4 = vld [vmem:[%s10044_s11 + $0x210] sm:$0xff] }
 0x34e   : > { %v2987_v15 = vrot.slane %v8707_v11, 3  ;;  %v2981_v24 = vrot.slane %v2972_v38, 2  ;;  %v2982_v12 = vrot.slane %v8707_v11, 2  ;;  %v2299_v43 = vsel %vm956_vm0, %v2297_v6, %v2298_v29 }
 0x34f   : > { %7077 = vrot.lane.b32.xlu1 %v7076_v63, %s10118_s25  ;;  %7072 = vrot.lane.b32.xlu0 %v7071_v2, %s10118_s25  ;;  %v2978_v49 = vsel %vm876_vm1, %v2976_v18, %v2977_v13  ;;  %v6450_v2 = vpack.c.bf16 %v5341_v56, %v5340_v27  ;;  %v2301_v6 = vsel %vm956_vm0, %v2298_v29, %v2300_v9  ;;  %v5351_v29 = vld [vmem:[%s10044_s11 + $0x258] sm:$0xff] }
 0x350   : > { %6499 = vmatpush3.bf16.msra.mxu1 %v6498_v36  ;;  %3123 = vmatprep.mubr.f32.mxu1 %v2978_v49  ;;  %v8716_v55 = vsel %vm1036_vm2, %v2986_v33, %v2987_v15  ;;  %v8721_v53 = vsel %vm956_vm0, %v2981_v24, %v2982_v12  ;;  %v5344_v36 = vld [vmem:[%s10044_s11 + $0x220] sm:$0xff]  ;;  %v5366_v49 = vld [vmem:[%s10044_s11 + $0x2d0] sm:$0xff]  ;;  %v5367_v33 = vld [vmem:[%s10044_s11 + $0x2d8] sm:$0xff] }
 0x351   : > { %6501 = vmatprep.subr.bf16.mxu1 %v6500_v40  ;;  %v5345_v40 = vld [vmem:[%s10044_s11 + $0x228] sm:$0xff] }
 0x352   : > { %v6458_v52 = vpack.c.bf16 %v5345_v40, %v5344_v36  ;;  %v5355_v36 = vld [vmem:[%s10044_s11 + $0x278] sm:$0xff]  ;;  %v3039_v40 = vld [vmem:[%s10121_s9 + $0x180] sm:$0xff] }
 0x354   : > { %6503 = vmatpush3.bf16.msra.mxu1 %v6502_v17  ;;  %v5346_v17 = vld [vmem:[%s10044_s11 + $0x230] sm:$0xff] }
 0x355   : > { %6505 = vmatprep.subr.bf16.mxu1 %v6504_v22  ;;  %v5347_v22 = vld [vmem:[%s10044_s11 + $0x238] sm:$0xff] }
 0x356   : > { %v6462_v34 = vpack.c.bf16 %v5347_v22, %v5346_v17  ;;  %v2306_v22 = vrot.slane %v8516_v35, 2 }
 0x358   : > { %6507 = vmatpush3.bf16.msra.mxu1 %v6506_v41 }
 0x359   : > { %6509 = vmatprep.subr.bf16.mxu1 %v6508_v39  ;;  %v2302_v39 = vrot.slane %v8483_v46, 2 }
 0x35b   : > { %v2303_v31 = vsel %vm956_vm0, %v2300_v9, %v2302_v39 }
 0x35c   : > { %6511 = vmatpush3.bf16.msra.mxu1 %v6510_v57 }
 0x35f   : > { %3124 = vmatmul.mubr.f32.vlgmr.msra.gmra.mrb[40].mxu1 %v2972_v38  ;;  %v5349_v38 = vld [vmem:[%s10044_s11 + $0x248] sm:$0xff] }
 0x360   : > { %3128 = vmatprep.mubr.f32.mxu1 %v2977_v13 }
 0x363   : > { %3129 = vmatmul.mubr.f32.gmra.mrb[42].mxu1 %v8707_v11  ;;  %v5372_v11 = vld [vmem:[%s10044_s11 + $0x300] sm:$0xff] }
 0x37c   : > { %v7023_v62 = vpop.permute.xlu0 %7022 }
 0x37d   : > { %v7025_v63 = vunpack.i.h.bf16 %v7023_v62  ;;  %v7024_v61 = vunpack.i.l.bf16 %v7023_v62  ;;  %v6466_v62 = vpack.c.bf16 %v5349_v38, %v5348_v37 }
 0x37f   : > { %v2367_v28 = vsel %vm1179_vm6, %v2299_v43, %v7024_v61  ;;  %v2359_v10 = vsel %vm1179_vm6, %v8469_v23, %v7025_v63  ;;  %v6454_v23 = vpack.c.bf16 %v5343_v54, %v5342_v4  ;;  %v6468_v63 = vpack.c.bf16 %v5367_v33, %v5366_v49  ;;  %v5350_v61 = vld [vmem:[%s10044_s11 + $0x250] sm:$0xff]  ;;  %v5352_v4 = vld [vmem:[%s10044_s11 + $0x260] sm:$0xff]  ;;  %v5353_v54 = vld [vmem:[%s10044_s11 + $0x268] sm:$0xff] }
 0x380   : > { %2476 = vmatprep.mubr.f32.mxu0 %v2367_v28  ;;  %v6470_v28 = vpack.c.bf16 %v5351_v29, %v5350_v61  ;;  %v2308_v49 = vrot.slane %v8555_v45, 2  ;;  %v2310_v33 = vrot.slane %v8553_v25, 2 }
 0x381   : > { %2477 = vmatmul.mubr.f32.vlgmr.msra.gmra.mrb[24].mxu0 %v2359_v10 }
 0x382   : > { %6451 = vmatpush3.bf16.msra.mxu0 %v6450_v2  ;;  %v5369_v2 = vld [vmem:[%s10044_s11 + $0x2e8] sm:$0xff] }
 0x383   : > { %6453 = vmatprep.subr.bf16.mxu0 %v6452_v48 }
 0x386   : > { %6455 = vmatpush3.bf16.msra.mxu0 %v6454_v23  ;;  %v6476_v23 = vpack.c.bf16 %v5371_v32, %v5370_v58  ;;  %v3024_v58 = vld [vmem:[%s10121_s9 + $0x108] sm:$0xff] }
 0x387   : > { %6457 = vmatprep.subr.bf16.mxu0 %v6456_v5  ;;  %v5354_v5 = vld [vmem:[%s10044_s11 + $0x270] sm:$0xff] }
 0x388   : > { %v6478_v21 = vpack.c.bf16 %v5355_v36, %v5354_v5  ;;  %v3041_v5 = vld [vmem:[%s10121_s9 + $0x190] sm:$0xff]  ;;  %v3042_v36 = vld [vmem:[%s10121_s9 + $0x198] sm:$0xff] }
 0x38a   : > { %6459 = vmatpush3.bf16.msra.mxu0 %v6458_v52  ;;  %v6512_v52 = vpack.c.bf16 %v3040_v44, %v3039_v40 }
 0x38b   : > { %v7028_v41 = vpop.permute.xlu1 %7027  ;;  %6461 = vmatprep.subr.bf16.mxu0 %v6460_v3  ;;  %v2304_v3 = vrot.slane %v8520_v1, 2 }
 0x38c   : > { %v7030_v18 = vunpack.i.h.bf16 %v7028_v41  ;;  %v7029_v13 = vunpack.i.l.bf16 %v7028_v41  ;;  %v7033_v57 = vpop.permute.xlu0 %7032 }
 0x38d   : > { %v7034_v24 = vunpack.i.l.bf16 %v7033_v57  ;;  %v7035_v16 = vunpack.i.h.bf16 %v7033_v57  ;;  %v2305_v41 = vsel %vm956_vm0, %v2302_v39, %v2304_v3 }
 0x38e   : > { %v2368_v27 = vsel %vm1179_vm6, %v2301_v6, %v7029_v13  ;;  %v2360_v56 = vsel %vm1179_vm6, %v8465_v60, %v7030_v18  ;;  %6463 = vmatpush3.bf16.msra.mxu0 %v6462_v34  ;;  %v5368_v60 = vld [vmem:[%s10044_s11 + $0x2e0] sm:$0xff]  ;;  %v2307_v18 = vsel %vm956_vm0, %v2304_v3, %v2306_v22  ;;  %v6516_v3 = vpack.c.bf16 %v3042_v36, %v3041_v5  ;;  %v3053_v5 = vld [vmem:[%s10121_s9 + $0x1f0] sm:$0xff]  ;;  %v3054_v36 = vld [vmem:[%s10121_s9 + $0x1f8] sm:$0xff] }
 0x38f   : > { %2481 = vmatprep.mubr.f32.mxu0 %v2368_v27  ;;  %6465 = vmatprep.subr.bf16.mxu0 %v6464_v30  ;;  %v2369_v43 = vsel %vm1179_vm6, %v2303_v31, %v7034_v24  ;;  %v2361_v10 = vsel %vm1179_vm6, %v8487_v50, %v7035_v16  ;;  %v6472_v48 = vpack.c.bf16 %v5369_v2, %v5368_v60 }
 0x390   : > { %2482 = vmatmul.mubr.f32.gmra.mrb[26].mxu0 %v2360_v56  ;;  %v6474_v50 = vpack.c.bf16 %v5353_v54, %v5352_v4  ;;  %v2309_v27 = vsel %vm956_vm0, %v2306_v22, %v2308_v49  ;;  %v3023_v54 = vld [vmem:[%s10121_s9 + $0x100] sm:$0xff]  ;;  %v2790_v22 = vrot.slane %v8632_v14, 2 }
 0x391   : > { %2486 = vmatprep.mubr.f32.mxu0 %v2369_v43  ;;  %v2786_v43 = vrot.slane %v8590_v20, 2 }
 0x392   : > { %6467 = vmatpush3.bf16.msra.mxu0 %v6466_v62 }
 0x393   : > { %6469 = vmatprep.subr.bf16.mxu0 %v6468_v63 }
 0x394   : > { %2487 = vmatmul.mubr.f32.gmra.mrb[28].mxu0 %v2361_v10  ;;  %v2785_v10 = vrot.slane %v8587_v47, 2 }
 0x396   : > { %6471 = vmatpush3.bf16.msra.mxu0 %v6470_v28  ;;  %v2787_v4 = vsel %vm956_vm0, %v2785_v10, %v2786_v43  ;;  %v3050_v10 = vld [vmem:[%s10121_s9 + $0x1d8] sm:$0xff] }
 0x397   : > { %6473 = vmatprep.subr.bf16.mxu0 %v6472_v48 }
 0x39a   : > { %6475 = vmatpush3.bf16.msra.mxu0 %v6474_v50 }
 0x39b   : > { %6477 = vmatprep.subr.bf16.mxu0 %v6476_v23 }
 0x39e   : > { %6479 = vmatpush3.bf16.msra.mxu0 %v6478_v21  ;;  %v6514_v21 = vpack.c.bf16 %v3024_v58, %v3023_v54  ;;  %v3033_v54 = vld [vmem:[%s10121_s9 + $0x150] sm:$0xff]  ;;  %v3051_v58 = vld [vmem:[%s10121_s9 + $0x1e0] sm:$0xff] }
 0x39f   : > { %6513 = vmatprep.subr.bf16.mxu0 %v6512_v52 }
 0x3a0   : > { %v7038_v17 = vpop.permute.xlu1 %7037 }
 0x3a1   : > { %v7040_v0 = vunpack.i.h.bf16 %v7038_v17  ;;  %v7039_v8 = vunpack.i.l.bf16 %v7038_v17  ;;  %v7043_v9 = vpop.permute.xlu0 %7042  ;;  %v3026_v17 = vld [vmem:[%s10121_s9 + $0x118] sm:$0xff] }
 0x3a2   : > { %v7044_v34 = vunpack.i.l.bf16 %v7043_v9  ;;  %v7045_v38 = vunpack.i.h.bf16 %v7043_v9 }
 0x3a3   : > { %v2370_v30 = vsel %vm1179_vm6, %v2305_v41, %v7039_v8  ;;  %v2362_v37 = vsel %vm1179_vm6, %v8483_v46, %v7040_v0  ;;  %v3044_v41 = vld [vmem:[%s10121_s9 + $0x1a8] sm:$0xff] }
 0x3a4   : > { %2491 = vmatprep.mubr.f32.mxu0 %v2370_v30  ;;  %v2371_v13 = vsel %vm1179_vm6, %v2307_v18, %v7044_v34  ;;  %v2363_v57 = vsel %vm1179_vm6, %v8520_v1, %v7045_v38  ;;  %v2311_v1 = vsel %vm956_vm0, %v2308_v49, %v2310_v33  ;;  %v3043_v34 = vld [vmem:[%s10121_s9 + $0x1a0] sm:$0xff]  ;;  %v3028_v49 = vld [vmem:[%s10121_s9 + $0x128] sm:$0xff] }
 0x3a5   : > { %2492 = vmatmul.mubr.f32.gmra.mrb[30].mxu0 %v2362_v37 }
 0x3a6   : > { %2496 = vmatprep.mubr.f32.mxu0 %v2371_v13  ;;  %v6520_v13 = vpack.c.bf16 %v3044_v41, %v3043_v34  ;;  %v5388_v34 = vld [vmem:[%s10044_s11 + $0x380] sm:$0xff] }
 0x3a7   : > { %v3405_v41 = vld [vmem:[%s10123_s29 + $0x80] sm:$0xff] }
 0x3a9   : > { %2497 = vmatmul.mubr.f32.gmra.mrb[32].mxu0 %v2363_v57  ;;  %v3027_v57 = vld [vmem:[%s10121_s9 + $0x120] sm:$0xff] }
 0x3b0   : > { %v7048_v39 = vpop.permute.xlu1 %7047 }
 0x3b1   : > { %v7050_v24 = vunpack.i.h.bf16 %v7048_v39  ;;  %v7049_v6 = vunpack.i.l.bf16 %v7048_v39 }
 0x3b2   : > { %v7053_v46 = vpop.permute.xlu0 %7052 }
 0x3b3   : > { %v7054_v56 = vunpack.i.l.bf16 %v7053_v46  ;;  %v2372_v62 = vsel %vm1179_vm6, %v2309_v27, %v7049_v6  ;;  %v2364_v16 = vsel %vm1179_vm6, %v8516_v35, %v7050_v24  ;;  %v7055_v31 = vunpack.i.h.bf16 %v7053_v46  ;;  %v3045_v6 = vld [vmem:[%s10121_s9 + $0x1b0] sm:$0xff]  ;;  %v3046_v46 = vld [vmem:[%s10121_s9 + $0x1b8] sm:$0xff] }
 0x3b4   : > { %v7058_v63 = vpop.permute.xlu1 %7057  ;;  %2501 = vmatprep.mubr.f32.mxu0 %v2372_v62  ;;  %v6524_v62 = vpack.c.bf16 %v3046_v46, %v3045_v6 }
 0x3b5   : > { %v7059_v61 = vunpack.i.l.bf16 %v7058_v63  ;;  %2502 = vmatmul.mubr.f32.gmra.mrb[34].mxu0 %v2364_v16  ;;  %v2373_v29 = vsel %vm1179_vm6, %v2311_v1, %v7054_v56  ;;  %v7060_v60 = vunpack.i.h.bf16 %v7058_v63  ;;  %v2365_v2 = vsel %vm1179_vm6, %v8555_v45, %v7055_v31  ;;  %v3030_v16 = vld [vmem:[%s10121_s9 + $0x138] sm:$0xff]  ;;  %v3047_v1 = vld [vmem:[%s10121_s9 + $0x1c0] sm:$0xff] }
 0x3b6   : > { %2506 = vmatprep.mubr.f32.mxu0 %v2373_v29  ;;  %v2788_v45 = vrot.slane %v8612_v26, 2  ;;  %v6522_v56 = vpack.c.bf16 %v3028_v49, %v3027_v57  ;;  %v5391_v49 = vld [vmem:[%s10044_s11 + $0x398] sm:$0xff] }
 0x3b7   : > { %v2374_v28 = vsel %vm1179_vm6, %v2310_v33, %v7059_v61  ;;  %v2366_v50 = vsel %vm1179_vm6, %v8553_v25, %v7060_v60  ;;  %v3025_v25 = vld [vmem:[%s10121_s9 + $0x110] sm:$0xff]  ;;  %v3048_v61 = vld [vmem:[%s10121_s9 + $0x1c8] sm:$0xff] }
 0x3b8   : > { %v2789_v52 = vsel %vm956_vm0, %v2786_v43, %v2788_v45  ;;  %v6518_v18 = vpack.c.bf16 %v3026_v17, %v3025_v25  ;;  %v6528_v60 = vpack.c.bf16 %v3048_v61, %v3047_v1  ;;  %v5376_v61 = vld [vmem:[%s10044_s11 + $0x320] sm:$0xff] }
 0x3b9   : > { %2507 = vmatmul.mubr.f32.gmra.mrb[36].mxu0 %v2365_v2  ;;  %v7063_v35 = vpop.permute.xlu0 %7062  ;;  %v3032_v2 = vld [vmem:[%s10121_s9 + $0x148] sm:$0xff] }
 0x3ba   : > { %2511 = vmatprep.mubr.f32.mxu0 %v2374_v28  ;;  %v7064_v48 = vunpack.i.l.bf16 %v7063_v35  ;;  %v7065_v32 = vunpack.i.h.bf16 %v7063_v35  ;;  %v3049_v35 = vld [vmem:[%s10121_s9 + $0x1d0] sm:$0xff] }
 0x3bc   : > { %v2819_v23 = vsel %vm1179_vm6, %v2787_v4, %v7064_v48  ;;  %v2815_v8 = vsel %vm1179_vm6, %v8587_v47, %v7065_v32  ;;  %v2791_v47 = vsel %vm956_vm0, %v2788_v45, %v2790_v22  ;;  %v6532_v4 = vpack.c.bf16 %v3050_v10, %v3049_v35  ;;  %v3052_v45 = vld [vmem:[%s10121_s9 + $0x1e8] sm:$0xff]  ;;  %v5394_v10 = vld [vmem:[%s10044_s11 + $0x3b0] sm:$0xff] }
 0x3bd   : > { %2512 = vmatmul.mubr.f32.gmra.mrb[38].mxu0 %v2366_v50  ;;  %v7068_v40 = vpop.permute.xlu1 %7067  ;;  %v6536_v32 = vpack.c.bf16 %v3052_v45, %v3051_v58  ;;  %v3035_v50 = vld [vmem:[%s10121_s9 + $0x160] sm:$0xff]  ;;  %v5379_v58 = vld [vmem:[%s10044_s11 + $0x338] sm:$0xff] }
 0x3be   : > { %v7069_v44 = vunpack.i.l.bf16 %v7068_v40  ;;  %2924 = vmatprep.mubr.f32.mxu0 %v2819_v23  ;;  %v7070_v0 = vunpack.i.h.bf16 %v7068_v40  ;;  %v3036_v23 = vld [vmem:[%s10121_s9 + $0x168] sm:$0xff] }
 0x3bf   : > { %v6538_v40 = vpack.c.bf16 %v3036_v23, %v3035_v50 }
 0x3c0   : > { %v2820_v9 = vsel %vm1179_vm6, %v2789_v52, %v7069_v44  ;;  %v2816_v33 = vsel %vm1179_vm6, %v8590_v20, %v7070_v0  ;;  %v3029_v20 = vld [vmem:[%s10121_s9 + $0x130] sm:$0xff]  ;;  %v6540_v44 = vpack.c.bf16 %v3054_v36, %v3053_v5  ;;  %v3038_v52 = vld [vmem:[%s10121_s9 + $0x178] sm:$0xff]  ;;  %v5396_v5 = vld [vmem:[%s10044_s11 + $0x3c0] sm:$0xff] }
 0x3c1   : > { %2925 = vmatmul.mubr.f32.vlgmr.msra.gmra.mrb[40].mxu0 %v2815_v8  ;;  %v7073_v30 = vpop.permute.xlu0 %7072  ;;  %v7078_v37 = vpop.permute.xlu1 %7077  ;;  %v6526_v43 = vpack.c.bf16 %v3030_v16, %v3029_v20  ;;  %v5392_v16 = vld [vmem:[%s10044_s11 + $0x3a0] sm:$0xff]  ;;  %v5397_v36 = vld [vmem:[%s10044_s11 + $0x3c8] sm:$0xff] }
 0x3c2   : > { %6515 = vmatpush3.bf16.msra.mxu0 %v6514_v21  ;;  %v7074_v38 = vunpack.i.l.bf16 %v7073_v30  ;;  %2929 = vmatprep.mubr.f32.mxu0 %v2820_v9  ;;  %v7075_v39 = vunpack.i.h.bf16 %v7073_v30  ;;  %v7079_v27 = vunpack.i.l.bf16 %v7078_v37  ;;  %v7080_v31 = vunpack.i.h.bf16 %v7078_v37  ;;  %v3037_v21 = vld [vmem:[%s10121_s9 + $0x170] sm:$0xff] }
 0x3c3   : > { %6517 = vmatprep.subr.bf16.mxu0 %v6516_v3  ;;  %v6542_v3 = vpack.c.bf16 %v3038_v52, %v3037_v21 }
 0x3c4   : > { %v2821_v24 = vsel %vm1179_vm6, %v2791_v47, %v7074_v38  ;;  %v2817_v63 = vsel %vm1179_vm6, %v8612_v26, %v7075_v39  ;;  %v2822_v29 = vsel %vm1179_vm6, %v2790_v22, %v7079_v27  ;;  %v3031_v26 = vld [vmem:[%s10121_s9 + $0x140] sm:$0xff]  ;;  %v2818_v28 = vsel %vm1179_vm6, %v8632_v14, %v7080_v31  ;;  %v3034_v14 = vld [vmem:[%s10121_s9 + $0x158] sm:$0xff]  ;;  %s10124_s9 = smov %s10123_s29  ;;  %v5374_v39 = vld [vmem:[%s10044_s11 + $0x310] sm:$0xff] }
 0x3c5   : > { %2930 = vmatmul.mubr.f32.gmra.mrb[42].mxu0 %v2816_v33  ;;  %v6530_v48 = vpack.c.bf16 %v3032_v2, %v3031_v26  ;;  %v3406_v30 = vld [vmem:[%s10124_s9 + $0x88] sm:$0xff]  ;;  %v5375_v33 = vld [vmem:[%s10044_s11 + $0x318] sm:$0xff]  ;;  %v3407_v46 = vld [vmem:[%s10124_s9 + $0x90] sm:$0xff] }
 0x3c6   : > { %6519 = vmatpush3.bf16.msra.mxu0 %v6518_v18  ;;  %2934 = vmatprep.mubr.f32.mxu0 %v2821_v24  ;;  %v6576_v38 = vpack.c.bf16 %v3406_v30, %v3405_v41  ;;  %v3389_v18 = vld [vmem:[%s10124_s9] sm:$0xff]  ;;  %v3390_v47 = vld [vmem:[%s10124_s9 + $0x8] sm:$0xff]  ;;  %v6550_v6 = vpack.c.bf16 %v5375_v33, %v5374_v39  ;;  %v3408_v27 = vld [vmem:[%s10124_s9 + $0x98] sm:$0xff] }
 0x3c7   : > { %6521 = vmatprep.subr.bf16.mxu0 %v6520_v13  ;;  %v5390_v13 = vld [vmem:[%s10044_s11 + $0x390] sm:$0xff]  ;;  %v6578_v57 = vpack.c.bf16 %v3390_v47, %v3389_v18  ;;  %v3392_v20 = vld [vmem:[%s10124_s9 + $0x18] sm:$0xff]  ;;  %v5393_v31 = vld [vmem:[%s10044_s11 + $0x3a8] sm:$0xff] }
 0x3c8   : > { %v6548_v24 = vpack.c.bf16 %v5391_v49, %v5390_v13  ;;  %v6552_v1 = vpack.c.bf16 %v5393_v31, %v5392_v16  ;;  %v3393_v26 = vld [vmem:[%s10124_s9 + $0x20] sm:$0xff]  ;;  %v3394_v2 = vld [vmem:[%s10124_s9 + $0x28] sm:$0xff]  ;;  %v3411_v45 = vld [vmem:[%s10124_s9 + $0xb0] sm:$0xff] }
 0x3c9   : > { %2935 = vmatmul.mubr.f32.gmra.mrb[44].mxu0 %v2817_v63  ;;  %v3395_v50 = vld [vmem:[%s10124_s9 + $0x30] sm:$0xff]  ;;  %v3396_v23 = vld [vmem:[%s10124_s9 + $0x38] sm:$0xff]  ;;  %v3414_v21 = vld [vmem:[%s10124_s9 + $0xc8] sm:$0xff] }
 0x3ca   : > { %6523 = vmatpush3.bf16.msra.mxu0 %v6522_v56  ;;  %2939 = vmatprep.mubr.f32.mxu0 %v2822_v29  ;;  %v3391_v56 = vld [vmem:[%s10124_s9 + $0x10] sm:$0xff]  ;;  %v5377_v29 = vld [vmem:[%s10044_s11 + $0x328] sm:$0xff]  ;;  %v6590_v52 = vpack.c.bf16 %v3396_v23, %v3395_v50  ;;  %v3416_v30 = vld [vmem:[%s10124_s9 + $0xd8] sm:$0xff] }
 0x3cb   : > { %6525 = vmatprep.subr.bf16.mxu0 %v6524_v62  ;;  %v6580_v62 = vpack.c.bf16 %v3408_v27, %v3407_v46  ;;  %v6582_v63 = vpack.c.bf16 %v3392_v20, %v3391_v56  ;;  %v3415_v41 = vld [vmem:[%s10124_s9 + $0xd0] sm:$0xff]  ;;  %v3400_v33 = vld [vmem:[%s10124_s9 + $0x58] sm:$0xff]  ;;  %v3417_v46 = vld [vmem:[%s10124_s9 + $0xe0] sm:$0xff] }
 0x3cc   : > { %v5382_v13 = vld [vmem:[%s10044_s11 + $0x350] sm:$0xff]  ;;  %v6596_v39 = vpack.c.bf16 %v3416_v30, %v3415_v41  ;;  %v3418_v27 = vld [vmem:[%s10124_s9 + $0xe8] sm:$0xff]  ;;  %v5384_v16 = vld [vmem:[%s10044_s11 + $0x360] sm:$0xff] }
 0x3cd   : > { %2940 = vmatmul.mubr.f32.gmra.mrb[46].mxu0 %v2818_v28  ;;  %v6554_v28 = vpack.c.bf16 %v5377_v29, %v5376_v61  ;;  %v3399_v49 = vld [vmem:[%s10124_s9 + $0x50] sm:$0xff]  ;;  %v5385_v31 = vld [vmem:[%s10044_s11 + $0x368] sm:$0xff]  ;;  %v9149_v29 = vld [vmem:[%s10045_s12] sm:$0x1f] }
 0x3ce   : > { %6527 = vmatpush3.bf16.msra.mxu0 %v6526_v43  ;;  %3198 = vmatprep.mubr.f32.mxu0 %v8716_v55  ;;  %v6534_v55 = vpack.c.bf16 %v3034_v14, %v3033_v54  ;;  %v3409_v43 = vld [vmem:[%s10124_s9 + $0xa0] sm:$0xff]  ;;  %v6586_v54 = vpack.c.bf16 %v3394_v2, %v3393_v26  ;;  %v3402_v61 = vld [vmem:[%s10124_s9 + $0x68] sm:$0xff] }
 0x3cf   : > { %6529 = vmatprep.subr.bf16.mxu0 %v6528_v60  ;;  %v3410_v60 = vld [vmem:[%s10124_s9 + $0xa8] sm:$0xff] }
 0x3d0   : > { %v6584_v35 = vpack.c.bf16 %v3410_v60, %v3409_v43  ;;  %v9153_v43 = vrot.slane %v9149_v29, %v8436_v59  ;;  %v6570_v60 = vpack.c.bf16 %v5385_v31, %v5384_v16 }
 0x3d2   : > { %6531 = vmatpush3.bf16.msra.mxu0 %v6530_v48  ;;  %v5395_v48 = vld [vmem:[%s10044_s11 + $0x3b8] sm:$0xff] }
 0x3d3   : > { %6533 = vmatprep.subr.bf16.mxu0 %v6532_v4  ;;  %v5378_v4 = vld [vmem:[%s10044_s11 + $0x330] sm:$0xff]  ;;  %v6556_v14 = vpack.c.bf16 %v5395_v48, %v5394_v10 }
 0x3d6   : > { %6535 = vmatpush3.bf16.msra.mxu0 %v6534_v55  ;;  %v3412_v55 = vld [vmem:[%s10124_s9 + $0xb8] sm:$0xff] }
 0x3d7   : > { %6537 = vmatprep.subr.bf16.mxu0 %v6536_v32  ;;  %v6588_v32 = vpack.c.bf16 %v3412_v55, %v3411_v45 }
 0x3da   : > { %6539 = vmatpush3.bf16.msra.mxu0 %v6538_v40  ;;  %v6558_v40 = vpack.c.bf16 %v5379_v58, %v5378_v4 }
 0x3db   : > { %6541 = vmatprep.subr.bf16.mxu0 %v6540_v44  ;;  %v3413_v44 = vld [vmem:[%s10124_s9 + $0xc0] sm:$0xff] }
 0x3de   : > { %6543 = vmatpush3.bf16.msra.mxu0 %v6542_v3  ;;  %v6560_v3 = vpack.c.bf16 %v5397_v36, %v5396_v5 }
 0x3df   : > { %6577 = vmatprep.subr.bf16.mxu0 %v6576_v38 }
 0x3e1   : > { %3199 = vmatmul.mubr.f32.vlgmr.msra.gmra.mrb[48].mxu0 %v8721_v53  ;;  %v5389_v53 = vld [vmem:[%s10044_s11 + $0x388] sm:$0xff] }
 0x3e2   : > { %3203 = vmatprep.mubr.f32.mxu0 %v2987_v15  ;;  %v6544_v15 = vpack.c.bf16 %v5389_v53, %v5388_v34  ;;  %6579 = vmatpush3.bf16.msra.mxu0 %v6578_v57  ;;  %v6592_v34 = vpack.c.bf16 %v3414_v21, %v3413_v44  ;;  %v3398_v53 = vld [vmem:[%s10124_s9 + $0x48] sm:$0xff]  ;;  %v5383_v57 = vld [vmem:[%s10044_s11 + $0x358] sm:$0xff] }
 0x3e3   : > { %6581 = vmatprep.subr.bf16.mxu0 %v6580_v62  ;;  %v6566_v56 = vpack.c.bf16 %v5383_v57, %v5382_v13  ;;  %v6598_v62 = vpack.c.bf16 %v3400_v33, %v3399_v49 }
 0x3e4   : > { %6545 = vmatprep.subr.bf16.mxu1 %v6544_v15  ;;  %v5399_v15 = vld [vmem:[%s10044_s11 + $0x3d8] sm:$0xff] }
 0x3e5   : > { %3204 = vmatmul.mubr.f32.gmra.mrb[50].mxu0 %v2982_v12  ;;  %v5373_v12 = vld [vmem:[%s10044_s11 + $0x308] sm:$0xff] }
 0x3e6   : > { %v6546_v37 = vpack.c.bf16 %v5373_v12, %v5372_v11  ;;  %6583 = vmatpush3.bf16.msra.mxu0 %v6582_v63  ;;  %v5398_v11 = vld [vmem:[%s10044_s11 + $0x3d0] sm:$0xff]  ;;  %v6600_v63 = vpack.c.bf16 %v3418_v27, %v3417_v46  ;;  %v1935_v27 = vrot.slane %v8569_v42, 4 }
 0x3e7   : > { %6585 = vmatprep.subr.bf16.mxu0 %v6584_v35  ;;  %v6564_v47 = vpack.c.bf16 %v5399_v15, %v5398_v11 }
 0x3e8   : > { %6547 = vmatpush3.bf16.msra.mxu1 %v6546_v37 }
 0x3e9   : > { %6549 = vmatprep.subr.bf16.mxu1 %v6548_v24  ;;  %v5400_v24 = vld [vmem:[%s10044_s11 + $0x3e0] sm:$0xff] }
 0x3ea   : > { %6587 = vmatpush3.bf16.msra.mxu0 %v6586_v54 }
 0x3eb   : > { %6589 = vmatprep.subr.bf16.mxu0 %v6588_v32 }
 0x3ec   : > { %6551 = vmatpush3.bf16.msra.mxu1 %v6550_v6  ;;  %v5401_v6 = vld [vmem:[%s10044_s11 + $0x3e8] sm:$0xff] }
 0x3ed   : > { %6553 = vmatprep.subr.bf16.mxu1 %v6552_v1  ;;  %v6568_v20 = vpack.c.bf16 %v5401_v6, %v5400_v24  ;;  %v3401_v1 = vld [vmem:[%s10124_s9 + $0x60] sm:$0xff] }
 0x3ee   : > { %6591 = vmatpush3.bf16.msra.mxu0 %v6590_v52  ;;  %v6602_v26 = vpack.c.bf16 %v3402_v61, %v3401_v1 }
 0x3ef   : > { %6593 = vmatprep.subr.bf16.mxu0 %v6592_v34 }
 0x3f0   : > { %6555 = vmatpush3.bf16.msra.mxu1 %v6554_v28 }
 0x3f1   : > { %6557 = vmatprep.subr.bf16.mxu1 %v6556_v14 }
 0x3f4   : > { %6559 = vmatpush3.bf16.msra.mxu1 %v6558_v40 }
 0x3f5   : > { %6561 = vmatprep.subr.bf16.mxu1 %v6560_v3 }
 0x432   : > { %v5771_v25 = vpop.f32.mrb[40].mxu1 }
 0x433   : > { %v5772_v17 = vpop.f32.mrb[41].mxu1 }
 0x434   : > { %v8974_v22 = vadd.f32 %v5772_v17, %v5771_v25  ;;  %v5380_v25 = vld [vmem:[%s10044_s11 + $0x340] sm:$0xff]  ;;  %v5381_v17 = vld [vmem:[%s10044_s11 + $0x348] sm:$0xff] }
 0x435   : > { %v6562_v38 = vpack.c.bf16 %v5381_v17, %v5380_v25 }
 0x436   : > { %v5774_v0 = vpop.f32.mrb[42].mxu1 }
 0x437   : > { %v5775_v8 = vpop.f32.mrb[43].mxu1  ;;  %6563 = vmatpush3.bf16.msra.mxu1 %v6562_v38 }
 0x438   : > { %v8976_v9 = vadd.f32 %v5775_v8, %v5774_v0  ;;  %v3397_v0 = vld [vmem:[%s10124_s9 + $0x40] sm:$0xff]  ;;  %6565 = vmatprep.subr.bf16.mxu1 %v6564_v47 }
 0x439   : > { %v6594_v18 = vpack.c.bf16 %v3398_v53, %v3397_v0 }
 0x43b   : > { %6595 = vmatpush3.bf16.msra.mxu0 %v6594_v18  ;;  %6567 = vmatpush3.bf16.msra.mxu1 %v6566_v56 }
 0x43c   : > { %6597 = vmatprep.subr.bf16.mxu0 %v6596_v39  ;;  %6569 = vmatprep.subr.bf16.mxu1 %v6568_v20 }
 0x43f   : > { %6599 = vmatpush3.bf16.msra.mxu0 %v6598_v62  ;;  %6571 = vmatpush3.bf16.msra.mxu1 %v6570_v60  ;;  %v1936_v60 = vadd.f32 %v1935_v27, %v8569_v42 }
 0x440   : > { %6601 = vmatprep.subr.bf16.mxu0 %v6600_v63 }
 0x443   : > { %6603 = vmatpush3.bf16.msra.mxu0 %v6602_v26 }
 0x454   : > { %v5627_v8 = vpop.f32.mrb[24].mxu0 }
 0x455   : > { %v5628_v12 = vpop.f32.mrb[25].mxu0 }
 0x456   : > { %v5629_v37 = vadd.f32 %v5628_v12, %v5627_v8 }
 0x458   : > { %v2479_v2 = vadd.f32 %v5629_v37, %v9153_v43 }
 0x45a   : > { %v2525_v10 = vmul.f32 0.01, %v2479_v2  ;;  %vm2517_vm8 = vcmp.ge.f32.partialorder %v2479_v2, 0.0 }
 0x45c   : > { %v2533_v58 = vsel %vm2517_vm8, %v2479_v2, %v2525_v10 }
 0x45d   : > { %v2541_v23 = vsel %vm1179_vm6, %v2533_v58, 0.0  ;;  %v1937_v58 = vrot.slane %v1936_v60, 2 }
 0x463   : > { %v5630_v28 = vpop.f32.mrb[26].mxu0 }
 0x464   : > { %v5631_v35 = vpop.f32.mrb[27].mxu0 }
 0x465   : > { %v5632_v48 = vadd.f32 %v5631_v35, %v5630_v28  ;;  %v2859_v35 = vrot.slane %v9149_v29, %v8542_v51 }
 0x467   : > { %v2484_v4 = vadd.f32 %v5632_v48, %v9153_v43  ;;  %v5633_v54 = vpop.f32.mrb[28].mxu0 }
 0x468   : > { %v5634_v14 = vpop.f32.mrb[29].mxu0 }
 0x469   : > { %vm2518_vm9 = vcmp.ge.f32.partialorder %v2484_v4, 0.0  ;;  %v2526_v45 = vmul.f32 0.01, %v2484_v4  ;;  %v5635_v55 = vadd.f32 %v5634_v14, %v5633_v54 }
 0x46b   : > { %v2534_v32 = vsel %vm2518_vm9, %v2484_v4, %v2526_v45  ;;  %v2489_v50 = vadd.f32 %v5635_v55, %v9153_v43 }
 0x46c   : > { %v2542_v5 = vsel %vm1179_vm6, %v2534_v32, 0.0 }
 0x46d   : > { %v2543_v36 = vadd.f32 %v2542_v5, %v2541_v23  ;;  %vm2519_vm10 = vcmp.ge.f32.partialorder %v2489_v50, 0.0  ;;  %v2527_v40 = vmul.f32 0.01, %v2489_v50 }
 0x46f   : > { %v2535_v44 = vsel %vm2519_vm10, %v2489_v50, %v2527_v40 }
 0x470   : > { %v2544_v21 = vsel %vm1179_vm6, %v2535_v44, 0.0 }
 0x471   : > { %v2545_v52 = vadd.f32 %v2544_v21, %v2543_v36  ;;  %v1938_v36 = vadd.f32 %v1937_v58, %v1936_v60  ;;  %v9186_v60 = vld [vmem:[%s10043_s10] sm:$0x1f]  ;;  %v5403_v58 = vld [vmem:[%s10044_s11 + $0x3f8] sm:$0xff] }
 0x478   : > { %v5636_v3 = vpop.f32.mrb[30].mxu0 }
 0x479   : > { %v5637_v25 = vpop.f32.mrb[31].mxu0 }
 0x47a   : > { %v5638_v17 = vadd.f32 %v5637_v25, %v5636_v3 }
 0x47c   : > { %v2494_v0 = vadd.f32 %v5638_v17, %v9153_v43  ;;  %v5639_v8 = vpop.f32.mrb[32].mxu0 }
 0x47d   : > { %v5640_v34 = vpop.f32.mrb[33].mxu0 }
 0x47e   : > { %vm2520_vm11 = vcmp.ge.f32.partialorder %v2494_v0, 0.0  ;;  %v2528_v53 = vmul.f32 0.01, %v2494_v0  ;;  %v5641_v11 = vadd.f32 %v5640_v34, %v5639_v8 }
 0x480   : > { %v2536_v15 = vsel %vm2520_vm11, %v2494_v0, %v2528_v53  ;;  %v2499_v12 = vadd.f32 %v5641_v11, %v9153_v43 }
 0x481   : > { %v2546_v41 = vsel %vm1179_vm6, %v2536_v15, 0.0  ;;  %v1939_v15 = vrot.slane %v1938_v36, 1 }
 0x482   : > { %v2547_v30 = vadd.f32 %v2546_v41, %v2545_v52  ;;  %vm2521_vm13 = vcmp.ge.f32.partialorder %v2499_v12, 0.0  ;;  %v2529_v37 = vmul.f32 0.01, %v2499_v12 }
 0x484   : > { %v2537_v38 = vsel %vm2521_vm13, %v2499_v12, %v2529_v37  ;;  %vm3937_vm13 = vcmask 1040384  }
 0x485   : > { %v2548_v18 = vsel %vm1179_vm6, %v2537_v38, 0.0 }
 0x486   : > { %v2549_v47 = vadd.f32 %v2548_v18, %v2547_v30 }
 0x488   : > { %v5642_v13 = vpop.f32.mrb[34].mxu0 }
 0x489   : > { %v5643_v57 = vpop.f32.mrb[35].mxu0 }
 0x48a   : > { %v5644_v49 = vadd.f32 %v5643_v57, %v5642_v13  ;;  %v1940_v57 = vadd.f32 %v1939_v15, %v1938_v36  ;;  %v3419_v36 = vld [vmem:[%s10124_s9 + $0xf0] sm:$0xff]  ;;  %v3469_v15 = vld [vmem:[%s10124_s9 + $0x280] sm:$0xff] }
 0x48c   : > { %v2504_v39 = vadd.f32 %v5644_v49, %v9153_v43  ;;  %v5645_v33 = vpop.f32.mrb[36].mxu0  ;;  %v1942_v27 = vmul.f32 0.008196721, %v1940_v57 }
 0x48d   : > { %v5646_v24 = vpop.f32.mrb[37].mxu0 }
 0x48e   : > { %vm2522_vm14 = vcmp.ge.f32.partialorder %v2504_v39, 0.0  ;;  %v2530_v6 = vmul.f32 0.01, %v2504_v39  ;;  %v5647_v46 = vadd.f32 %v5646_v24, %v5645_v33 }
 0x490   : > { %v2538_v56 = vsel %vm2522_vm14, %v2504_v39, %v2530_v6  ;;  %v2509_v62 = vadd.f32 %v5647_v46, %v9153_v43  ;;  %v5648_v20 = vpop.f32.mrb[38].mxu0  ;;  %vm3939_vm14 = vcmask 1041408  }
 0x491   : > { %v2550_v16 = vsel %vm1179_vm6, %v2538_v56, 0.0  ;;  %v5649_v31 = vpop.f32.mrb[39].mxu0 }
 0x492   : > { %v2551_v63 = vadd.f32 %v2550_v16, %v2549_v47  ;;  %vm2523_vm15 = vcmp.ge.f32.partialorder %v2509_v62, 0.0  ;;  %v2531_v1 = vmul.f32 0.01, %v2509_v62  ;;  %v5650_v61 = vadd.f32 %v5649_v31, %v5648_v20 }
 0x494   : > { %v2539_v26 = vsel %vm2523_vm15, %v2509_v62, %v2531_v1  ;;  %v2514_v2 = vadd.f32 %v5650_v61, %v9153_v43  ;;  %v5727_v28 = vpop.f32.mrb[40].mxu0 }
 0x495   : > { %v2552_v10 = vsel %vm1179_vm6, %v2539_v26, 0.0  ;;  %v5728_v48 = vpop.f32.mrb[41].mxu0 }
 0x496   : > { %v2553_v4 = vadd.f32 %v2552_v10, %v2551_v63  ;;  %vm2524_vm7 = vcmp.ge.f32.partialorder %v2514_v2, 0.0  ;;  %v2532_v54 = vmul.f32 0.01, %v2514_v2  ;;  %v5729_v14 = vadd.f32 %v5728_v48, %v5727_v28 }
 0x497   : > { %v9181_v63 = vsub.s32 3, %v7760_v19 }
 0x498   : > { %v2540_v45 = vsel %vm2524_vm7, %v2514_v2, %v2532_v54  ;;  %v2927_v55 = vadd.f32 %v5729_v14, %v2859_v35  ;;  %v5730_v32 = vpop.f32.mrb[42].mxu0  ;;  %v5402_v14 = vld [vmem:[%s10044_s11 + $0x3f0] sm:$0xff] }
 0x499   : > { %v2554_v42 = vsel %vm1932_vm12, %v2540_v45, 0.0  ;;  %v5731_v50 = vpop.f32.mrb[43].mxu0  ;;  %v3058_v26 = vrot.slane %v9186_v60, %v9181_v63 }
 0x49a   : > { %v2555_v23 = vadd.f32 %v2554_v42, %v2553_v4  ;;  %vm2945_vm8 = vcmp.ge.f32.partialorder %v2927_v55, 0.0  ;;  %v2949_v43 = vmul.f32 0.01, %v2927_v55  ;;  %v5732_v5 = vadd.f32 %v5731_v50, %v5730_v32 }
 0x49b   : > { %v3131_v32 = vadd.f32 %v8976_v9, %v3058_v26  ;;  %v6572_v50 = vpack.c.bf16 %v5403_v58, %v5402_v14  ;;  %v3420_v9 = vld [vmem:[%s10124_s9 + $0xf8] sm:$0xff] }
 0x49c   : > { %v2556_v40 = vrot.slane %v2555_v23, 4  ;;  %v2932_v44 = vadd.f32 %v5732_v5, %v2859_v35  ;;  %v5733_v21 = vpop.f32.mrb[44].mxu0  ;;  %v2953_v52 = vsel %vm2945_vm8, %v2927_v55, %v2949_v43  ;;  %v3476_v14 = vld [vmem:[%s10124_s9 + $0x2b8] sm:$0xff]  ;;  %vm3941_vm8 = vcmask 1042432  }
 0x49d   : > { %v5734_v3 = vpop.f32.mrb[45].mxu0  ;;  %v2957_v12 = vsel %vm1179_vm6, %v2953_v52, 0.0  ;;  %6573 = vmatprep.subr.bf16.mxu1 %v6572_v50  ;;  %v3478_v50 = vld [vmem:[%s10124_s9 + $0x2c8] sm:$0xff] }
 0x49e   : > { %v2557_v25 = vadd.f32 %v2556_v40, %v2555_v23  ;;  %vm2946_vm9 = vcmp.ge.f32.partialorder %v2932_v44, 0.0  ;;  %v2950_v17 = vmul.f32 0.01, %v2932_v44  ;;  %v5735_v0 = vadd.f32 %v5734_v3, %v5733_v21  ;;  %v5387_v23 = vld [vmem:[%s10044_s11 + $0x378] sm:$0xff]  ;;  %v3403_v40 = vld [vmem:[%s10124_s9 + $0x70] sm:$0xff] }
 0x49f   : > { %v6604_v3 = vpack.c.bf16 %v3420_v9, %v3419_v36  ;;  %v3479_v36 = vld [vmem:[%s10124_s9 + $0x2d0] sm:$0xff]  ;;  %v3480_v9 = vld [vmem:[%s10124_s9 + $0x2d8] sm:$0xff] }
 0x4a0   : > { %v2558_v8 = vrot.slane %v2557_v25, 2  ;;  %v2954_v34 = vsel %vm2946_vm9, %v2932_v44, %v2950_v17  ;;  %v2937_v53 = vadd.f32 %v5735_v0, %v2859_v35  ;;  %v5736_v11 = vpop.f32.mrb[46].mxu0  ;;  %v3437_v0 = vld [vmem:[%s10124_s9 + $0x180] sm:$0xff] }
 0x4a1   : > { %v2958_v41 = vsel %vm1179_vm6, %v2954_v34, 0.0  ;;  %v5737_v30 = vpop.f32.mrb[47].mxu0  ;;  %6605 = vmatprep.subr.bf16.mxu0 %v6604_v3  ;;  %v3481_v3 = vld [vmem:[%s10124_s9 + $0x2e0] sm:$0xff] }
 0x4a2   : > { %v2559_v37 = vadd.f32 %v2558_v8, %v2557_v25  ;;  %v2959_v38 = vadd.f32 %v2958_v41, %v2957_v12  ;;  %vm2947_vm10 = vcmp.ge.f32.partialorder %v2937_v53, 0.0  ;;  %v2951_v18 = vmul.f32 0.01, %v2937_v53  ;;  %v3404_v25 = vld [vmem:[%s10124_s9 + $0x78] sm:$0xff]  ;;  %v3438_v8 = vld [vmem:[%s10124_s9 + $0x188] sm:$0xff] }
 0x4a3   : > { %v5738_v47 = vadd.f32 %v5737_v30, %v5736_v11  ;;  %v6606_v17 = vpack.c.bf16 %v3404_v25, %v3403_v40  ;;  %v6608_v11 = vpack.c.bf16 %v3438_v8, %v3437_v0  ;;  %v3470_v12 = vld [vmem:[%s10124_s9 + $0x288] sm:$0xff]  ;;  %v6660_v40 = vpack.c.bf16 %v3480_v9, %v3479_v36  ;;  %v3465_v0 = vld [vmem:[%s10124_s9 + $0x260] sm:$0xff] }
 0x4a4   : > { %v2955_v13 = vsel %vm2947_vm10, %v2937_v53, %v2951_v18  ;;  %v2560_v49 = vrot.slane %v2559_v37, 1  ;;  %v3454_v18 = vld [vmem:[%s10124_s9 + $0x208] sm:$0xff]  ;;  %v3445_v36 = vld [vmem:[%s10124_s9 + $0x1c0] sm:$0xff] }
 0x4a5   : > { %v2960_v39 = vsel %vm1179_vm6, %v2955_v13, 0.0  ;;  %v2942_v33 = vadd.f32 %v5738_v47, %v2859_v35  ;;  %v3126_v35 = vadd.f32 %v8974_v22, %v3058_v26  ;;  %v5386_v22 = vld [vmem:[%s10044_s11 + $0x370] sm:$0xff]  ;;  %6607 = vmatpush3.bf16.msra.mxu0 %v6606_v17  ;;  %v9244_v47 = vld [vmem:[%s841_s6] sm:$0xff]  ;;  %v9246_v13 = vld [vmem:[%s841_s6 + $0x8] sm:$0xff] }
 0x4a6   : > { %v2961_v24 = vadd.f32 %v2960_v39, %v2959_v38  ;;  %v2561_v6 = vadd.f32 %v2560_v49, %v2559_v37  ;;  %v6574_v5 = vpack.c.bf16 %v5387_v23, %v5386_v22  ;;  %v6640_v37 = vpack.c.bf16 %v3470_v12, %v3469_v15  ;;  %v3453_v38 = vld [vmem:[%s10124_s9 + $0x200] sm:$0xff]  ;;  %3585 = vmatprep.mubr.f32.mxu0 %v9246_v13  ;;  %v3482_v25 = vld [vmem:[%s10124_s9 + $0x2e8] sm:$0xff]  ;;  %v3484_v15 = vld [vmem:[%s10124_s9 + $0x2f8] sm:$0xff] }
 0x4a7   : > { %vm2948_vm11 = vcmp.ge.f32.partialorder %v2942_v33, 0.0  ;;  %v2952_v46 = vmul.f32 0.01, %v2942_v33  ;;  %v6642_v57 = vpack.c.bf16 %v3454_v18, %v3453_v38  ;;  %v3461_v23 = vld [vmem:[%s10124_s9 + $0x240] sm:$0xff]  ;;  %v6664_v17 = vpack.c.bf16 %v3482_v25, %v3481_v3  ;;  %v3466_v8 = vld [vmem:[%s10124_s9 + $0x268] sm:$0xff]  ;;  %v3447_v3 = vld [vmem:[%s10124_s9 + $0x1d0] sm:$0xff] }
 0x4a8   : > { %v2563_v56 = vmul.f32 0.01724138, %v2561_v6  ;;  %6575 = vmatpush3.bf16.msra.mxu1 %v6574_v5  ;;  %6641 = vmatprep.subr.bf16.mxu0 %v6640_v37  ;;  %v3468_v37 = vld [vmem:[%s10124_s9 + $0x278] sm:$0xff]  ;;  %v3382_v18 = vrot.slane %v9246_v13, 2  ;;  %v3446_v9 = vld [vmem:[%s10124_s9 + $0x1c8] sm:$0xff] }
 0x4a9   : > { %v2956_v62 = vsel %vm2948_vm11, %v2942_v33, %v2952_v46  ;;  %6609 = vmatprep.subr.bf16.mxu1 %v6608_v11  ;;  %3586 = vmatmul.mubr.f32.vlgmr.msra.gmra.mrb[52].mxu0 %v9244_v47  ;;  %v3471_v46 = vld [vmem:[%s10124_s9 + $0x290] sm:$0xff]  ;;  %v3448_v25 = vld [vmem:[%s10124_s9 + $0x1d8] sm:$0xff]  ;;  %vm3943_vm11 = vcmask 1043456  }
 0x4aa   : > { %v2962_v20 = vsel %vm1932_vm12, %v2956_v62, 0.0  ;;  %v3938_v16 = vsel %vm3937_vm13, %v1942_v27, %v2563_v56  ;;  %v3472_v27 = vld [vmem:[%s10124_s9 + $0x298] sm:$0xff]  ;;  %6643 = vmatpush3.bf16.msra.mxu0 %v6642_v57  ;;  %v3455_v62 = vld [vmem:[%s10124_s9 + $0x210] sm:$0xff]  ;;  %v3381_v57 = vrot.slane %v9244_v47, 2  ;;  %3725 = vmatprep.mubr.f32.mxu0 %v3382_v18 }
 0x4ab   : > { %v2963_v31 = vadd.f32 %v2962_v20, %v2961_v24  ;;  %v6644_v56 = vpack.c.bf16 %v3472_v27, %v3471_v46  ;;  %v3456_v20 = vld [vmem:[%s10124_s9 + $0x218] sm:$0xff]  ;;  %v3483_v11 = vld [vmem:[%s10124_s9 + $0x2f0] sm:$0xff] }
 0x4ac   : > { %v6646_v26 = vpack.c.bf16 %v3456_v20, %v3455_v62  ;;  %v6668_v12 = vpack.c.bf16 %v3484_v15, %v3483_v11  ;;  %v3440_v62 = vld [vmem:[%s10124_s9 + $0x198] sm:$0xff]  ;;  %v3449_v11 = vld [vmem:[%s10124_s9 + $0x1e0] sm:$0xff]  ;;  %v3450_v15 = vld [vmem:[%s10124_s9 + $0x1e8] sm:$0xff] }
 0x4ad   : > { %v2964_v1 = vrot.slane %v2963_v31, 4  ;;  %6645 = vmatprep.subr.bf16.mxu0 %v6644_v56  ;;  %v3439_v56 = vld [vmem:[%s10124_s9 + $0x190] sm:$0xff] }
 0x4ae   : > { %6647 = vmatpush3.bf16.msra.mxu0 %v6646_v26  ;;  %v3451_v18 = vld [vmem:[%s10124_s9 + $0x1f0] sm:$0xff] }
 0x4af   : > { %v2965_v61 = vadd.f32 %v2964_v1, %v2963_v31 }
 0x4b1   : > { %v2966_v2 = vrot.slane %v2965_v61, 2 }
 0x4b3   : > { %v2967_v28 = vadd.f32 %v2966_v2, %v2965_v61  ;;  %v3473_v2 = vld [vmem:[%s10124_s9 + $0x2a0] sm:$0xff] }
 0x4b4   : > { %v5809_v10 = vpop.f32.mrb[48].mxu0 }
 0x4b5   : > { %v2968_v48 = vrot.slane %v2967_v28, 1  ;;  %v5810_v4 = vpop.f32.mrb[49].mxu0 }
 0x4b6   : > { %v5811_v54 = vadd.f32 %v5810_v4, %v5809_v10  ;;  %v3457_v10 = vld [vmem:[%s10124_s9 + $0x220] sm:$0xff] }
 0x4b7   : > { %v2969_v45 = vadd.f32 %v2968_v48, %v2967_v28  ;;  %v3474_v28 = vld [vmem:[%s10124_s9 + $0x2a8] sm:$0xff] }
 0x4b8   : > { %v3201_v55 = vadd.f32 %v5811_v54, %v3126_v35  ;;  %v5812_v42 = vpop.f32.mrb[50].mxu0  ;;  %v6648_v35 = vpack.c.bf16 %v3474_v28, %v3473_v2  ;;  %v3458_v48 = vld [vmem:[%s10124_s9 + $0x228] sm:$0xff]  ;;  %v3475_v54 = vld [vmem:[%s10124_s9 + $0x2b0] sm:$0xff]  ;;  %v6612_v28 = vpack.c.bf16 %v3440_v62, %v3439_v56 }
 0x4b9   : > { %v5813_v43 = vpop.f32.mrb[51].mxu0  ;;  %v2971_v44 = vmul.f32 0.03846154, %v2969_v45  ;;  %v6650_v4 = vpack.c.bf16 %v3458_v48, %v3457_v10  ;;  %v6652_v58 = vpack.c.bf16 %v3476_v14, %v3475_v54  ;;  %v3459_v45 = vld [vmem:[%s10124_s9 + $0x230] sm:$0xff]  ;;  %v3424_v10 = vld [vmem:[%s10124_s9 + $0x118] sm:$0xff]  ;;  %v3442_v54 = vld [vmem:[%s10124_s9 + $0x1a8] sm:$0xff] }
 0x4ba   : > { %v3211_v21 = vmul.f32 0.01, %v3201_v55  ;;  %v5814_v52 = vadd.f32 %v5813_v43, %v5812_v42  ;;  %vm3209_vm15 = vcmp.ge.f32.partialorder %v3201_v55, 0.0  ;;  %6649 = vmatprep.subr.bf16.mxu0 %v6648_v35  ;;  %v3477_v42 = vld [vmem:[%s10124_s9 + $0x2c0] sm:$0xff]  ;;  %v3462_v43 = vld [vmem:[%s10124_s9 + $0x248] sm:$0xff]  ;;  %v3423_v35 = vld [vmem:[%s10124_s9 + $0x110] sm:$0xff] }
 0x4bb   : > { %v9223_v34 = vsel %vm3939_vm14, %v3938_v16, %v2971_v44  ;;  %6651 = vmatpush3.bf16.msra.mxu0 %v6650_v4  ;;  %v6656_v22 = vpack.c.bf16 %v3478_v50, %v3477_v42  ;;  %v6658_v5 = vpack.c.bf16 %v3462_v43, %v3461_v23  ;;  %v3463_v44 = vld [vmem:[%s10124_s9 + $0x250] sm:$0xff]  ;;  %v3441_v4 = vld [vmem:[%s10124_s9 + $0x1a0] sm:$0xff]  ;;  %v6614_v14 = vpack.c.bf16 %v3424_v10, %v3423_v35  ;;  %v3488_v10 = vld [vmem:[%s10124_s9 + $0x318] sm:$0xff] }
 0x4bc   : > { %v3206_v53 = vadd.f32 %v5814_v52, %v3131_v32  ;;  %v9231_v41 = vsel %vm3209_vm15, %v3201_v55, %v3211_v21  ;;  %v3460_v55 = vld [vmem:[%s10124_s9 + $0x238] sm:$0xff]  ;;  %6653 = vmatprep.subr.bf16.mxu0 %v6652_v58  ;;  %v3378_v58 = vrot.slane %v9246_v13, 1  ;;  %v3443_v50 = vld [vmem:[%s10124_s9 + $0x1b0] sm:$0xff]  ;;  %vm3954_vm14 = vcmask 521216  }
 0x4bd   : > { %v3217_v24 = vrot.slane %v9231_v41, 1  ;;  %v3231_v6 = vrot.slane %v9231_v41, 3  ;;  %v6654_v32 = vpack.c.bf16 %v3460_v55, %v3459_v45  ;;  %v3464_v21 = vld [vmem:[%s10124_s9 + $0x258] sm:$0xff]  ;;  %v3226_v27 = vrot.slane %v9231_v41, 2  ;;  %v3425_v55 = vld [vmem:[%s10124_s9 + $0x120] sm:$0xff]  ;;  %v3487_v35 = vld [vmem:[%s10124_s9 + $0x310] sm:$0xff] }
 0x4be   : > { %vm3210_vm7 = vcmp.ge.f32.partialorder %v3206_v53, 0.0  ;;  %v3212_v30 = vmul.f32 0.01, %v3206_v53  ;;  %v6662_v52 = vpack.c.bf16 %v3464_v21, %v3463_v44  ;;  %v6616_v45 = vpack.c.bf16 %v3442_v54, %v3441_v4  ;;  %v3429_v21 = vld [vmem:[%s10124_s9 + $0x140] sm:$0xff]  ;;  %v3506_v4 = vld [vmem:[%s10124_s9 + $0x3a8] sm:$0xff] }
 0x4bf   : > { %6655 = vmatpush3.bf16.msra.mxu0 %v6654_v32  ;;  %v3426_v32 = vld [vmem:[%s10124_s9 + $0x128] sm:$0xff]  ;;  %v6624_v44 = vpack.c.bf16 %v3446_v9, %v3445_v36  ;;  %v3511_v9 = vld [vmem:[%s10124_s9 + $0x3d0] sm:$0xff]  ;;  %vm4171_vm15 = vcmask 48128  }
 0x4c0   : > { %v9248_v49 = vsel %vm3210_vm7, %v3206_v53, %v3212_v30  ;;  %6657 = vmatprep.subr.bf16.mxu0 %v6656_v22  ;;  %v6666_v53 = vpack.c.bf16 %v3466_v8, %v3465_v0  ;;  %v3467_v30 = vld [vmem:[%s10124_s9 + $0x270] sm:$0xff]  ;;  %v3444_v22 = vld [vmem:[%s10124_s9 + $0x1b8] sm:$0xff]  ;;  %v6618_v23 = vpack.c.bf16 %v3426_v32, %v3425_v55  ;;  %v6628_v0 = vpack.c.bf16 %v3448_v25, %v3447_v3  ;;  %v3494_v36 = vld [vmem:[%s10124_s9 + $0x348] sm:$0xff] }
 0x4c1   : > { %v3218_v39 = vrot.slane %v9248_v49, 1  ;;  %v3232_v33 = vrot.slane %v9248_v49, 3  ;;  %v6670_v38 = vpack.c.bf16 %v3468_v37, %v3467_v30  ;;  %v6620_v43 = vpack.c.bf16 %v3444_v22, %v3443_v50  ;;  %v3431_v8 = vld [vmem:[%s10124_s9 + $0x150] sm:$0xff]  ;;  %v3433_v37 = vld [vmem:[%s10124_s9 + $0x160] sm:$0xff]  ;;  %v3492_v50 = vld [vmem:[%s10124_s9 + $0x338] sm:$0xff] }
 0x4c2   : > { %v6632_v30 = vpack.c.bf16 %v3450_v15, %v3449_v11  ;;  %v3509_v22 = vld [vmem:[%s10124_s9 + $0x3c0] sm:$0xff]  ;;  %v3496_v3 = vld [vmem:[%s10124_s9 + $0x358] sm:$0xff]  ;;  %v3498_v11 = vld [vmem:[%s10124_s9 + $0x368] sm:$0xff] }
 0x4c3   : > { %v7086_v16 = vpack.i.bf16 %v3218_v39, %v3232_v33  ;;  %v3219_v31 = vsel %vm876_vm1, %v3217_v24, %v3218_v39  ;;  %v3233_v1 = vsel %vm1036_vm2, %v3231_v6, %v3232_v33  ;;  %6659 = vmatpush3.bf16.msra.mxu0 %v6658_v5  ;;  %v3227_v39 = vrot.slane %v9248_v49, 2  ;;  %v3421_v24 = vld [vmem:[%s10124_s9 + $0x100] sm:$0xff]  ;;  %v3422_v6 = vld [vmem:[%s10124_s9 + $0x108] sm:$0xff]  ;;  %v3427_v5 = vld [vmem:[%s10124_s9 + $0x130] sm:$0xff] }
 0x4c4   : > { %v7081_v61 = vpack.i.bf16 %v3219_v31, %v3233_v1  ;;  %6661 = vmatprep.subr.bf16.mxu0 %v6660_v40  ;;  %v3513_v25 = vld [vmem:[%s10124_s9 + $0x3e0] sm:$0xff]  ;;  %v3515_v15 = vld [vmem:[%s10124_s9 + $0x3f0] sm:$0xff] }
 0x4c5   : > { %7087 = vrot.lane.b32.xlu1 %v7086_v16, %s10118_s25  ;;  %v3228_v1 = vsel %vm956_vm0, %v3226_v27, %v3227_v39  ;;  %v3502_v27 = vld [vmem:[%s10124_s9 + $0x388] sm:$0xff] }
 0x4c6   : > { %7082 = vrot.lane.b32.xlu0 %v7081_v61, %s10118_s25  ;;  %v6610_v61 = vpack.c.bf16 %v3422_v6, %v3421_v24  ;;  %v3435_v24 = vld [vmem:[%s10124_s9 + $0x170] sm:$0xff]  ;;  %v3436_v6 = vld [vmem:[%s10124_s9 + $0x178] sm:$0xff] }
 0x4c7   : > { %6663 = vmatpush3.bf16.msra.mxu0 %v6662_v52  ;;  %v3430_v52 = vld [vmem:[%s10124_s9 + $0x148] sm:$0xff]  ;;  %v6638_v56 = vpack.c.bf16 %v3436_v6, %v3435_v24 }
 0x4c8   : > { %6665 = vmatprep.subr.bf16.mxu0 %v6664_v17  ;;  %v6626_v17 = vpack.c.bf16 %v3430_v52, %v3429_v21  ;;  %v3495_v52 = vld [vmem:[%s10124_s9 + $0x350] sm:$0xff] }
 0x4cb   : > { %6667 = vmatpush3.bf16.msra.mxu0 %v6666_v53  ;;  %v3432_v53 = vld [vmem:[%s10124_s9 + $0x158] sm:$0xff] }
 0x4cc   : > { %6669 = vmatprep.subr.bf16.mxu0 %v6668_v12  ;;  %v6630_v12 = vpack.c.bf16 %v3432_v53, %v3431_v8  ;;  %v3497_v53 = vld [vmem:[%s10124_s9 + $0x360] sm:$0xff] }
 0x4cf   : > { %6671 = vmatpush3.bf16.msra.mxu0 %v6670_v38  ;;  %v3434_v38 = vld [vmem:[%s10124_s9 + $0x168] sm:$0xff] }
 0x4d2   : > { %3726 = vmatmul.mubr.f32.vlgmr.msra.gmra.mrb[54].mxu0 %v3381_v57  ;;  %v3452_v57 = vld [vmem:[%s10124_s9 + $0x1f8] sm:$0xff] }
 0x537   : > { %v7088_v33 = vpop.permute.xlu1 %7087 }
 0x538   : > { %v7083_v46 = vpop.permute.xlu0 %7082  ;;  %v7089_v20 = vunpack.i.l.bf16 %v7088_v33  ;;  %v7090_v48 = vunpack.i.h.bf16 %v7088_v33  ;;  %v6636_v33 = vpack.c.bf16 %v3452_v57, %v3451_v18  ;;  %v3500_v18 = vld [vmem:[%s10124_s9 + $0x378] sm:$0xff] }
 0x539   : > { %v7085_v16 = vunpack.i.h.bf16 %v7083_v46  ;;  %v7084_v31 = vunpack.i.l.bf16 %v7083_v46  ;;  %v3501_v46 = vld [vmem:[%s10124_s9 + $0x380] sm:$0xff] }
 0x53a   : > { %v3241_v42 = vsel %vm1179_vm6, %v9248_v49, %v7090_v48  ;;  %v3428_v49 = vld [vmem:[%s10124_s9 + $0x138] sm:$0xff]  ;;  %v6672_v62 = vpack.c.bf16 %v3502_v27, %v3501_v46  ;;  %v3505_v48 = vld [vmem:[%s10124_s9 + $0x3a0] sm:$0xff] }
 0x53b   : > { %v3242_v26 = vsel %vm1179_vm6, %v3228_v1, %v7084_v31  ;;  %v3240_v2 = vsel %vm1179_vm6, %v9231_v41, %v7085_v16  ;;  %v3243_v41 = vsel %vm1179_vm6, %v3227_v39, %v7089_v20  ;;  %v6622_v40 = vpack.c.bf16 %v3428_v49, %v3427_v5  ;;  %v3485_v20 = vld [vmem:[%s10124_s9 + $0x300] sm:$0xff]  ;;  %v3486_v16 = vld [vmem:[%s10124_s9 + $0x308] sm:$0xff]  ;;  %v3503_v31 = vld [vmem:[%s10124_s9 + $0x390] sm:$0xff] }
 0x53c   : > { %3345 = vmatprep.mubr.f32.mxu1 %v3242_v26  ;;  %v6634_v39 = vpack.c.bf16 %v3434_v38, %v3433_v37  ;;  %v3504_v1 = vld [vmem:[%s10124_s9 + $0x398] sm:$0xff]  ;;  %v6674_v26 = vpack.c.bf16 %v3486_v16, %v3485_v20  ;;  %v6680_v54 = vpack.c.bf16 %v3506_v4, %v3505_v48  ;;  %v3493_v49 = vld [vmem:[%s10124_s9 + $0x340] sm:$0xff]  ;;  %v3499_v38 = vld [vmem:[%s10124_s9 + $0x370] sm:$0xff] }
 0x53d   : > { %3346 = vmatmul.mubr.f32.vlgmr.msra.gmra.mrb[44].mxu1 %v3240_v2  ;;  %v3386_v2 = vrot.slane %v9246_v13, 3  ;;  %v6678_v13 = vpack.c.bf16 %v3488_v10, %v3487_v35  ;;  %v6702_v57 = vpack.c.bf16 %v3500_v18, %v3499_v38  ;;  %v5421_v20 = vld [vmem:[%s10044_s11 + $0x488] sm:$0xff]  ;;  %v5407_v35 = vld [vmem:[%s10044_s11 + $0x418] sm:$0xff]  ;;  %v5424_v10 = vld [vmem:[%s10044_s11 + $0x4a0] sm:$0xff] }
 0x53e   : > { %6611 = vmatpush3.bf16.msra.mxu1 %v6610_v61  ;;  %3350 = vmatprep.mubr.f32.mxu1 %v3243_v41  ;;  %v3377_v61 = vrot.slane %v9244_v47, 1  ;;  %v3489_v41 = vld [vmem:[%s10124_s9 + $0x320] sm:$0xff]  ;;  %v5425_v48 = vld [vmem:[%s10044_s11 + $0x4a8] sm:$0xff] }
 0x53f   : > { %6613 = vmatprep.subr.bf16.mxu1 %v6612_v28  ;;  %v6676_v28 = vpack.c.bf16 %v3504_v1, %v3503_v31  ;;  %v5405_v31 = vld [vmem:[%s10044_s11 + $0x408] sm:$0xff]  ;;  %v5422_v1 = vld [vmem:[%s10044_s11 + $0x490] sm:$0xff] }
 0x541   : > { %3351 = vmatmul.mubr.f32.gmra.mrb[46].mxu1 %v3241_v42  ;;  %v3491_v42 = vld [vmem:[%s10124_s9 + $0x330] sm:$0xff] }
 0x542   : > { %6615 = vmatpush3.bf16.msra.mxu1 %v6614_v14  ;;  %3655 = vmatprep.mubr.f32.mxu1 %v3378_v58  ;;  %v3490_v14 = vld [vmem:[%s10124_s9 + $0x328] sm:$0xff]  ;;  %v3507_v58 = vld [vmem:[%s10124_s9 + $0x3b0] sm:$0xff] }
 0x543   : > { %6617 = vmatprep.subr.bf16.mxu1 %v6616_v45  ;;  %v3508_v45 = vld [vmem:[%s10124_s9 + $0x3b8] sm:$0xff]  ;;  %v6682_v55 = vpack.c.bf16 %v3490_v14, %v3489_v41  ;;  %v5409_v41 = vld [vmem:[%s10044_s11 + $0x428] sm:$0xff]  ;;  %v5426_v14 = vld [vmem:[%s10044_s11 + $0x4b0] sm:$0xff] }
 0x544   : > { %v6684_v32 = vpack.c.bf16 %v3508_v45, %v3507_v58  ;;  %v5427_v58 = vld [vmem:[%s10044_s11 + $0x4b8] sm:$0xff] }
 0x546   : > { %6619 = vmatpush3.bf16.msra.mxu1 %v6618_v23  ;;  %v3510_v23 = vld [vmem:[%s10124_s9 + $0x3c8] sm:$0xff] }
 0x547   : > { %6621 = vmatprep.subr.bf16.mxu1 %v6620_v43  ;;  %v6686_v43 = vpack.c.bf16 %v3492_v50, %v3491_v42  ;;  %v6688_v5 = vpack.c.bf16 %v3510_v23, %v3509_v22  ;;  %v5411_v42 = vld [vmem:[%s10044_s11 + $0x438] sm:$0xff]  ;;  %v5428_v50 = vld [vmem:[%s10044_s11 + $0x4c0] sm:$0xff]  ;;  %v5429_v22 = vld [vmem:[%s10044_s11 + $0x4c8] sm:$0xff] }
 0x54a   : > { %6623 = vmatpush3.bf16.msra.mxu1 %v6622_v40  ;;  %v3512_v40 = vld [vmem:[%s10124_s9 + $0x3d8] sm:$0xff] }
 0x54b   : > { %6625 = vmatprep.subr.bf16.mxu1 %v6624_v44  ;;  %v6690_v44 = vpack.c.bf16 %v3494_v36, %v3493_v49  ;;  %v6692_v21 = vpack.c.bf16 %v3512_v40, %v3511_v9  ;;  %v5413_v49 = vld [vmem:[%s10044_s11 + $0x448] sm:$0xff]  ;;  %v5430_v36 = vld [vmem:[%s10044_s11 + $0x4d0] sm:$0xff]  ;;  %v5431_v9 = vld [vmem:[%s10044_s11 + $0x4d8] sm:$0xff] }
 0x54e   : > { %6627 = vmatpush3.bf16.msra.mxu1 %v6626_v17  ;;  %v3514_v17 = vld [vmem:[%s10124_s9 + $0x3e8] sm:$0xff] }
 0x54f   : > { %6629 = vmatprep.subr.bf16.mxu1 %v6628_v0  ;;  %v6694_v0 = vpack.c.bf16 %v3496_v3, %v3495_v52  ;;  %v6696_v8 = vpack.c.bf16 %v3514_v17, %v3513_v25  ;;  %v5415_v52 = vld [vmem:[%s10044_s11 + $0x458] sm:$0xff]  ;;  %v5432_v3 = vld [vmem:[%s10044_s11 + $0x4e0] sm:$0xff]  ;;  %v5433_v25 = vld [vmem:[%s10044_s11 + $0x4e8] sm:$0xff] }
 0x552   : > { %6631 = vmatpush3.bf16.msra.mxu1 %v6630_v12  ;;  %v3516_v12 = vld [vmem:[%s10124_s9 + $0x3f8] sm:$0xff] }
 0x553   : > { %6633 = vmatprep.subr.bf16.mxu1 %v6632_v30  ;;  %v6698_v30 = vpack.c.bf16 %v3498_v11, %v3497_v53  ;;  %v6700_v37 = vpack.c.bf16 %v3516_v12, %v3515_v15  ;;  %v5417_v53 = vld [vmem:[%s10044_s11 + $0x468] sm:$0xff]  ;;  %v3280_v12 = vrot.slane %v9149_v29, %v9181_v63 }
 0x556   : > { %6635 = vmatpush3.bf16.msra.mxu1 %v6634_v39  ;;  %v3385_v39 = vrot.slane %v9244_v47, 3  ;;  %v5404_v47 = vld [vmem:[%s10044_s11 + $0x400] sm:$0xff] }
 0x557   : > { %6637 = vmatprep.subr.bf16.mxu1 %v6636_v33 }
 0x55a   : > { %6639 = vmatpush3.bf16.msra.mxu1 %v6638_v56 }
 0x55b   : > { %6673 = vmatprep.subr.bf16.mxu1 %v6672_v62  ;;  %v5420_v62 = vld [vmem:[%s10044_s11 + $0x480] sm:$0xff] }
 0x55c   : > { %v6704_v16 = vpack.c.bf16 %v5421_v20, %v5420_v62 }
 0x55d   : > { %3656 = vmatmul.mubr.f32.vlgmr.msra.gmra.mrb[48].mxu1 %v3377_v61  ;;  %v5423_v61 = vld [vmem:[%s10044_s11 + $0x498] sm:$0xff] }
 0x55e   : > { %6675 = vmatpush3.bf16.msra.mxu1 %v6674_v26  ;;  %3795 = vmatprep.mubr.f32.mxu1 %v3386_v2  ;;  %v6706_v26 = vpack.c.bf16 %v5405_v31, %v5404_v47  ;;  %v6708_v2 = vpack.c.bf16 %v5423_v61, %v5422_v1 }
 0x55f   : > { %6677 = vmatprep.subr.bf16.mxu1 %v6676_v28  ;;  %v5406_v28 = vld [vmem:[%s10044_s11 + $0x410] sm:$0xff]  ;;  %6705 = vmatprep.subr.bf16.mxu0 %v6704_v16 }
 0x560   : > { %6707 = vmatpush3.bf16.msra.mxu0 %v6706_v26  ;;  %v6710_v4 = vpack.c.bf16 %v5407_v35, %v5406_v28 }
 0x561   : > { %6709 = vmatprep.subr.bf16.mxu0 %v6708_v2  ;;  %v3519_v2 = vsub.s32 4, %v7760_v19  ;;  %v5435_v19 = vld [vmem:[%s10044_s11 + $0x4f8] sm:$0xff] }
 0x562   : > { %6679 = vmatpush3.bf16.msra.mxu1 %v6678_v13  ;;  %v6712_v13 = vpack.c.bf16 %v5425_v48, %v5424_v10 }
 0x563   : > { %6681 = vmatprep.subr.bf16.mxu1 %v6680_v54  ;;  %v5408_v54 = vld [vmem:[%s10044_s11 + $0x420] sm:$0xff]  ;;  %v3520_v35 = vrot.slane %v9186_v60, %v3519_v2 }
 0x564   : > { %6711 = vmatpush3.bf16.msra.mxu0 %v6710_v4  ;;  %v6714_v45 = vpack.c.bf16 %v5409_v41, %v5408_v54 }
 0x565   : > { %6713 = vmatprep.subr.bf16.mxu0 %v6712_v13 }
 0x566   : > { %6683 = vmatpush3.bf16.msra.mxu1 %v6682_v55  ;;  %v6716_v55 = vpack.c.bf16 %v5427_v58, %v5426_v14 }
 0x567   : > { %6685 = vmatprep.subr.bf16.mxu1 %v6684_v32  ;;  %v5410_v32 = vld [vmem:[%s10044_s11 + $0x430] sm:$0xff] }
 0x568   : > { %6715 = vmatpush3.bf16.msra.mxu0 %v6714_v45  ;;  %v6718_v23 = vpack.c.bf16 %v5411_v42, %v5410_v32  ;;  %v5434_v45 = vld [vmem:[%s10044_s11 + $0x4f0] sm:$0xff] }
 0x569   : > { %6717 = vmatprep.subr.bf16.mxu0 %v6716_v55  ;;  %v6732_v60 = vpack.c.bf16 %v5435_v19, %v5434_v45  ;;  %v3988_v19 = vld [vmem:[%s10048_s15 + $0x48] sm:$0xff] }
 0x56a   : > { %6687 = vmatpush3.bf16.msra.mxu1 %v6686_v43  ;;  %v6720_v43 = vpack.c.bf16 %v5429_v22, %v5428_v50 }
 0x56b   : > { %6689 = vmatprep.subr.bf16.mxu1 %v6688_v5  ;;  %v5412_v5 = vld [vmem:[%s10044_s11 + $0x440] sm:$0xff] }
 0x56c   : > { %6719 = vmatpush3.bf16.msra.mxu0 %v6718_v23  ;;  %v6722_v40 = vpack.c.bf16 %v5413_v49, %v5412_v5 }
 0x56d   : > { %6721 = vmatprep.subr.bf16.mxu0 %v6720_v43 }
 0x56e   : > { %6691 = vmatpush3.bf16.msra.mxu1 %v6690_v44  ;;  %v6724_v44 = vpack.c.bf16 %v5431_v9, %v5430_v36 }
 0x56f   : > { %6693 = vmatprep.subr.bf16.mxu1 %v6692_v21  ;;  %v5414_v21 = vld [vmem:[%s10044_s11 + $0x450] sm:$0xff] }
 0x570   : > { %6723 = vmatpush3.bf16.msra.mxu0 %v6722_v40  ;;  %v6726_v17 = vpack.c.bf16 %v5415_v52, %v5414_v21 }
 0x571   : > { %6725 = vmatprep.subr.bf16.mxu0 %v6724_v44 }
 0x572   : > { %6695 = vmatpush3.bf16.msra.mxu1 %v6694_v0  ;;  %v6728_v0 = vpack.c.bf16 %v5433_v25, %v5432_v3  ;;  %v7125_v25 = vld [vmem:[%s10045_s12] sm:$0x1f] }
 0x573   : > { %6697 = vmatprep.subr.bf16.mxu1 %v6696_v8  ;;  %v5416_v8 = vld [vmem:[%s10044_s11 + $0x460] sm:$0xff] }
 0x574   : > { %6727 = vmatpush3.bf16.msra.mxu0 %v6726_v17  ;;  %v6730_v11 = vpack.c.bf16 %v5417_v53, %v5416_v8  ;;  %v3853_v17 = vrot.slane %v7125_v25, %v3519_v2  ;;  %v3980_v2 = vld [vmem:[%s10048_s15 + $0x8] sm:$0xff] }
 0x575   : > { %6729 = vmatprep.subr.bf16.mxu0 %v6728_v0 }
 0x576   : > { %6699 = vmatpush3.bf16.msra.mxu1 %v6698_v30 }
 0x577   : > { %6701 = vmatprep.subr.bf16.mxu1 %v6700_v37 }
 0x578   : > { %6731 = vmatpush3.bf16.msra.mxu0 %v6730_v11 }
 0x579   : > { %6733 = vmatprep.subr.bf16.mxu0 %v6732_v60  ;;  %v3990_v60 = vld [vmem:[%s10048_s15 + $0x58] sm:$0xff] }
 0x57a   : > { %6703 = vmatpush3.bf16.msra.mxu1 %v6702_v57 }
 0x57c   : > { %v5885_v33 = vpop.f32.mrb[52].mxu0 }
 0x57d   : > { %3796 = vmatmul.mubr.f32.vlgmr.msra.gmra.mrb[50].mxu1 %v3385_v39  ;;  %v5886_v24 = vpop.f32.mrb[53].mxu0 }
 0x57e   : > { %v9545_v6 = vadd.f32 %v5886_v24, %v5885_v33 }
 0x580   : > { %v3588_v4 = vadd.f32 %v9545_v6, %v3520_v35  ;;  %v5419_v6 = vld [vmem:[%s10044_s11 + $0x478] sm:$0xff] }
 0x5a5   : > { %v5955_v46 = vpop.f32.mrb[54].mxu0 }
 0x5a6   : > { %v5956_v27 = vpop.f32.mrb[55].mxu0 }
 0x5a7   : > { %v9547_v56 = vadd.f32 %v5956_v27, %v5955_v46 }
 0x610   : > { %v5847_v15 = vpop.f32.mrb[44].mxu1 }
 0x611   : > { %v5848_v30 = vpop.f32.mrb[45].mxu1 }
 0x612   : > { %v5849_v37 = vadd.f32 %v5848_v30, %v5847_v15 }
 0x614   : > { %v3348_v38 = vadd.f32 %v5849_v37, %v3280_v12  ;;  %v5850_v18 = vpop.f32.mrb[46].mxu1 }
 0x615   : > { %v5851_v57 = vpop.f32.mrb[47].mxu1 }
 0x616   : > { %v3358_v39 = vmul.f32 0.01, %v3348_v38  ;;  %v5852_v33 = vadd.f32 %v5851_v57, %v5850_v18  ;;  %vm3356_vm1 = vcmp.ge.f32.partialorder %v3348_v38, 0.0 }
 0x618   : > { %v3353_v24 = vadd.f32 %v5852_v33, %v3280_v12  ;;  %v3360_v46 = vsel %vm3356_vm1, %v3348_v38, %v3358_v39  ;;  %v3936_v39 = vld [vmem:[%s10046_s13] sm:$0x3f] }
 0x619   : > { %v3362_v20 = vsel %vm1179_vm6, %v3360_v46, 0.0 }
 0x61a   : > { %vm3357_vm2 = vcmp.ge.f32.partialorder %v3353_v24, 0.0  ;;  %v3359_v27 = vmul.f32 0.01, %v3353_v24 }
 0x61c   : > { %v3361_v62 = vsel %vm3357_vm2, %v3353_v24, %v3359_v27  ;;  %v3946_v24 = vrot.slane %v3936_v39, 1 }
 0x61d   : > { %v3363_v47 = vsel %vm1932_vm12, %v3361_v62, 0.0 }
 0x61e   : > { %v3364_v16 = vadd.f32 %v3363_v47, %v3362_v20 }
 0x620   : > { %v3365_v31 = vrot.slane %v3364_v16, 4 }
 0x622   : > { %v3366_v29 = vadd.f32 %v3365_v31, %v3364_v16 }
 0x624   : > { %v3367_v1 = vrot.slane %v3366_v29, 2 }
 0x626   : > { %v3368_v61 = vadd.f32 %v3367_v1, %v3366_v29 }
 0x628   : > { %v3369_v26 = vrot.slane %v3368_v61, 1 }
 0x62a   : > { %v3370_v28 = vadd.f32 %v3369_v26, %v3368_v61 }
 0x62c   : > { %v3372_v10 = vmul.f32 0.1, %v3370_v28  ;;  %v3982_v28 = vld [vmem:[%s10048_s15 + $0x18] sm:$0xff] }
 0x62d   : > { %v6736_v35 = vpack.c.bf16 %v3982_v28, %v3980_v2 }
 0x62e   : > { %v3942_v48 = vsel %vm3941_vm8, %v9223_v34, %v3372_v10  ;;  %v5418_v34 = vld [vmem:[%s10044_s11 + $0x470] sm:$0xff]  ;;  %v3979_v10 = vld [vmem:[%s10048_s15] sm:$0xff] }
 0x62f   : > { %v6734_v32 = vpack.c.bf16 %v5419_v6, %v5418_v34  ;;  %6737 = vmatprep.subr.bf16.mxu1 %v6736_v35  ;;  %v3987_v34 = vld [vmem:[%s10048_s15 + $0x40] sm:$0xff]  ;;  %v6744_v6 = vpack.c.bf16 %v3990_v60, %v3988_v19 }
 0x630   : > { %v5920_v13 = vpop.f32.mrb[48].mxu1 }
 0x631   : > { %v5921_v54 = vpop.f32.mrb[49].mxu1  ;;  %6735 = vmatpush3.bf16.msra.mxu0 %v6734_v32  ;;  %v3992_v32 = vld [vmem:[%s10048_s15 + $0x68] sm:$0xff] }
 0x632   : > { %v5922_v41 = vadd.f32 %v5921_v54, %v5920_v13  ;;  %v3984_v13 = vld [vmem:[%s10048_s15 + $0x28] sm:$0xff]  ;;  %v3986_v54 = vld [vmem:[%s10048_s15 + $0x38] sm:$0xff] }
 0x634   : > { %v3658_v14 = vadd.f32 %v5922_v41, %v3588_v4  ;;  %v6740_v41 = vpack.c.bf16 %v3986_v54, %v3984_v13 }
 0x636   : > { %v3728_v58 = vadd.f32 %v9547_v56, %v3658_v14  ;;  %v3983_v14 = vld [vmem:[%s10048_s15 + $0x20] sm:$0xff] }
 0x650   : > { %v5990_v55 = vpop.f32.mrb[50].mxu1 }
 0x651   : > { %v5991_v56 = vpop.f32.mrb[51].mxu1 }
 0x652   : > { %v5992_v42 = vadd.f32 %v5991_v56, %v5990_v55  ;;  %v3989_v55 = vld [vmem:[%s10048_s15 + $0x50] sm:$0xff]  ;;  %v3994_v56 = vld [vmem:[%s10048_s15 + $0x78] sm:$0xff] }
 0x654   : > { %v3798_v50 = vadd.f32 %v5992_v42, %v3728_v58  ;;  %v3985_v58 = vld [vmem:[%s10048_s15 + $0x30] sm:$0xff]  ;;  %v7195_v42 = vmov 0.0  }
 0x655   : > { %v6742_v45 = vpack.c.bf16 %v3985_v58, %v3983_v14  ;;  %4074 = vmatprep.mubr.f32.mxu1 %v7195_v42  ;;  %6192 = vmatprep.subr.mxu0 %v7195_v42 }
 0x656   : > { %vm3801_vm9 = vcmp.ge.f32.partialorder %v3798_v50, 0.0  ;;  %v3802_v22 = vmul.f32 0.01, %v3798_v50 }
 0x658   : > { %v3803_v23 = vsel %vm3801_vm9, %v3798_v50, %v3802_v22  ;;  %v6746_v50 = vpack.c.bf16 %v3989_v55, %v3987_v34  ;;  %v6748_v22 = vpack.c.bf16 %v3994_v56, %v3992_v32 }
 0x659   : > { %v3805_v43 = vrot.slane %v3803_v23, 1  ;;  %v3811_v5 = vrot.slane %v3803_v23, 3  ;;  %v3809_v44 = vrot.slane %v3803_v23, 2 }
 0x65b   : > { %v7091_v49 = vpack.i.bf16 %v3805_v43, %v3811_v5  ;;  %v3993_v43 = vld [vmem:[%s10048_s15 + $0x70] sm:$0xff] }
 0x65d   : > { %7092 = vrot.lane.b32.xlu0 %v7091_v49, %s10118_s25 }
 0x6cf   : > { %v7093_v36 = vpop.permute.xlu0 %7092 }
 0x6d0   : > { %v7095_v9 = vunpack.i.h.bf16 %v7093_v36  ;;  %v7094_v40 = vunpack.i.l.bf16 %v7093_v36 }
 0x6d2   : > { %v3816_v21 = vsel %vm1179_vm6, %v3809_v44, %v7094_v40  ;;  %v3815_v52 = vsel %vm1179_vm6, %v3803_v23, %v7095_v9  ;;  %v3991_v23 = vld [vmem:[%s10048_s15 + $0x60] sm:$0xff] }
 0x6d3   : > { %3918 = vmatprep.mubr.f32.mxu0 %v3816_v21  ;;  %v6750_v5 = vpack.c.bf16 %v3993_v43, %v3991_v23  ;;  %v9725_v40 = vld [vmem:[%s10047_s14] sm:$0xf] }
 0x6d4   : > { %3919 = vmatmul.mubr.f32.vlgmr.msra.gmra.mrb[56].mxu0 %v3815_v52  ;;  %v3972_v44 = vrot.slane %v9725_v40, %v7769_v7 }
 0x7a7   : > { %v6025_v3 = vpop.f32.mrb[56].mxu0 }
 0x7a8   : > { %v6026_v0 = vpop.f32.mrb[57].mxu0 }
 0x7a9   : > { %v6027_v8 = vadd.f32 %v6026_v0, %v6025_v3  ;;  %v3977_v3 = vrot.slane %v9725_v40, %v8436_v59  ;;  %v3995_v0 = vld [vmem:[%s10049_s16] sm:$0x3] }
 0x7ab   : > { %v3921_v53 = vadd.f32 %v6027_v8, %v3853_v17  ;;  %v4000_v8 = vrot.slane %v3995_v0, %v7769_v7 }
 0x7ad   : > { %vm3924_vm10 = vcmp.ge.f32.partialorder %v3921_v53, 0.0  ;;  %v3925_v11 = vmul.f32 0.01, %v3921_v53 }
 0x7af   : > { %v3926_v15 = vsel %vm3924_vm10, %v3921_v53, %v3925_v11 }
 0x7b0   : > { %v3927_v12 = vsel %vm1932_vm12, %v3926_v15, 0.0  ;;  %vm7196_vm12 = vmmov 0  }
 0x7b1   : > { %v3928_v30 = vrot.slane %v3927_v12, 4  ;;  %6194 = vmatprep.mubr.msk.f32.mxu0 %vm7196_vm12, %v7195_v42 }
 0x7b3   : > { %v3929_v37 = vadd.f32 %v3928_v30, %v3927_v12  ;;  %v4004_v12 = vrot.slane %v3995_v0, %v8436_v59 }
 0x7b5   : > { %v3930_v38 = vrot.slane %v3929_v37, 2 }
 0x7b7   : > { %v3931_v18 = vadd.f32 %v3930_v38, %v3929_v37 }
 0x7b9   : > { %v3932_v57 = vrot.slane %v3931_v18, 1 }
 0x7bb   : > { %v3933_v33 = vadd.f32 %v3932_v57, %v3931_v18 }
 0x7bd   : > { %v3935_v46 = vmul.f32 0.5, %v3933_v33 }
 0x7bf   : > { %v3944_v27 = vsel %vm3943_vm11, %v3942_v48, %v3935_v46  ;;  %v3981_v48 = vld [vmem:[%s10048_s15 + $0x10] sm:$0xff] }
 0x7c0   : > { %v3948_v62 = vadd.f32 %v3946_v24, %v3944_v27  ;;  %v6738_v4 = vpack.c.bf16 %v3981_v48, %v3979_v10 }
 0x7c2   : > { %v3950_v20 = vrot.slane %v3948_v62, 7  ;;  %6739 = vmatpush1.bf16.msra.mxu1 %v6738_v4 }
 0x7c3   : > { %6741 = vmatprep.subr.bf16.mxu1 %v6740_v41 }
 0x7c4   : > { %v9665_v47 = vsel %vm3937_vm13, %v3936_v39, %v3950_v20  ;;  %vm4159_vm13 = vcmask 46080  }
 0x7c5   : > { %v3955_v16 = vsel %vm3954_vm14, %v9665_v47, 0.0 }
 0x7c6   : > { %3956 = vadd.xlane.f32.xlu1 %v3955_v16  ;;  %6743 = vmatpush1.bf16.msra.mxu1 %v6742_v45 }
 0x7c7   : > { %6745 = vmatprep.subr.bf16.mxu1 %v6744_v6 }
 0x7ca   : > { %6747 = vmatpush1.bf16.msra.mxu1 %v6746_v50 }
 0x7cb   : > { %6749 = vmatprep.subr.bf16.mxu1 %v6748_v22 }
 0x7ce   : > { %6751 = vmatpush1.bf16.msra.mxu1 %v6750_v5 }
 0x7cf   : > { %6172 = vmatprep.subr.mxu1 %v7195_v42 }
 0x853   : > { %v3957_v31 = vpop.xlane.xlu1 %3956 }
 0x854   : > { %v3959_v29 = vmul.f32 0.015625, %v3957_v31 }
 0x856   : > { %v3960_v1 = vsub.f32 %v9665_v47, %v3959_v29 }
 0x858   : > { %v3961_v61 = vmul.f32 %v3960_v1, %v3960_v1 }
 0x85a   : > { %v3962_v26 = vsel %vm3954_vm14, %v3961_v61, 0.0 }
 0x85b   : > { %3963 = vadd.xlane.f32.xlu0 %v3962_v26 }
 0x8e8   : > { %v3964_v49 = vpop.xlane.xlu0 %3963 }
 0x8e9   : > { %v3965_v36 = vmul.f32 0.015625, %v3964_v49 }
 0x8eb   : > { %v3966_v9 = vadd.f32 1e-05, %v3965_v36 }
 0x8ed   : > { %7096 = vrsqrt.f32 %v3966_v9 }
 0x8f7   : > { %v7097_v21 = vpop.eup %7096 }
 0x8f8   : > { %v3968_v52 = vmul.f32 %v7097_v21, %v3960_v1 }
 0x8fa   : > { %v3973_v25 = vmul.f32 %v3972_v44, %v3968_v52 }
 0x8fc   : > { %v3978_v17 = vadd.f32 %v3977_v3, %v3973_v25 }
 0x8fe   : > { %5436 = vmatmul.mubr.msk.f32.vlgmr.msra.gmra.mrb[52].mxu1 %vm1179_vm6, %v3978_v17 }
 0x8ff   : > { %6174 = vmatprep.mubr.msk.f32.mxu1 %vm7196_vm12, %v7195_v42 }
 0x9d1   : > { %v4076_v53 = vpop.f32.mrb[52].mxu1 }
 0x9d2   : > { %v4077_v11 = vadd.f32 %v4076_v53, %v4000_v8  ;;  %v4078_v15 = vpop.f32.mrb[53].mxu1 }
 0x9d3   : > { %v9747_v7 = vadd.f32 %v4078_v15, %v4004_v12 }
 0x9d4   : > { %4082 = vrot.lane.b32.xlu0 %v4077_v11, %s10118_s25  ;;  %s10128_s25 = smov 48  }
 0x9d8   : > { %4248 = vrot.lane.b32.xlu0 %v4077_v11, %s7197_s8 }
 0x9dc   : > { %4417 = vrot.lane.b32.xlu0 %v4077_v11, %s10119_s5 }
 0x9e0   : > { %4584 = vrot.lane.b32.xlu0 %v4077_v11, %s10127_s0 }
 0xa46   : > { %v4083_v30 = vpop.permute.xlu0 %4082 }
 0xa47   : > { %6173 = vmatpush3.xpose.msk.msra.mxu1 %vm1116_vm3, %v4083_v30 }
 0xa48   : > { %6177 = vmatprep.subr.mxu1 %v7195_v42 }
 0xa4a   : > { %6175 = vmatmul.mubr.msk.f32.vlgmr.msra.gmra.mrb[54].mxu1 %vm1116_vm3, %v4077_v11  ;;  %v4249_v37 = vpop.permute.xlu0 %4248 }
 0xa4b   : > { %6178 = vmatpush3.msk.msra.mxu1 %vm956_vm0, %v9747_v7  ;;  %6179 = vmatprep.mubr.msk.f32.mxu1 %vm7196_vm12, %v7195_v42 }
 0xa4c   : > { %6182 = vmatprep.subr.mxu1 %v7195_v42 }
 0xa4e   : > { %v4418_v38 = vpop.permute.xlu0 %4417 }
 0xa4f   : > { %6193 = vmatpush3.xpose.msk.msra.mxu0 %vm1116_vm3, %v4418_v38  ;;  %v4765_v38 = vld [vmem:[%s10050_s17 + $0x8] sm:$0xff] }
 0xa50   : > { %6202 = vmatprep.subr.mxu0 %v7195_v42 }
 0xa52   : > { %v4585_v29 = vpop.permute.xlu0 %4584 }
 0xb1d   : > { %v4154_v59 = vpop.f32.mrb[54].mxu1 }
 0xb1e   : > { %v4158_v18 = vmul.f32 0.25, %v4154_v59  ;;  %v6176_v57 = vpop.f32.mrb[55].mxu1  ;;  %v4766_v59 = vld [vmem:[%s10050_s17 + $0x10] sm:$0xff] }
 0xb20   : > { %v4160_v39 = vsel %vm4159_vm13, %v4158_v18, -inf }
 0xb21   : > { %4161 = vmax.xlane.f32.xlu1 %v4160_v39  ;;  %v4767_v39 = vld [vmem:[%s10050_s17 + $0x18] sm:$0xff] }
 0xb32   : > { %4250 = vrot.lane.b32.xlu1 %v4077_v11, %s10128_s25 }
 0xbae   : > { %v4162_v33 = vpop.xlane.xlu1 %4161 }
 0xbaf   : > { %v4163_v24 = vsub.f32 %v4158_v18, %v4162_v33  ;;  %v7199_v18 = vmov 0.0|0.0   ;;  %v6756_v33 = vpack.c.bf16 %v4767_v39, %v4766_v59  ;;  %v4979_v59 = vld [vmem:[%s10054_s21 + $0x30] sm:$0xff] }
 0xbb1   : > { %v4164_v46 = vmul.f32 1.442695, %v4163_v24  ;;  %v4768_v24 = vld [vmem:[%s10050_s17 + $0x20] sm:$0xff] }
 0xbb2   : > { %v4251_v20 = vpop.permute.xlu1 %4250 }
 0xbb3   : > { %7098 = vpow2.f32 %v4164_v46  ;;  %v4769_v46 = vld [vmem:[%s10050_s17 + $0x28] sm:$0xff] }
 0xbbd   : > { %v7099_v27 = vpop.eup %7098 }
 0xbbe   : > { %v4166_v62 = vsel %vm4159_vm13, %v7099_v27, 0.0 }
 0xbbf   : > { %4167 = vadd.xlane.f32.xlu1 %v4166_v62  ;;  %v4770_v62 = vld [vmem:[%s10050_s17 + $0x30] sm:$0xff] }
 0xbd0   : > { %4415 = vrot.lane.b32.xlu1 %v4077_v11, %s10129_s28 }
 0xbd4   : > { %4582 = vrot.lane.b32.xlu1 %v4077_v11, %s7198_s7 }
 0xc4c   : > { %v4168_v16 = vpop.xlane.xlu1 %4167 }
 0xc4d   : > { %7100 = vrcp.f32 %v4168_v16 }
 0xc50   : > { %v4416_v31 = vpop.permute.xlu1 %4415 }
 0xc51   : > { %6195 = vmatmul.mubr.msk.f32.vlgmr.msra.gmra.mrb[58].mxu0 %vm1116_vm3, %v4416_v31 }
 0xc52   : > { %6203 = vmatpush3.xpose.msk.msra.mxu0 %vm1116_vm3, %v4585_v29  ;;  %6204 = vmatprep.mubr.msk.f32.mxu0 %vm7196_vm12, %v7195_v42 }
 0xc53   : > { %6752 = vmatprep.subr.bf16.mxu0 %v7199_v18 }
 0xc54   : > { %v4583_v1 = vpop.permute.xlu1 %4582 }
 0xc55   : > { %6205 = vmatmul.mubr.msk.f32.vlgmr.msra.gmra.mrb[60].mxu0 %vm1116_vm3, %v4583_v1 }
 0xc56   : > { %6228 = vmatprep.mubr.msk.f32.mxu0 %vm7196_vm12, %v7195_v42 }
 0xc57   : > { %v7101_v61 = vpop.eup %7100 }
 0xc58   : > { %v4170_v26 = vmul.f32 %v7101_v61, %v7099_v27  ;;  %v6759_v27 = vpack.c.bf16 %v4769_v46, %v4768_v24  ;;  %v4982_v24 = vld [vmem:[%s10054_s21 + $0x48] sm:$0xff] }
 0xc5a   : > { %6180 = vmatmul.mubr.msk.f32.vlgmr.msra.gmra.mrb[56].mxu1 %vm4171_vm15, %v4170_v26 }
 0xc5b   : > { %6183 = vmatpush3.xpose.msk.msra.mxu1 %vm1116_vm3, %v4251_v20  ;;  %6184 = vmatprep.mubr.msk.f32.mxu1 %vm7196_vm12, %v7195_v42  ;;  %v4771_v20 = vld [vmem:[%s10050_s17 + $0x38] sm:$0xff] }
 0xc5c   : > { %6187 = vmatprep.subr.mxu1 %v7195_v42  ;;  %v6762_v16 = vpack.c.bf16 %v4771_v20, %v4770_v62  ;;  %v4984_v62 = vld [vmem:[%s10054_s21 + $0x58] sm:$0xff] }
 0xc5e   : > { %6185 = vmatmul.mubr.msk.f32.vlgmr.msra.gmra.mrb[58].mxu1 %vm1116_vm3, %v4249_v37  ;;  %v4764_v37 = vld [vmem:[%s10050_s17] sm:$0xff] }
 0xc5f   : > { %6189 = vmatprep.mubr.msk.f32.mxu1 %vm7196_vm12, %v7195_v42  ;;  %v6753_v57 = vpack.c.bf16 %v4765_v38, %v4764_v37  ;;  %v4975_v37 = vld [vmem:[%s10054_s21 + $0x10] sm:$0xff] }
 0xc61   : > { %6754 = vmatpush3.bf16.msra.mxu0 %v6753_v57  ;;  %v4980_v57 = vld [vmem:[%s10054_s21 + $0x38] sm:$0xff] }
 0xc62   : > { %6755 = vmatprep.subr.bf16.mxu0 %v7199_v18  ;;  %v6786_v39 = vpack.c.bf16 %v4980_v57, %v4979_v59 }
 0xc65   : > { %6757 = vmatpush3.bf16.msra.mxu0 %v6756_v33  ;;  %v4981_v33 = vld [vmem:[%s10054_s21 + $0x40] sm:$0xff] }
 0xc66   : > { %6758 = vmatprep.subr.bf16.mxu0 %v7199_v18  ;;  %v6789_v46 = vpack.c.bf16 %v4982_v24, %v4981_v33 }
 0xc69   : > { %6760 = vmatpush3.bf16.msra.mxu0 %v6759_v27  ;;  %v4983_v27 = vld [vmem:[%s10054_s21 + $0x50] sm:$0xff] }
 0xc6a   : > { %6761 = vmatprep.subr.bf16.mxu0 %v7199_v18  ;;  %v6792_v20 = vpack.c.bf16 %v4984_v62, %v4983_v27 }
 0xc6d   : > { %6763 = vmatpush3.bf16.msra.mxu0 %v6762_v16  ;;  %v4985_v16 = vld [vmem:[%s10054_s21 + $0x60] sm:$0xff] }
 0xc6e   : > { %6776 = vmatprep.subr.bf16.mxu0 %v7199_v18 }
 0xd24   : > { %v4489_v2 = vpop.f32.mrb[58].mxu0 }
 0xd25   : > { %v4493_v28 = vmul.f32 0.25, %v4489_v2  ;;  %v6196_v35 = vpop.f32.mrb[59].mxu0 }
 0xd27   : > { %v4494_v10 = vsel %vm4159_vm13, %v4493_v28, -inf }
 0xd28   : > { %4495 = vmax.xlane.f32.xlu1 %v4494_v10  ;;  %v4656_v48 = vpop.f32.mrb[60].mxu0 }
 0xd29   : > { %v6206_v4 = vpop.f32.mrb[61].mxu0  ;;  %v4660_v45 = vmul.f32 0.25, %v4656_v48 }
 0xd2b   : > { %v4661_v60 = vsel %vm4159_vm13, %v4660_v45, -inf }
 0xd2d   : > { %v9778_v13 = vpop.f32.mrb[56].mxu1 }
 0xd2e   : > { %v6181_v54 = vpop.f32.mrb[57].mxu1 }
 0xd31   : > { %v4322_v41 = vpop.f32.mrb[58].mxu1 }
 0xd32   : > { %v4326_v14 = vmul.f32 0.25, %v4322_v41  ;;  %v6186_v58 = vpop.f32.mrb[59].mxu1  ;;  %v5453_v41 = vld [vmem:[%s10051_s18] ss:$0 sm:$0xff] }
 0xd34   : > { %v4327_v19 = vsel %vm4159_vm13, %v4326_v14, -inf }
 0xd35   : > { %4328 = vmax.xlane.f32.xlu0 %v4327_v19 }
 0xd39   : > { %4662 = vmax.xlane.f32.xlu0 %v4661_v60 }
 0xdb5   : > { %v4496_v34 = vpop.xlane.xlu1 %4495 }
 0xdb6   : > { %v4497_v6 = vsub.f32 %v4493_v28, %v4496_v34 }
 0xdb8   : > { %v4498_v55 = vmul.f32 1.442695, %v4497_v6 }
 0xdba   : > { %7102 = vpow2.f32 %v4498_v55 }
 0xdc2   : > { %v4329_v32 = vpop.xlane.xlu0 %4328 }
 0xdc3   : > { %v4330_v50 = vsub.f32 %v4326_v14, %v4329_v32 }
 0xdc4   : > { %v7103_v56 = vpop.eup %7102 }
 0xdc5   : > { %v4500_v22 = vsel %vm4159_vm13, %v7103_v56, 0.0  ;;  %v4331_v5 = vmul.f32 1.442695, %v4330_v50 }
 0xdc6   : > { %4501 = vadd.xlane.f32.xlu1 %v4500_v22  ;;  %v4663_v23 = vpop.xlane.xlu0 %4662  ;;  %v4878_v22 = vld [vmem:[%s10052_s19 + $0x10] sm:$0xff] }
 0xdc7   : > { %v4664_v43 = vsub.f32 %v4660_v45, %v4663_v23  ;;  %v4879_v23 = vld [vmem:[%s10052_s19 + $0x18] sm:$0xff] }
 0xdc9   : > { %v4665_v49 = vmul.f32 1.442695, %v4664_v43  ;;  %v6768_v43 = vpack.c.bf16 %v4879_v23, %v4878_v22 }
 0xdcb   : > { %7104 = vpow2.f32 %v4665_v49  ;;  %v4881_v49 = vld [vmem:[%s10052_s19 + $0x28] sm:$0xff] }
 0xdcc   : > { %7106 = vpow2.f32 %v4331_v5  ;;  %v4880_v5 = vld [vmem:[%s10052_s19 + $0x20] sm:$0xff] }
 0xdd5   : > { %v7105_v36 = vpop.eup %7104 }
 0xdd6   : > { %v4667_v9 = vsel %vm4159_vm13, %v7105_v36, 0.0  ;;  %v7107_v44 = vpop.eup %7106 }
 0xdd7   : > { %4338 = vrot.lane.b32.xlu1 %v9747_v7, %s7197_s8  ;;  %4668 = vadd.xlane.f32.xlu0 %v4667_v9  ;;  %v4333_v21 = vsel %vm4159_vm13, %v7107_v44, 0.0  ;;  %v4882_v9 = vld [vmem:[%s10052_s19 + $0x30] sm:$0xff] }
 0xddb   : > { %4672 = vrot.lane.b32.xlu1 %v9747_v7, %s7198_s7  ;;  %4334 = vadd.xlane.f32.xlu0 %v4333_v21  ;;  %s7200_s7 = smov [#allocation2]  }
 0xddc   : > { %s7130_s29 = sshll.u32 %s7200_s7, 4  ;;  %s7131_s29 = int_to_ptr.vmem [resolvable:$false] %s7130_s29 }
 0xdf1   : > { %4505 = vrot.lane.b32.xlu0 %v9747_v7, %s10129_s28 }
 0xe53   : > { %v4502_v52 = vpop.xlane.xlu1 %4501 }
 0xe57   : > { %v4339_v3 = vpop.permute.xlu1 %4338 }
 0xe58   : > { %6188 = vmatpush3.msk.msra.mxu1 %vm956_vm0, %v4339_v3  ;;  %v4974_v3 = vld [vmem:[%s10054_s21 + $0x8] sm:$0xff] }
 0xe59   : > { %6197 = vmatprep.subr.mxu1 %v7195_v42 }
 0xe5b   : > { %v4673_v30 = vpop.permute.xlu1 %4672 }
 0xe64   : > { %v4669_v25 = vpop.xlane.xlu0 %4668 }
 0xe68   : > { %v4335_v17 = vpop.xlane.xlu0 %4334 }
 0xe69   : > { %7108 = vrcp.f32 %v4335_v17 }
 0xe6a   : > { %7110 = vrcp.f32 %v4502_v52  ;;  %v4973_v52 = vld [vmem:[%s10054_s21] sm:$0xff] }
 0xe6b   : > { %7112 = vrcp.f32 %v4669_v25  ;;  %v6777_v25 = vpack.c.bf16 %v4974_v3, %v4973_v52  ;;  %v5075_v52 = vld [vmem:[%s10057_s24] sm:$0x1] }
 0xe6c   : > { %v4506_v11 = vpop.permute.xlu0 %4505 }
 0xe73   : > { %v7109_v0 = vpop.eup %7108 }
 0xe74   : > { %v4337_v8 = vmul.f32 %v7109_v0, %v7107_v44  ;;  %v7111_v53 = vpop.eup %7110  ;;  %v4883_v44 = vld [vmem:[%s10052_s19 + $0x38] sm:$0xff] }
 0xe75   : > { %v4504_v15 = vmul.f32 %v7111_v53, %v7103_v56  ;;  %v7113_v12 = vpop.eup %7112  ;;  %v4876_v56 = vld [vmem:[%s10052_s19] sm:$0xff]  ;;  %v6774_v21 = vpack.c.bf16 %v4883_v44, %v4882_v9  ;;  %v4869_v53 = vrot.slane %v9725_v40, %v8542_v51  ;;  %v4976_v51 = vld [vmem:[%s10054_s21 + $0x18] sm:$0xff] }
 0xe76   : > { %6190 = vmatmul.mubr.msk.f32.vlgmr.msra.gmra.mrb[60].mxu1 %vm4171_vm15, %v4337_v8  ;;  %v4671_v7 = vmul.f32 %v7113_v12, %v7105_v36  ;;  %v6771_v36 = vpack.c.bf16 %v4881_v49, %v4880_v5  ;;  %v6780_v38 = vpack.c.bf16 %v4976_v51, %v4975_v37  ;;  %v5457_v49 = vld [vmem:[%s10055_s22] ss:$0 sm:$0xff] }
 0xe77   : > { %6198 = vmatpush3.msk.msra.mxu1 %vm956_vm0, %v4506_v11  ;;  %6199 = vmatprep.mubr.msk.f32.mxu1 %vm7196_vm12, %v7195_v42 }
 0xe78   : > { %6207 = vmatprep.subr.mxu1 %v7195_v42 }
 0xe7a   : > { %6200 = vmatmul.mubr.msk.f32.vlgmr.msra.gmra.mrb[62].mxu1 %vm4171_vm15, %v4504_v15  ;;  %v4874_v15 = vrot.slane %v9725_v40, %v9181_v63  ;;  %v4977_v63 = vld [vmem:[%s10054_s21 + $0x20] sm:$0xff] }
 0xe7b   : > { %6208 = vmatpush3.msk.msra.mxu1 %vm956_vm0, %v4673_v30  ;;  %6209 = vmatprep.mubr.msk.f32.mxu1 %vm7196_vm12, %v7195_v42  ;;  %vm5149_vm0 = vcmask 16384  }
 0xe7c   : > { %6764 = vmatprep.subr.bf16.mxu1 %v7199_v18 }
 0xe7e   : > { %6210 = vmatmul.mubr.msk.f32.vlgmr.msra.gmra.mrb[64].mxu1 %vm4171_vm15, %v4671_v7 }
 0xe7f   : > { %6247 = vmatprep.mubr.msk.f32.mxu1 %vm7196_vm12, %v7195_v42 }
 0xf49   : > { %v4411_v31 = vpop.f32.mrb[60].mxu1 }
 0xf4a   : > { %4750 = vrot.lane.b32.xlu1 %v4411_v31, %s10127_s0  ;;  %v6191_v29 = vpop.f32.mrb[61].mxu1  ;;  %v4986_v31 = vld [vmem:[%s10054_s21 + $0x68] sm:$0xff]  ;;  %s5459_s0 = sshll.u32 %s10131_s2, 4 }
 0xf4b   : > { %v6795_v29 = vpack.c.bf16 %v4986_v31, %v4985_v16  ;;  %s9990_s27 = scalar_lea.hbm %s10133_s3, %s5459_s0 }
 0xf4d   : > { %v4578_v1 = vpop.f32.mrb[62].mxu1 }
 0xf4e   : > { %4754 = vrot.lane.b32.xlu0 %v4578_v1, %s10119_s5  ;;  %v6201_v61 = vpop.f32.mrb[63].mxu1  ;;  %v4987_v1 = vld [vmem:[%s10054_s21 + $0x70] sm:$0xff]  ;;  %s815_s5 = sand.u32 1, %s10130_s26   ;;  %s7132_s26 = scalar_lea.vmem %s7131_s29, 32 }
 0xf4f   : > { %v4988_v61 = vld [vmem:[%s10054_s21 + $0x78] sm:$0xff]  ;;  %s5163_s8 = scalar_lea.sflag [#allocation3], %s815_s5 }
 0xf51   : > { %v4745_v26 = vpop.f32.mrb[64].mxu1 }
 0xf52   : > { %4758 = vrot.lane.b32.xlu1 %v4745_v26, %s10128_s25  ;;  %v6211_v2 = vpop.f32.mrb[65].mxu1  ;;  %v6798_v26 = vpack.c.bf16 %v4988_v61, %v4987_v1  ;;  %s816_s25 = scalar_lea.vmem [#allocation2], %s815_s5 }
 0xf53   : > { %v5067_v2 = vld [vmem:[%s10056_s23] sm:$0xff]  ;;  %s5175_s1 = sshll.u32 %s816_s25, 4  ;;  %s9992_s1 = int_to_ptr.vmem [resolvable:$true] %s5175_s1 }
 0xf54   : > { %s7126_s28 = scalar_lea.vmem %s9992_s1, 16  ;;  %p7133_p0 = scmp.lt.s32.totalorder %s9992_s1, %s7131_s29 }
 0xf55   : > { %p7127_p11 = scmp.ne.s32.totalorder %s9992_s1, %s7126_s28  ;;  %p7134_p1 = scmp.lt.s32.totalorder %s7132_s26, %s7126_s28 }
 0xf57   : > { %p7128_p12 = pnand %p7127_p11, %p7369_p5  ;;  %p7135_p2 = por %p7134_p1, %p7133_p0 }
 0xf59   : > { %p7129_p13 = pneg %p7128_p12 }
 0xf5b   : > { %p7136_p3 = pnand %p7135_p2, %p7129_p13 }
 0xfbc   : > { %v4751_v28 = vpop.permute.xlu1 %4750 }
 0xfbd   : > { %v4761_v10 = vsel %vm1116_vm3, %v9778_v13, %v4751_v28  ;;  %v5068_v28 = vld [vmem:[%s10056_s23 + $0x8] sm:$0xff] }
 0xfc0   : > { %v4755_v35 = vpop.permute.xlu0 %4754 }
 0xfc1   : > { %v4762_v48 = vsel %vm1133_vm4, %v4761_v10, %v4755_v35  ;;  %v5069_v35 = vld [vmem:[%s10056_s23 + $0x10] sm:$0xff]  ;;  %v6801_v10 = vpack.c.bf16 %v5068_v28, %v5067_v2 }
 0xfc4   : > { %v4759_v4 = vpop.permute.xlu1 %4758 }
 0xfc5   : > { %v4763_v54 = vsel %vm1150_vm5, %v4762_v48, %v4759_v4  ;;  %v5070_v48 = vld [vmem:[%s10056_s23 + $0x18] sm:$0xff] }
 0xfc6   : > { %6229 = vmatmul.mubr.msk.f32.vlgmr.msra.gmra.mrb[62].mxu0 %vm1179_vm6, %v4763_v54  ;;  %v6804_v4 = vpack.c.bf16 %v5070_v48, %v5069_v35  ;;  %v5071_v54 = vld [vmem:[%s10056_s23 + $0x20] sm:$0xff] }
 0xfc7   : > { %6282 = vmatprep.mubr.msk.f32.mxu0 %vm7196_vm12, %v7195_v42  ;;  %6778 = vmatpush3.bf16.msra.mxu0 %v6777_v25 }
 0xfc8   : > { %6779 = vmatprep.subr.bf16.mxu0 %v7199_v18 }
 0xfcb   : > { %6781 = vmatpush3.bf16.msra.mxu0 %v6780_v38 }
 0xfcc   : > { %6782 = vmatprep.subr.bf16.mxu0 %v7199_v18 }
0x1099   : > { %v4848_v14 = vpop.f32.mrb[62].mxu0 }
0x109a   : > { %v4849_v58 = vadd.f32 %v5453_v41, %v4848_v14  ;;  %v6230_v45 = vpop.f32.mrb[63].mxu0  ;;  %v5072_v41 = vld [vmem:[%s10056_s23 + $0x28] sm:$0xff] }
0x109b   : > { %v6807_v14 = vpack.c.bf16 %v5072_v41, %v5071_v54 }
0x109c   : > { %v9849_v19 = vadd.f32 %v4849_v58, %v9665_v47  ;;  %v4877_v47 = vld [vmem:[%s10052_s19 + $0x8] sm:$0xff]  ;;  %v5455_v58 = vld [vmem:[%s10053_s20] ss:$0 sm:$0xff] }
0x109d   : > { %v6765_v50 = vpack.c.bf16 %v4877_v47, %v4876_v56 }
0x109e   : > { %v4853_v13 = vsel %vm3954_vm14, %v9849_v19, 0.0 }
0x109f   : > { %4854 = vadd.xlane.f32.xlu0 %v4853_v13  ;;  %6766 = vmatpush3.bf16.msra.mxu1 %v6765_v50 }
0x10a0   : > { %6767 = vmatprep.subr.bf16.mxu1 %v7199_v18 }
0x10a3   : > { %6769 = vmatpush3.bf16.msra.mxu1 %v6768_v43  ;;  %v5074_v43 = vld [vmem:[%s10056_s23 + $0x38] sm:$0xff] }
0x10a4   : > { %6770 = vmatprep.subr.bf16.mxu1 %v7199_v18 }
0x10a7   : > { %6772 = vmatpush3.bf16.msra.mxu1 %v6771_v36 }
0x10a8   : > { %6773 = vmatprep.subr.bf16.mxu1 %v7199_v18 }
0x10ab   : > { %6775 = vmatpush3.bf16.msra.mxu1 %v6774_v21 }
0x10ac   : > { %6800 = vmatprep.subr.bf16.mxu1 %v7199_v18 }
0x112c   : > { %v4855_v60 = vpop.xlane.xlu0 %4854 }
0x112d   : > { %v4856_v34 = vmul.f32 0.015625, %v4855_v60 }
0x112f   : > { %v4857_v6 = vsub.f32 %v9849_v19, %v4856_v34 }
0x1131   : > { %v4858_v55 = vmul.f32 %v4857_v6, %v4857_v6 }
0x1133   : > { %v4859_v32 = vsel %vm3954_vm14, %v4858_v55, 0.0 }
0x1134   : > { %4860 = vadd.xlane.f32.xlu1 %v4859_v32 }
0x11c1   : > { %v4861_v17 = vpop.xlane.xlu1 %4860 }
0x11c2   : > { %v4862_v0 = vmul.f32 0.015625, %v4861_v17 }
0x11c4   : > { %v4863_v8 = vadd.f32 1e-05, %v4862_v0 }
0x11c6   : > { %7114 = vrsqrt.f32 %v4863_v8 }
0x11d0   : > { %v7115_v11 = vpop.eup %7114 }
0x11d1   : > { %v4865_v12 = vmul.f32 %v7115_v11, %v4857_v6 }
0x11d3   : > { %v4870_v30 = vmul.f32 %v4869_v53, %v4865_v12 }
0x11d5   : > { %v4875_v7 = vadd.f32 %v4874_v15, %v4870_v30 }
0x11d7   : > { %6248 = vmatmul.mubr.msk.f32.vlgmr.msra.gmra.mrb[66].mxu1 %vm1179_vm6, %v4875_v7 }
0x11d8   : > { %6301 = vmatprep.mubr.msk.f32.mxu1 %vm7196_vm12, %v7195_v42  ;;  %v4978_v42 = vld [vmem:[%s10054_s21 + $0x28] sm:$0xff]  ;;  %6802 = vmatpush3.bf16.msra.mxu1 %v6801_v10 }
0x11d9   : > { %v6783_v40 = vpack.c.bf16 %v4978_v42, %v4977_v63  ;;  %6803 = vmatprep.subr.bf16.mxu1 %v7199_v18 }
0x11db   : > { %6784 = vmatpush3.bf16.msra.mxu0 %v6783_v40 }
0x11dc   : > { %6785 = vmatprep.subr.bf16.mxu0 %v7199_v18  ;;  %6805 = vmatpush3.bf16.msra.mxu1 %v6804_v4 }
0x11dd   : > { %6806 = vmatprep.subr.bf16.mxu1 %v7199_v18 }
0x11df   : > { %6787 = vmatpush3.bf16.msra.mxu0 %v6786_v39 }
0x11e0   : > { %6788 = vmatprep.subr.bf16.mxu0 %v7199_v18  ;;  %6808 = vmatpush3.bf16.msra.mxu1 %v6807_v14 }
0x11e1   : > { %6809 = vmatprep.subr.bf16.mxu1 %v7199_v18 }
0x11e3   : > { %6790 = vmatpush3.bf16.msra.mxu0 %v6789_v46 }
0x11e4   : > { %6791 = vmatprep.subr.bf16.mxu0 %v7199_v18 }
0x11e7   : > { %6793 = vmatpush3.bf16.msra.mxu0 %v6792_v20 }
0x11e8   : > { %6794 = vmatprep.subr.bf16.mxu0 %v7199_v18 }
0x11eb   : > { %6796 = vmatpush3.bf16.msra.mxu0 %v6795_v29 }
0x11ec   : > { %6797 = vmatprep.subr.bf16.mxu0 %v7199_v18  ;;  %v5073_v18 = vld [vmem:[%s10056_s23 + $0x30] sm:$0xff] }
0x11ed   : > { %v6810_v5 = vpack.c.bf16 %v5074_v43, %v5073_v18 }
0x11ef   : > { %6799 = vmatpush3.bf16.msra.mxu0 %v6798_v26  ;;  %6811 = vmatpush3.bf16.msra.mxu1 %v6810_v5 }
0x12aa   : > { %v4960_v45 = vpop.f32.mrb[66].mxu1 }
0x12ab   : > { %v4961_v13 = vadd.f32 %v5455_v58, %v4960_v45  ;;  %v6249_v60 = vpop.f32.mrb[67].mxu1 }
0x12ad   : > { %v4965_v34 = vmul.f32 0.044715, %v4961_v13  ;;  %v4964_v50 = vmul.f32 0.5, %v4961_v13 }
0x12af   : > { %v4966_v6 = vmul.f32 %v4965_v34, %v4961_v13 }
0x12b1   : > { %v4967_v55 = vmul.f32 %v4966_v6, %v4961_v13 }
0x12b3   : > { %v4968_v32 = vadd.f32 %v4967_v55, %v4961_v13 }
0x12b5   : > { %v4969_v56 = vmul.f32 0.7978846, %v4968_v32 }
0x12b7   : > { %7116 = vtanh.f32 %v4969_v56 }
0x12c1   : > { %v7117_v47 = vpop.eup %7116 }
0x12c2   : > { %v4971_v22 = vadd.f32 1.0, %v7117_v47 }
0x12c4   : > { %v4972_v23 = vmul.f32 %v4971_v22, %v4964_v50 }
0x12c6   : > { %6283 = vmatmul.mubr.f32.vlgmr.msra.gmra.mrb[64].mxu0 %v4972_v23 }
0x1399   : > { %v5062_v36 = vpop.f32.mrb[64].mxu0 }
0x139a   : > { %v5063_v9 = vadd.f32 %v5457_v49, %v5062_v36  ;;  %v6284_v44 = vpop.f32.mrb[65].mxu0 }
0x139c   : > { %v5066_v21 = vadd.f32 %v5063_v9, %v9849_v19 }
0x139e   : > { %6302 = vmatmul.mubr.msk.f32.vlgmr.msra.gmra.mrb[68].mxu1 %vm1179_vm6, %v5066_v21 }
0x1471   : > { %v5145_v3 = vpop.f32.mrb[68].mxu1 }
0x1472   : > { %v5146_v25 = vadd.f32 %v5145_v3, %v5075_v52  ;;  %v6303_v17 = vpop.f32.mrb[69].mxu1 }
0x1474   : > { %v5150_v0 = vsel %vm5149_vm0, %v5146_v25, -inf }
0x1475   : > { %5151 = vmax.xlane.f32.xlu0 %v5150_v0 }
0x1502   : > { %v5152_v8 = vpop.xlane.xlu0 %5151 }
0x1503   : > { %v5153_v53 = vsub.f32 %v5146_v25, %v5152_v8 }
0x1505   : > { %v5154_v11 = vmul.f32 1.442695, %v5153_v53 }
0x1507   : > { %7118 = vpow2.f32 %v5154_v11 }
0x1511   : > { %v7119_v19 = vpop.eup %7118 }
0x1512   : > { %v5156_v15 = vsel %vm5149_vm0, %v7119_v19, 0.0 }
0x1513   : > { %5157 = vadd.xlane.f32.xlu0 %v5156_v15 }
0x15a0   : > { %v5158_v12 = vpop.xlane.xlu0 %5157 }
0x15a1   : > { %7120 = vrcp.f32 %v5158_v12 }
0x15ab   : > { %v7121_v30 = vpop.eup %7120 }
0x15ac   : > { %v5160_v7 = vmul.f32 %v7121_v30, %v7119_v19 }
0x15ae   : > { %5161 = vst.msk [vmem:[%s816_s25] sm:$0x1] %vm5149_vm0, %v5160_v7 }
0x15af   : > { %7139 = shalt.err (!%p7136_p3)
}
0x15b0   : > { %s7140_s2 = scalar_lea.hbm %s9990_s27, 16  ;;  %s7144_s25 = scalar_lea.hbm %s10133_s3, 32 }
0x15b1   : > { %p7141_p4 = scmp.ne.s32.totalorder %s9990_s27, %s7140_s2  ;;  %p7145_p9 = scmp.lt.u32.totalorder %s9990_s27, %s10133_s3 }
0x15b2   : > { %p7146_p10 = scmp.lt.u32.totalorder %s7144_s25, %s7140_s2  ;;  %p7148_p12 = scmp.lt.u32.totalorder %s7140_s2, %s9990_s27 }
0x15b3   : > { %p7142_p7 = pnand %p7141_p4, %p7369_p5 }
0x15b4   : > { %p7147_p11 = por %p7146_p10, %p7145_p9 }
0x15b5   : > { %p7143_p8 = pneg %p7142_p7 }
0x15b6   : > { %p7149_p13 = por %p7148_p12, %p7147_p11 }
0x15b8   : > { %p7150_p0 = pnand %p7149_p13, %p7143_p8 }
0x15ba   : > { %7153 = shalt.err (!%p7150_p0)
}
0x15bb   : > { %6812 = dma.vmem_to_hbm [thread:$0]  (%p7369_p5), %s9992_s1, 16, %s9990_s27, %s5163_s8  }
0x15bc PF: > { %s10134_s28 = sld [smem:[#allocation8_spill]]  ;;  %s10135_s7 = sld [smem:[#allocation5_spill]] }
0x15c2   : > { %p6818_p1 = scmp.ge.s32.totalorder %s10134_s28, 2  ;;  %s5187_s26 = sand.u32 1, %s10135_s7  }
0x15c3   : > { %s5188_s5 = scalar_lea.sflag [#allocation3], %s5187_s26 }
0x15c4   : > { %p6815_p2 = pnand %p6818_p1, %p7373_p6 }
0x15c6   : > { %7171 = dma.done.wait (!%p6815_p2), %s5188_s5, 16  }
0x15c7   : > { %7173 = vsyncadd (!%p6815_p2), %s5188_s5, 4294967280  ;;  %s10137_s30 = sld [smem:[#allocation10_spill]]  ;;  %s10138_s29 = sld [smem:[#allocation6_spill]] }
0x15c8   : > { %s10139_s2 = sld [smem:[#allocation7_spill]]  ;;  %s10140_s6 = sld [smem:[#allocation11_spill]] }
0x15cd   : > { %p35_p3 = scmp.ge.s32.totalorder %s10137_s30, 4  }
0x15cf   :  { %37 = sbr.rel (!%p35_p3) target bundleno = 15 (0xf), region = 171 }
0x15d6   :  { %5192 = vsyncpa [#allocation3], 1 }
0x15d7   :  { %5194 = vsyncpa [#allocation3 + $0x1], 1 }

</bundles_post_ra>
